<compile_context>
chip_gen: v7x
topology: tpu7x:2x2x1
jax: 0.10.0
libtpu: 0.0.40
codegen_flags: <defaults>
</compile_context>

<pallas_src>
import jax
import jax.numpy as jnp
from jax import lax
from jax.experimental import pallas as pl
from jax.experimental.pallas import tpu as pltpu


def _residual_block_kernel(xpad_ref, w1_ref, w2aug_ref, out_ref):
    # xpad_ref  : (Nb, H+2, W+2, C)  zero-padded NHWC input block
    # w1_ref    : (9*C, C)           conv1 weights, row index = (kh*3 + kw)*C + ci
    # w2aug_ref : (2*C, 10*C)        [[w2^T, 0], [0, I_C]]  (see wrapper)
    # out_ref   : (Nb, C, H*W)       channel-major, lane-dense output block
    Nb, Hp2, Wp2, C = xpad_ref.shape
    H, W = Hp2 - 2, Wp2 - 2
    HW = H * W

    def cat(parts, axis):
        return parts[0] if len(parts) == 1 else jnp.concatenate(parts, axis=axis)

    def im2col(src):
        # src: (H+2, W+2, C) value -> (H*W, 9*C) patch matrix built as a value
        # (no scratch staging / reload round trip; one fat MXU contraction).
        return cat([src[kh:kh + H, kw:kw + W, :].reshape(HW, C)
                    for kh in range(3) for kw in range(3)], axis=1)

    # ---- conv1 (norm1 = Identity) + ReLU: all Nb images stacked along matmul M ----
    p1_list, ident_list = [], []
    for i in range(Nb):
        p = im2col(xpad_ref[i])
        p1_list.append(p)
        # Centre tap (kh=1, kw=1) of the padded image is exactly the original input:
        # reuse it as the residual branch (no second HBM input stream).
        ident_list.append(p[:, 4 * C:5 * C])
    p1 = cat(p1_list, axis=0)                                   # (Nb*HW, 9C)
    h1 = jnp.maximum(
        jnp.dot(p1, w1_ref[...], preferred_element_type=jnp.float32), 0.0)

    # ---- conv2 (norm2 = Identity) + ReLU + residual add ----
    # Zero-halo the ReLU output at trace time (value concatenation, no padded VMEM
    # scratch), im2col again, and append the identity as a 10th "tap".  w2aug carries
    # an identity block, so one transposed matmul yields, lane-dense and channel-major:
    #   rows 0:C   -> conv2(h1)            (pre-ReLU)
    #   rows C:2C  -> the residual input x (exact)
    zrow = jnp.zeros((1, W, C), jnp.float32)
    zcol = jnp.zeros((Hp2, 1, C), jnp.float32)
    p2_list = []
    for i in range(Nb):
        h1_i = h1[i * HW:(i + 1) * HW, :].reshape(H, W, C)
        h1p = cat([zrow, h1_i, zrow], axis=0)                   # (H+2, W,   C)
        h1p = cat([zcol, h1p, zcol], axis=1)                    # (H+2, W+2, C)
        p2_list.append(jnp.concatenate([im2col(h1p), ident_list[i]], axis=1))
    p2 = cat(p2_list, axis=0)                                   # (Nb*HW, 10C)

    zi = lax.dot_general(w2aug_ref[...], p2,
                         (((1,), (1,)), ((), ())),
                         preferred_element_type=jnp.float32)    # (2C, Nb*HW)
    res = jnp.maximum(zi[:C, :], 0.0) + zi[C:, :]               # relu(conv2) + x

    for i in range(Nb):
        out_ref[i] = res[:, i * HW:(i + 1) * HW].astype(out_ref.dtype)


def residual_block(x_nchw, w1_oihw, w2_oihw, *, images_per_step=1):
    """x_nchw: (N, C, H, W) float32; weights: (Cout, Cin, 3, 3). Returns (N, C, H, W)."""
    N, C, H, W = x_nchw.shape
    assert w1_oihw.shape == (C, C, 3, 3) and w2_oihw.shape == (C, C, 3, 3)
    Nb = images_per_step
    assert N % Nb == 0, "images_per_step must divide the batch"

    # One-time wrapper glue: NCHW -> NHWC + spatial zero pad for the conv windows.
    x = jnp.transpose(x_nchw, (0, 2, 3, 1)).astype(jnp.float32)
    x_pad = jnp.pad(x, ((0, 0), (1, 1), (1, 1), (0, 0)))

    # conv1: (Cout, Cin, kh, kw) -> (kh, kw, ci, co) -> (9*C, C); row = (kh*3+kw)*C + ci.
    w1 = jnp.transpose(w1_oihw, (2, 3, 1, 0)).reshape(9 * C, C).astype(jnp.float32)
    # conv2: pre-transposed (C, 9C), col = (kh*3+kw)*C + ci, then augmented with an
    # identity block so the kernel's single transposed matmul also emits the residual
    # branch channel-major: w2aug = [[w2^T, 0], [0, I_C]]  -> (2C, 10C).
    w2t = jnp.transpose(w2_oihw, (0, 2, 3, 1)).reshape(C, 9 * C).astype(jnp.float32)
    w2aug = jnp.concatenate(
        [jnp.concatenate([w2t, jnp.zeros((C, C), jnp.float32)], axis=1),
         jnp.concatenate([jnp.zeros((C, 9 * C), jnp.float32),
                          jnp.eye(C, dtype=jnp.float32)], axis=1)], axis=0)

    out_flat = pl.pallas_call(
        _residual_block_kernel,
        out_shape=jax.ShapeDtypeStruct((N, C, H * W), jnp.float32),
        grid_spec=pltpu.PrefetchScalarGridSpec(
            num_scalar_prefetch=0,
            grid=(N // Nb,),
            in_specs=[
                pl.BlockSpec((Nb, H + 2, W + 2, C), lambda n: (n, 0, 0, 0)),
                pl.BlockSpec((9 * C, C), lambda n: (0, 0)),          # block-invariant
                pl.BlockSpec((2 * C, 10 * C), lambda n: (0, 0)),     # block-invariant
            ],
            out_specs=pl.BlockSpec((Nb, C, H * W), lambda n: (n, 0, 0)),
        ),
        # Batch images are independent -> parallel (shards grid steps across TCs on v7x).
        compiler_params=pltpu.CompilerParams(
            dimension_semantics=("parallel",)),
        # For realistic H, W, C: add a row-tiled spatial grid axis and set
        # vmem_limit_bytes against v7x's 64 MiB VMEM; irrelevant at this toy size.
    )(x_pad, w1, w2aug)

    # (N, C, H*W) -> (N, C, H, W): pure reshape, no transpose needed anymore.
    return out_flat.reshape(N, C, H, W)


def _reference(x_nchw, w1_oihw, w2_oihw):
    """Pure-JAX reference matching the PyTorch ResidualBlock forward (NCHW)."""
    dn = lax.conv_dimension_numbers(x_nchw.shape, w1_oihw.shape,
                                    ("NCHW", "OIHW", "NCHW"))
    h = lax.conv_general_dilated(x_nchw, w1_oihw, (1, 1), ((1, 1), (1, 1)),
                                 dimension_numbers=dn)
    h = jnp.maximum(h, 0.0)
    h = lax.conv_general_dilated(h, w2_oihw, (1, 1), ((1, 1), (1, 1)),
                                 dimension_numbers=dn)
    h = jnp.maximum(h, 0.0)
    return h + x_nchw


if __name__ == "__main__":
    # Small shapes: batch=2, channels=4 (in == out for the residual add), spatial=16.
    N, C, H, W = 2, 4, 16, 16
    key = jax.random.PRNGKey(0)
    kx, k1, k2 = jax.random.split(key, 3)
    x = jax.random.normal(kx, (N, C, H, W), dtype=jnp.float32)
    # Deterministic synthetic weights, PyTorch-style (Cout, Cin, 3, 3), no bias.
    w1 = jax.random.normal(k1, (C, C, 3, 3), dtype=jnp.float32) * 0.1
    w2 = jax.random.normal(k2, (C, C, 3, 3), dtype=jnp.float32) * 0.1

    out = jax.block_until_ready(residual_block(x, w1, w2))
    ref = _reference(x, w1, w2)
    assert out.shape == (N, C, H, W)
    assert jnp.allclose(out, ref, atol=1e-4, rtol=1e-4), "mismatch vs reference"
    print("KERNEL_OK")
</pallas_src>

<mosaic_0001>
module attributes {stable_mosaic.version = 11 : i64} {
  func.func @_residual_block_kernel(%arg0: i32, %arg1: memref<1x18x18x4xf32, #tpu.memory_space<vmem>>, %arg2: memref<36x4xf32, #tpu.memory_space<vmem>>, %arg3: memref<8x40xf32, #tpu.memory_space<vmem>>, %arg4: memref<1x4x256xf32, #tpu.memory_space<vmem>>) attributes {dimension_semantics = [#tpu.dimension_semantics<parallel>], iteration_bounds = array<i64: 2>, scalar_prefetch = 0 : i64, scratch_operands = 0 : i64, tpu.core_type = #tpu.core_type<tc>, window_params = [{transform_indices = @transform_0, window_bounds = array<i64: 1, 18, 18, 4>}, {pipeline_mode = #tpu.pipeline_mode<synchronous>, transform_indices = @transform_1, window_bounds = array<i64: 36, 4>}, {pipeline_mode = #tpu.pipeline_mode<synchronous>, transform_indices = @transform_2, window_bounds = array<i64: 8, 40>}, {transform_indices = @transform_3, window_bounds = array<i64: 1, 4, 256>}]} {
    %c0 = arith.constant 0 : index
    %c0_0 = arith.constant 0 : index
    %c0_1 = arith.constant 0 : index
    %c0_2 = arith.constant 0 : index
    %0 = vector.load %arg1[%c0, %c0_0, %c0_1, %c0_2] : memref<1x18x18x4xf32, #tpu.memory_space<vmem>>, vector<1x18x18x4xf32>
    %1 = vector.shape_cast %0 : vector<1x18x18x4xf32> to vector<18x18x4xf32>
    %2 = vector.extract_strided_slice %1 {offsets = [0, 0, 0], sizes = [16, 16, 4], strides = [1, 1, 1]} : vector<18x18x4xf32> to vector<16x16x4xf32>
    %3 = vector.shape_cast %2 : vector<16x16x4xf32> to vector<256x4xf32>
    %4 = vector.extract_strided_slice %1 {offsets = [0, 1, 0], sizes = [16, 16, 4], strides = [1, 1, 1]} : vector<18x18x4xf32> to vector<16x16x4xf32>
    %5 = vector.shape_cast %4 : vector<16x16x4xf32> to vector<256x4xf32>
    %6 = vector.extract_strided_slice %1 {offsets = [0, 2, 0], sizes = [16, 16, 4], strides = [1, 1, 1]} : vector<18x18x4xf32> to vector<16x16x4xf32>
    %7 = vector.shape_cast %6 : vector<16x16x4xf32> to vector<256x4xf32>
    %8 = vector.extract_strided_slice %1 {offsets = [1, 0, 0], sizes = [16, 16, 4], strides = [1, 1, 1]} : vector<18x18x4xf32> to vector<16x16x4xf32>
    %9 = vector.shape_cast %8 : vector<16x16x4xf32> to vector<256x4xf32>
    %10 = vector.extract_strided_slice %1 {offsets = [1, 1, 0], sizes = [16, 16, 4], strides = [1, 1, 1]} : vector<18x18x4xf32> to vector<16x16x4xf32>
    %11 = vector.shape_cast %10 : vector<16x16x4xf32> to vector<256x4xf32>
    %12 = vector.extract_strided_slice %1 {offsets = [1, 2, 0], sizes = [16, 16, 4], strides = [1, 1, 1]} : vector<18x18x4xf32> to vector<16x16x4xf32>
    %13 = vector.shape_cast %12 : vector<16x16x4xf32> to vector<256x4xf32>
    %14 = vector.extract_strided_slice %1 {offsets = [2, 0, 0], sizes = [16, 16, 4], strides = [1, 1, 1]} : vector<18x18x4xf32> to vector<16x16x4xf32>
    %15 = vector.shape_cast %14 : vector<16x16x4xf32> to vector<256x4xf32>
    %16 = vector.extract_strided_slice %1 {offsets = [2, 1, 0], sizes = [16, 16, 4], strides = [1, 1, 1]} : vector<18x18x4xf32> to vector<16x16x4xf32>
    %17 = vector.shape_cast %16 : vector<16x16x4xf32> to vector<256x4xf32>
    %18 = vector.extract_strided_slice %1 {offsets = [2, 2, 0], sizes = [16, 16, 4], strides = [1, 1, 1]} : vector<18x18x4xf32> to vector<16x16x4xf32>
    %19 = vector.shape_cast %18 : vector<16x16x4xf32> to vector<256x4xf32>
    %20 = tpu.concatenate %3, %5, %7, %9, %11, %13, %15, %17, %19 in 1 : vector<256x4xf32>, vector<256x4xf32>, vector<256x4xf32>, vector<256x4xf32>, vector<256x4xf32>, vector<256x4xf32>, vector<256x4xf32>, vector<256x4xf32>, vector<256x4xf32> -> vector<256x36xf32>
    %21 = vector.extract_strided_slice %20 {offsets = [0, 16], sizes = [256, 4], strides = [1, 1]} : vector<256x36xf32> to vector<256x4xf32>
    %c0_3 = arith.constant 0 : index
    %c0_4 = arith.constant 0 : index
    %22 = vector.load %arg2[%c0_3, %c0_4] : memref<36x4xf32, #tpu.memory_space<vmem>>, vector<36x4xf32>
    %cst = arith.constant dense<0.000000e+00> : vector<256x4xf32>
    %23 = tpu.matmul %20, %22, %cst {dimension_numbers = #tpu.dot_dimension_numbers<[1], [0], [0], [1], [0, 0, 1, 1], [], []>} : vector<256x36xf32>, vector<36x4xf32>, vector<256x4xf32> -> vector<256x4xf32>
    %cst_5 = arith.constant 0.000000e+00 : f32
    %24 = vector.broadcast %cst_5 : f32 to vector<256x4xf32>
    %25 = arith.maximumf %23, %24 : vector<256x4xf32>
    %cst_6 = arith.constant 0.000000e+00 : f32
    %26 = vector.broadcast %cst_6 : f32 to vector<1x16x4xf32>
    %cst_7 = arith.constant 0.000000e+00 : f32
    %27 = vector.broadcast %cst_7 : f32 to vector<18x1x4xf32>
    %28 = vector.shape_cast %25 : vector<256x4xf32> to vector<16x16x4xf32>
    %29 = tpu.concatenate %26, %28, %26 in 0 : vector<1x16x4xf32>, vector<16x16x4xf32>, vector<1x16x4xf32> -> vector<18x16x4xf32>
    %30 = tpu.concatenate %27, %29, %27 in 1 : vector<18x1x4xf32>, vector<18x16x4xf32>, vector<18x1x4xf32> -> vector<18x18x4xf32>
    %31 = vector.extract_strided_slice %30 {offsets = [0, 0, 0], sizes = [16, 16, 4], strides = [1, 1, 1]} : vector<18x18x4xf32> to vector<16x16x4xf32>
    %32 = vector.shape_cast %31 : vector<16x16x4xf32> to vector<256x4xf32>
    %33 = vector.extract_strided_slice %30 {offsets = [0, 1, 0], sizes = [16, 16, 4], strides = [1, 1, 1]} : vector<18x18x4xf32> to vector<16x16x4xf32>
    %34 = vector.shape_cast %33 : vector<16x16x4xf32> to vector<256x4xf32>
    %35 = vector.extract_strided_slice %30 {offsets = [0, 2, 0], sizes = [16, 16, 4], strides = [1, 1, 1]} : vector<18x18x4xf32> to vector<16x16x4xf32>
    %36 = vector.shape_cast %35 : vector<16x16x4xf32> to vector<256x4xf32>
    %37 = vector.extract_strided_slice %30 {offsets = [1, 0, 0], sizes = [16, 16, 4], strides = [1, 1, 1]} : vector<18x18x4xf32> to vector<16x16x4xf32>
    %38 = vector.shape_cast %37 : vector<16x16x4xf32> to vector<256x4xf32>
    %39 = vector.extract_strided_slice %30 {offsets = [1, 1, 0], sizes = [16, 16, 4], strides = [1, 1, 1]} : vector<18x18x4xf32> to vector<16x16x4xf32>
    %40 = vector.shape_cast %39 : vector<16x16x4xf32> to vector<256x4xf32>
    %41 = vector.extract_strided_slice %30 {offsets = [1, 2, 0], sizes = [16, 16, 4], strides = [1, 1, 1]} : vector<18x18x4xf32> to vector<16x16x4xf32>
    %42 = vector.shape_cast %41 : vector<16x16x4xf32> to vector<256x4xf32>
    %43 = vector.extract_strided_slice %30 {offsets = [2, 0, 0], sizes = [16, 16, 4], strides = [1, 1, 1]} : vector<18x18x4xf32> to vector<16x16x4xf32>
    %44 = vector.shape_cast %43 : vector<16x16x4xf32> to vector<256x4xf32>
    %45 = vector.extract_strided_slice %30 {offsets = [2, 1, 0], sizes = [16, 16, 4], strides = [1, 1, 1]} : vector<18x18x4xf32> to vector<16x16x4xf32>
    %46 = vector.shape_cast %45 : vector<16x16x4xf32> to vector<256x4xf32>
    %47 = vector.extract_strided_slice %30 {offsets = [2, 2, 0], sizes = [16, 16, 4], strides = [1, 1, 1]} : vector<18x18x4xf32> to vector<16x16x4xf32>
    %48 = vector.shape_cast %47 : vector<16x16x4xf32> to vector<256x4xf32>
    %49 = tpu.concatenate %32, %34, %36, %38, %40, %42, %44, %46, %48 in 1 : vector<256x4xf32>, vector<256x4xf32>, vector<256x4xf32>, vector<256x4xf32>, vector<256x4xf32>, vector<256x4xf32>, vector<256x4xf32>, vector<256x4xf32>, vector<256x4xf32> -> vector<256x36xf32>
    %50 = tpu.concatenate %49, %21 in 1 : vector<256x36xf32>, vector<256x4xf32> -> vector<256x40xf32>
    %c0_8 = arith.constant 0 : index
    %c0_9 = arith.constant 0 : index
    %51 = vector.load %arg3[%c0_8, %c0_9] : memref<8x40xf32, #tpu.memory_space<vmem>>, vector<8x40xf32>
    %cst_10 = arith.constant dense<0.000000e+00> : vector<8x256xf32>
    %52 = tpu.matmul %51, %50, %cst_10 {dimension_numbers = #tpu.dot_dimension_numbers<[1], [1], [0], [0], [0, 0, 1, 0], [], []>} : vector<8x40xf32>, vector<256x40xf32>, vector<8x256xf32> -> vector<8x256xf32>
    %53 = vector.extract_strided_slice %52 {offsets = [0, 0], sizes = [4, 256], strides = [1, 1]} : vector<8x256xf32> to vector<4x256xf32>
    %cst_11 = arith.constant 0.000000e+00 : f32
    %54 = vector.broadcast %cst_11 : f32 to vector<4x256xf32>
    %55 = arith.maximumf %53, %54 : vector<4x256xf32>
    %56 = vector.extract_strided_slice %52 {offsets = [4, 0], sizes = [4, 256], strides = [1, 1]} : vector<8x256xf32> to vector<4x256xf32>
    %57 = arith.addf %55, %56 : vector<4x256xf32>
    %c0_12 = arith.constant 0 : index
    %c0_13 = arith.constant 0 : index
    %c0_14 = arith.constant 0 : index
    %58 = vector.load %arg4[%c0_12, %c0_13, %c0_14] : memref<1x4x256xf32, #tpu.memory_space<vmem>>, vector<1x4x256xf32>
    %59 = vector.shape_cast %58 : vector<1x4x256xf32> to vector<4x256xf32>
    %60 = vector.shape_cast %57 : vector<4x256xf32> to vector<1x4x256xf32>
    tpu.vector_store %arg4[%c0_12, %c0_13, %c0_14], %60 {strides = array<i32>} : memref<1x4x256xf32, #tpu.memory_space<vmem>>, vector<1x4x256xf32>,
    return
  }
  func.func @transform_0(%arg0: i32) -> (i32, i32, i32, i32) {
    %c0_i32 = arith.constant 0 : i32
    %c0_i32_0 = arith.constant 0 : i32
    %c0_i32_1 = arith.constant 0 : i32
    %c0_i32_2 = arith.constant 0 : i32
    return %arg0, %c0_i32, %c0_i32_0, %c0_i32_1 : i32, i32, i32, i32
  }
  func.func @transform_1(%arg0: i32) -> (i32, i32) {
    %c0_i32 = arith.constant 0 : i32
    %c0_i32_0 = arith.constant 0 : i32
    %c0_i32_1 = arith.constant 0 : i32
    return %c0_i32, %c0_i32_0 : i32, i32
  }
  func.func @transform_2(%arg0: i32) -> (i32, i32) {
    %c0_i32 = arith.constant 0 : i32
    %c0_i32_0 = arith.constant 0 : i32
    %c0_i32_1 = arith.constant 0 : i32
    return %c0_i32, %c0_i32_0 : i32, i32
  }
  func.func @transform_3(%arg0: i32) -> (i32, i32, i32) {
    %c0_i32 = arith.constant 0 : i32
    %c0_i32_0 = arith.constant 0 : i32
    %c0_i32_1 = arith.constant 0 : i32
    return %arg0, %c0_i32, %c0_i32_0 : i32, i32, i32
  }
}

</mosaic_0001>

<bundles_post_ra>
// kernel: tpu_custom_call.1
= control target key start
LH: loop header
LB: loop body
LE: loop exit
PB: predicated region body
PF: predicated region fallthrough
CT: control target
= control target key end

     0   :  { %8 = vsyncpa [#allocation3], 0  ;;  %s8434_s0 = inlined_call_operand.vmem [shape: f32[2,18,18,4], index: 0, kind: input, shape index: {}]   ;;  %s8435_s1 = inlined_call_operand.vmem [shape: f32[36,4], index: 1, kind: input, shape index: {}]   ;;  %s8436_s2 = inlined_call_operand.vmem [shape: f32[8,40], index: 2, kind: input, shape index: {}]   ;;  %s8437_s3 = inlined_call_operand.hbm [shape: f32[2,4,256], index: 3, kind: output, shape index: {}]  }
   0x1   :  { %10 = vsyncpa [#allocation3 + $0x1], 0  ;;  %s4796_s12 = smov 0   ;;  %s4798_s13 = smov 0  }
   0x2   :  { %s4800_s14 = smov 0   ;;  %s4802_s15 = smov 0  }
   0x3 LB: > { %s4817_s16 = sadd.s32 4294967295, %s4764_s15   ;;  %s3638_s17 = sadd.s32 4294967294, %s4764_s15   ;;  %s4764_s15 = sphi %s4802_s15, %s9342_s15   ;;  %s4760_s14 = sphi %s4800_s14, %s9341_s14   ;;  %s4756_s13 = sphi %s4798_s13, %s9340_s13   ;;  %s4752_s12 = sphi %s4796_s12, %s9339_s12  }
   0x4   : > { %s4821_s18 = sadd.s32 1, %s4764_s15   ;;  %s91_s19 = sadd.s32 1, %s4760_s14 }
   0x5   : > { %s88_s20 = ssub.s32 %s4764_s15, %s4821_s18  ;;  %p101_p0 = scmp.ne.s32.totalorder %s4760_s14, %s4756_s13 }
   0x6   : > { %p89_p1 = scmp.eq.s32.totalorder %s88_s20, 0  ;;  %p102_p2 = scmp.eq.s32.totalorder %s4817_s16, 1 }
   0x7   : > { %p107_p3 = scmp.ne.s32.totalorder %s4756_s13, %s4752_s12  ;;  %p108_p4 = scmp.eq.s32.totalorder %s3638_s17, 1 }
   0x8   : > { %s4832_s21 = scalar_select %p89_p1, %s4760_s14, %s91_s19  }
   0x9   : > { %p4834_p5 = por %p102_p2, %p101_p0  ;;  %p4838_p6 = por %p108_p4, %p107_p3 }
   0xa   : > { %p3641_p7 = scmp.ge.s32.totalorder %s4764_s15, 1  ;;  %p140_p8 = scmp.lt.s32.totalorder %s4764_s15, 3 }
   0xc   : > { %p141_p9 = pnand %p3641_p7, %p140_p8 }
   0xe   : > { %144 = sbr.rel (%p141_p9) target bundleno = 1489 (0x5d1), region = 32 }
  0x15   : > { %p164_p10 = scmp.lt.s32.totalorder %s4817_s16, 1  ;;  %vm271_vm0 = vcmask 1046528   ;;  %s4766_s29 = smov 4   ;;  %vm352_vm1 = vcmask 1045504   ;;  %vm1593_vm2 = vcmask 1043456   ;;  %vm1227_vm3 = vcmask 31744  }
  0x16   : > { %s4767_s30 = smov 8   ;;  %s4768_s4 = smov 12   ;;  %vm1260_vm4 = vcmask 64512   ;;  %vm1293_vm5 = vcmask 97280   ;;  %vm1326_vm6 = vcmask 130048   ;;  %vm1359_vm7 = vcmask 162816  }
  0x17   : > { %s165_s24 = scalar_select %p164_p10, %s4817_s16, 1  ;;  %vm1392_vm8 = vcmask 195584   ;;  %vm1425_vm9 = vcmask 228352   ;;  %vm1458_vm10 = vcmask 261120   ;;  %vm1496_vm11 = vcmask 293888  }
  0x18   : > { %s4769_s5 = smov 16   ;;  %s4770_s6 = smov 20   ;;  %vm1887_vm12 = vcmask 1040384   ;;  %vm3378_vm13 = vcmask 326656  }
  0x19   : > { %s3901_s25 = smul.u32 432, %s165_s24  ;;  %s4771_s7 = smov 24   ;;  %vm7855_vm14 = vmpackc.low %vm3378_vm13, %vm3378_vm13 }
  0x1a   : > { %s4772_s8 = smov 28   ;;  %s4773_s9 = smov 32  }
  0x1b   : > { %s4849_s28 = scalar_lea.vmem %s8434_s0, %s3901_s25 }
  0x1c   : > { %v4852_v0 = vld [vmem:[%s4849_s28 + $0x18] sm:$0xff]  ;;  %v4855_v1 = vld [vmem:[%s4849_s28 + $0x20] sm:$0xff]  ;;  %v4863_v5 = vld [vmem:[%s4849_s28 + $0x8] sm:$0xff] }
  0x1d   : > { %v4858_v2 = vld [vmem:[%s4849_s28] sm:$0xff]  ;;  %v277_v3 = vrot.slane %v4852_v0, 1  ;;  %v278_v4 = vrot.slane %v4855_v1, 1  ;;  %v4867_v7 = vld [vmem:[%s4849_s28 + $0x28] sm:$0x3]  ;;  %v273_v8 = vrot.slane %v4863_v5, 1 }
  0x1e   : > { %v272_v6 = vrot.slane %v4858_v2, 1  ;;  %v280_v9 = vrot.slane %v4867_v7, 1  ;;  %v4872_v10 = vld [vmem:[%s4849_s28 + $0x10] sm:$0x3]  ;;  %v4875_v11 = vld [vmem:[%s4849_s28 + $0x38] sm:$0xff]  ;;  %v4905_v24 = vld [vmem:[%s4849_s28 + $0x48] sm:$0xff] }
  0x1f   : > { %v4878_v12 = vsel %vm271_vm0, %v277_v3, %v278_v4  ;;  %v275_v13 = vrot.slane %v4872_v10, 1  ;;  %v4882_v14 = vld [vmem:[%s4849_s28 + $0x40] sm:$0x3]  ;;  %v4885_v15 = vld [vmem:[%s4849_s28 + $0x30] sm:$0xff]  ;;  %v283_v18 = vrot.slane %v4875_v11, 1  ;;  %v287_v29 = vrot.slane %v4905_v24, 1 }
  0x20   : > { %463 = vrot.lane.b32.xlu1 %v4878_v12, %s4766_s29  ;;  %v274_v16 = vsel %vm271_vm0, %v272_v6, %v273_v8  ;;  %v4892_v17 = vsel %vm271_vm0, %v278_v4, %v280_v9  ;;  %v285_v19 = vrot.slane %v4882_v14, 1  ;;  %v282_v21 = vrot.slane %v4885_v15, 1  ;;  %v4899_v22 = vld [vmem:[%s4849_s28 + $0x50] sm:$0xff]  ;;  %v4902_v23 = vld [vmem:[%s4849_s28 + $0x58] sm:$0x3]  ;;  %v4920_v30 = vld [vmem:[%s4849_s28 + $0x68] sm:$0xff] }
  0x21   : > { %459 = vrot.lane.b32.xlu0 %v274_v16, %s4766_s29  ;;  %v276_v20 = vsel %vm271_vm0, %v273_v8, %v275_v13  ;;  %v288_v26 = vrot.slane %v4899_v22, 1  ;;  %v290_v27 = vrot.slane %v4902_v23, 1  ;;  %v4923_v31 = vld [vmem:[%s4849_s28 + $0x70] sm:$0x3]  ;;  %v4926_v32 = vld [vmem:[%s4849_s28 + $0x60] sm:$0xff]  ;;  %v293_v34 = vrot.slane %v4920_v30, 1 }
  0x22   : > { %v4911_v25 = vsel %vm271_vm0, %v283_v18, %v285_v19  ;;  %v4916_v28 = vsel %vm271_vm0, %v282_v21, %v283_v18  ;;  %v295_v35 = vrot.slane %v4923_v31, 1  ;;  %v292_v37 = vrot.slane %v4926_v32, 1  ;;  %v4942_v38 = vld [vmem:[%s4849_s28 + $0x80] sm:$0xff]  ;;  %v4945_v39 = vld [vmem:[%s4849_s28 + $0x88] sm:$0x3]  ;;  %v4948_v40 = vld [vmem:[%s4849_s28 + $0x78] sm:$0xff] }
  0x23   : > { %v4933_v33 = vsel %vm271_vm0, %v288_v26, %v290_v27  ;;  %v4938_v36 = vsel %vm271_vm0, %v287_v29, %v288_v26  ;;  %v298_v42 = vrot.slane %v4942_v38, 1  ;;  %v300_v43 = vrot.slane %v4945_v39, 1  ;;  %v4964_v46 = vld [vmem:[%s4849_s28 + $0x98] sm:$0xff]  ;;  %v4967_v47 = vld [vmem:[%s4849_s28 + $0xa0] sm:$0x3]  ;;  %v4970_v48 = vld [vmem:[%s4849_s28 + $0x90] sm:$0xff] }
  0x24   : > { %465 = vrot.lane.b32.xlu1 %v4892_v17, %s4766_s29  ;;  %8642 = vst [vmem:[#allocation5_spill] sm:$0xff] %v4938_v36  ;;  %v4955_v41 = vsel %vm271_vm0, %v293_v34, %v295_v35  ;;  %v4960_v44 = vsel %vm271_vm0, %v292_v37, %v293_v34  ;;  %v297_v45 = vrot.slane %v4948_v40, 1  ;;  %v303_v50 = vrot.slane %v4964_v46, 1  ;;  %v4986_v54 = vld [vmem:[%s4849_s28 + $0xb0] sm:$0xff]  ;;  %v4989_v55 = vld [vmem:[%s4849_s28 + $0xb8] sm:$0x3] }
  0x25   : > { %461 = vrot.lane.b32.xlu0 %v276_v20, %s4766_s29  ;;  %8643 = vst [vmem:[#allocation6_spill] sm:$0xff] %v4955_v41  ;;  %8644 = vst [vmem:[#allocation7_spill] sm:$0xff] %v4960_v44  ;;  %v4977_v49 = vsel %vm271_vm0, %v298_v42, %v300_v43  ;;  %v305_v51 = vrot.slane %v4967_v47, 1  ;;  %v302_v53 = vrot.slane %v4970_v48, 1  ;;  %v4992_v56 = vld [vmem:[%s4849_s28 + $0xa8] sm:$0xff]  ;;  %v308_v58 = vrot.slane %v4986_v54, 1 }
  0x26   : > { %8645 = vst [vmem:[#allocation8_spill] sm:$0xff] %v4977_v49  ;;  %v4982_v52 = vsel %vm271_vm0, %v297_v45, %v298_v42  ;;  %v310_v59 = vrot.slane %v4989_v55, 1  ;;  %v307_v61 = vrot.slane %v4992_v56, 1  ;;  %v5008_v62 = vld [vmem:[%s4849_s28 + $0xc8] sm:$0xff]  ;;  %v5011_v63 = vld [vmem:[%s4849_s28 + $0xd0] sm:$0x3] }
  0x27   : > { %8646 = vst [vmem:[#allocation9_spill] sm:$0xff] %v4982_v52  ;;  %v4999_v57 = vsel %vm271_vm0, %v303_v50, %v305_v51  ;;  %v5004_v60 = vsel %vm271_vm0, %v302_v53, %v303_v50  ;;  %v5014_v3 = vld [vmem:[%s4849_s28 + $0xc0] sm:$0xff]  ;;  %v313_v6 = vrot.slane %v5008_v62, 1  ;;  %v315_v8 = vrot.slane %v5011_v63, 1  ;;  %v5033_v18 = vld [vmem:[%s4849_s28 + $0xe8] sm:$0x3] }
  0x28   : > { %469 = vrot.lane.b32.xlu1 %v4911_v25, %s4766_s29  ;;  %8647 = vst [vmem:[#allocation10_spill] sm:$0xff] %v4999_v57  ;;  %8648 = vst [vmem:[#allocation11_spill] sm:$0xff] %v5004_v60  ;;  %v5021_v4 = vsel %vm271_vm0, %v308_v58, %v310_v59  ;;  %v5026_v9 = vsel %vm271_vm0, %v307_v61, %v308_v58  ;;  %v312_v13 = vrot.slane %v5014_v3, 1  ;;  %v5030_v16 = vld [vmem:[%s4849_s28 + $0xe0] sm:$0xff]  ;;  %v5036_v19 = vld [vmem:[%s4849_s28 + $0xd8] sm:$0xff]  ;;  %v320_v26 = vrot.slane %v5033_v18, 1 }
  0x29   : > { %467 = vrot.lane.b32.xlu0 %v4916_v28, %s4766_s29  ;;  %8649 = vst [vmem:[#allocation12_spill] sm:$0xff] %v5021_v4  ;;  %8650 = vst [vmem:[#allocation13_spill] sm:$0xff] %v5026_v9  ;;  %v5043_v20 = vsel %vm271_vm0, %v313_v6, %v315_v8  ;;  %v318_v21 = vrot.slane %v5030_v16, 1  ;;  %v317_v29 = vrot.slane %v5036_v19, 1  ;;  %v5052_v34 = vld [vmem:[%s4849_s28 + $0xf8] sm:$0xff]  ;;  %v5058_v37 = vld [vmem:[%s4849_s28 + $0xf0] sm:$0xff] }
  0x2a   : > { %8651 = vst [vmem:[#allocation14_spill] sm:$0xff] %v5043_v20  ;;  %v5048_v27 = vsel %vm271_vm0, %v312_v13, %v313_v6  ;;  %v5055_v35 = vld [vmem:[%s4849_s28 + $0x100] sm:$0x3]  ;;  %v323_v43 = vrot.slane %v5052_v34, 1  ;;  %v322_v51 = vrot.slane %v5058_v37, 1  ;;  %v5074_v53 = vld [vmem:[%s4849_s28 + $0x110] sm:$0xff] }
  0x2b   : > { %8652 = vst [vmem:[#allocation15_spill] sm:$0xff] %v5048_v27  ;;  %v5065_v42 = vsel %vm271_vm0, %v318_v21, %v320_v26  ;;  %v325_v45 = vrot.slane %v5055_v35, 1  ;;  %v5070_v50 = vsel %vm271_vm0, %v317_v29, %v318_v21  ;;  %v5077_v58 = vld [vmem:[%s4849_s28 + $0x118] sm:$0x3]  ;;  %v5080_v59 = vld [vmem:[%s4849_s28 + $0x108] sm:$0xff]  ;;  %v328_v6 = vrot.slane %v5074_v53, 1 }
  0x2c   : > { %473 = vrot.lane.b32.xlu1 %v4933_v33, %s4766_s29  ;;  %8653 = vst [vmem:[#allocation16_spill] sm:$0xff] %v5065_v42  ;;  %8654 = vst [vmem:[#allocation17_spill] sm:$0xff] %v5070_v50  ;;  %v330_v8 = vrot.slane %v5077_v58, 1  ;;  %v5092_v13 = vsel %vm271_vm0, %v322_v51, %v323_v43  ;;  %v327_v21 = vrot.slane %v5080_v59, 1  ;;  %v5096_v26 = vld [vmem:[%s4849_s28 + $0x128] sm:$0xff] }
  0x2d   : > { %471 = vrot.lane.b32.xlu0 %v4938_v36, %s4766_s29  ;;  %v5087_v61 = vsel %vm271_vm0, %v323_v43, %v325_v45  ;;  %8656 = vst [vmem:[#allocation19_spill] sm:$0xff] %v5092_v13  ;;  %v5099_v29 = vld [vmem:[%s4849_s28 + $0x130] sm:$0x3]  ;;  %v333_v43 = vrot.slane %v5096_v26, 1 }
  0x2e   : > { %8655 = vst [vmem:[#allocation18_spill] sm:$0xff] %v5087_v61  ;;  %v5109_v45 = vsel %vm271_vm0, %v328_v6, %v330_v8  ;;  %v335_v51 = vrot.slane %v5099_v29, 1 }
  0x2f   : > { %8657 = vst [vmem:[#allocation20_spill] sm:$0xff] %v5109_v45 }
  0x30   : > { %477 = vrot.lane.b32.xlu1 %v4955_v41, %s4766_s29  ;;  %v5131_v8 = vsel %vm271_vm0, %v333_v43, %v335_v51 }
  0x31   : > { %475 = vrot.lane.b32.xlu0 %v4960_v44, %s4766_s29  ;;  %8659 = vst [vmem:[#allocation22_spill] sm:$0xff] %v5131_v8  ;;  %v5165_v44 = vld [vmem:[%s4849_s28 + $0x178] sm:$0x3] }
  0x34   : > { %481 = vrot.lane.b32.xlu1 %v4977_v49, %s4766_s29  ;;  %v5162_v49 = vld [vmem:[%s4849_s28 + $0x170] sm:$0xff] }
  0x35   : > { %479 = vrot.lane.b32.xlu0 %v4982_v52, %s4766_s29 }
  0x38   : > { %485 = vrot.lane.b32.xlu1 %v4999_v57, %s4766_s29 }
  0x39   : > { %483 = vrot.lane.b32.xlu0 %v5004_v60, %s4766_s29  ;;  %v5140_v60 = vld [vmem:[%s4849_s28 + $0x158] sm:$0xff] }
  0x3c   : > { %489 = vrot.lane.b32.xlu1 %v5021_v4, %s4766_s29 }
  0x3d   : > { %487 = vrot.lane.b32.xlu0 %v5026_v9, %s4766_s29 }
  0x40   : > { %493 = vrot.lane.b32.xlu1 %v5043_v20, %s4766_s29  ;;  %v5118_v20 = vld [vmem:[%s4849_s28 + $0x140] sm:$0xff] }
  0x41   : > { %491 = vrot.lane.b32.xlu0 %v5048_v27, %s4766_s29 }
  0x44   : > { %497 = vrot.lane.b32.xlu1 %v5065_v42, %s4766_s29  ;;  %v5114_v42 = vsel %vm271_vm0, %v327_v21, %v328_v6  ;;  %v338_v6 = vrot.slane %v5118_v20, 1 }
  0x45   : > { %495 = vrot.lane.b32.xlu0 %v5070_v50, %s4766_s29  ;;  %v5102_v50 = vld [vmem:[%s4849_s28 + $0x120] sm:$0xff]  ;;  %8658 = vst [vmem:[#allocation21_spill] sm:$0xff] %v5114_v42 }
  0x46   : > { %v332_v27 = vrot.slane %v5102_v50, 1 }
  0x48   : > { %501 = vrot.lane.b32.xlu1 %v5087_v61, %s4766_s29  ;;  %v5121_v61 = vld [vmem:[%s4849_s28 + $0x148] sm:$0x3]  ;;  %v5136_v9 = vsel %vm271_vm0, %v332_v27, %v333_v43  ;;  %v343_v27 = vrot.slane %v5140_v60, 1 }
  0x49   : > { %499 = vrot.lane.b32.xlu0 %v5092_v13, %s4766_s29  ;;  %v5124_v13 = vld [vmem:[%s4849_s28 + $0x138] sm:$0xff]  ;;  %v340_v21 = vrot.slane %v5121_v61, 1  ;;  %8660 = vst [vmem:[#allocation23_spill] sm:$0xff] %v5136_v9 }
  0x4a   : > { %v337_v4 = vrot.slane %v5124_v13, 1 }
  0x4b   : > { %v5153_v51 = vsel %vm271_vm0, %v338_v6, %v340_v21 }
  0x4c   : > { %505 = vrot.lane.b32.xlu1 %v5109_v45, %s4766_s29  ;;  %v5143_v45 = vld [vmem:[%s4849_s28 + $0x160] sm:$0x3]  ;;  %8661 = vst [vmem:[#allocation24_spill] sm:$0xff] %v5153_v51  ;;  %v5158_v57 = vsel %vm271_vm0, %v337_v4, %v338_v6  ;;  %v348_v4 = vrot.slane %v5162_v49, 1  ;;  %v350_v6 = vrot.slane %v5165_v44, 1 }
  0x4d   : > { %503 = vrot.lane.b32.xlu0 %v5114_v42, %s4766_s29  ;;  %v5146_v42 = vld [vmem:[%s4849_s28 + $0x150] sm:$0xff]  ;;  %v345_v43 = vrot.slane %v5143_v45, 1  ;;  %8662 = vst [vmem:[#allocation25_spill] sm:$0xff] %v5158_v57 }
  0x4e   : > { %v342_v52 = vrot.slane %v5146_v42, 1 }
  0x4f   : > { %v5175_v21 = vsel %vm271_vm0, %v343_v27, %v345_v43  ;;  %v354_v43 = vrot.slane %v4863_v5, 2  ;;  %v361_v5 = vrot.slane %v4867_v7, 2  ;;  %v363_v7 = vrot.slane %v4885_v15, 2 }
  0x50   : > { %509 = vrot.lane.b32.xlu1 %v5131_v8, %s4766_s29  ;;  %v5168_v8 = vld [vmem:[%s4849_s28 + $0x168] sm:$0xff]  ;;  %8663 = vst [vmem:[#allocation26_spill] sm:$0xff] %v5175_v21 }
  0x51   : > { %507 = vrot.lane.b32.xlu0 %v5136_v9, %s4766_s29  ;;  %v5180_v9 = vsel %vm271_vm0, %v342_v52, %v343_v27  ;;  %v347_v41 = vrot.slane %v5168_v8, 1  ;;  %v353_v52 = vrot.slane %v4858_v2, 2 }
  0x52   : > { %8664 = vst [vmem:[#allocation27_spill] sm:$0xff] %v5180_v9 }
  0x53   : > { %v5193_v36 = vsel %vm271_vm0, %v347_v41, %v348_v4  ;;  %v358_v41 = vrot.slane %v4852_v0, 2 }
  0x54   : > { %513 = vrot.lane.b32.xlu1 %v5153_v51, %s4766_s29  ;;  %v356_v51 = vrot.slane %v4872_v10, 2  ;;  %8666 = vst [vmem:[#allocation29_spill] sm:$0xff] %v5193_v36  ;;  %v355_v10 = vsel %vm352_vm1, %v353_v52, %v354_v43  ;;  %v369_v52 = vrot.slane %v4899_v22, 2 }
  0x55   : > { %511 = vrot.lane.b32.xlu0 %v5158_v57, %s4766_s29  ;;  %v5188_v57 = vsel %vm271_vm0, %v348_v4, %v350_v6  ;;  %v359_v6 = vrot.slane %v4855_v1, 2  ;;  %v364_v4 = vrot.slane %v4875_v11, 2 }
  0x56   : > { %8665 = vst [vmem:[#allocation28_spill] sm:$0xff] %v5188_v57  ;;  %v357_v27 = vsel %vm352_vm1, %v354_v43, %v356_v51  ;;  %v366_v51 = vrot.slane %v4882_v14, 2 }
  0x57   : > { %v5208_v2 = vsel %vm352_vm1, %v359_v6, %v361_v5  ;;  %v5226_v14 = vsel %vm352_vm1, %v363_v7, %v364_v4  ;;  %v379_v7 = vrot.slane %v4942_v38, 2 }
  0x58   : > { %517 = vrot.lane.b32.xlu1 %v5175_v21, %s4766_s29  ;;  %v5221_v43 = vsel %vm352_vm1, %v364_v4, %v366_v51  ;;  %v373_v4 = vrot.slane %v4926_v32, 2 }
  0x59   : > { %515 = vrot.lane.b32.xlu0 %v5180_v9, %s4766_s29 }
  0x5c   : > { %521 = vrot.lane.b32.xlu1 %v5188_v57, %s4766_s29 }
  0x5d   : > { %519 = vrot.lane.b32.xlu0 %v5193_v36, %s4766_s29  ;;  %v5213_v36 = vsel %vm352_vm1, %v358_v41, %v359_v6  ;;  %v368_v6 = vrot.slane %v4905_v24, 2  ;;  %v376_v41 = vrot.slane %v4923_v31, 2 }
  0x60   : > { %557 = vrot.lane.b32.xlu1 %v357_v27, %s4767_s30  ;;  %v371_v27 = vrot.slane %v4902_v23, 2  ;;  %v5239_v23 = vsel %vm352_vm1, %v368_v6, %v369_v52 }
  0x61   : > { %555 = vrot.lane.b32.xlu0 %v355_v10, %s4767_s30  ;;  %v374_v10 = vrot.slane %v4920_v30, 2  ;;  %8667 = vst [vmem:[#allocation30_spill] sm:$0xff] %v5239_v23 }
  0x62   : > { %v5234_v5 = vsel %vm352_vm1, %v369_v52, %v371_v27  ;;  %v381_v27 = vrot.slane %v4945_v39, 2  ;;  %v378_v52 = vrot.slane %v4948_v40, 2 }
  0x63   : > { %v5247_v51 = vsel %vm352_vm1, %v374_v10, %v376_v41  ;;  %v5252_v31 = vsel %vm352_vm1, %v373_v4, %v374_v10  ;;  %v384_v41 = vrot.slane %v4964_v46, 2  ;;  %v383_v10 = vrot.slane %v4970_v48, 2 }
  0x64   : > { %561 = vrot.lane.b32.xlu1 %v5208_v2, %s4767_s30  ;;  %8668 = vst [vmem:[#allocation31_spill] sm:$0xff] %v5252_v31  ;;  %v5260_v6 = vsel %vm352_vm1, %v379_v7, %v381_v27  ;;  %v5265_v39 = vsel %vm352_vm1, %v378_v52, %v379_v7  ;;  %v389_v27 = vrot.slane %v4986_v54, 2  ;;  %v388_v7 = vrot.slane %v4992_v56, 2 }
  0x65   : > { %559 = vrot.lane.b32.xlu0 %v5213_v36, %s4767_s30  ;;  %8669 = vst [vmem:[#allocation32_spill] sm:$0xff] %v5265_v39 }
  0x68   : > { %565 = vrot.lane.b32.xlu1 %v5221_v43, %s4767_s30 }
  0x69   : > { %563 = vrot.lane.b32.xlu0 %v5226_v14, %s4767_s30 }
  0x6c   : > { %569 = vrot.lane.b32.xlu1 %v5234_v5, %s4767_s30 }
  0x6d   : > { %567 = vrot.lane.b32.xlu0 %v5239_v23, %s4767_s30  ;;  %v386_v23 = vrot.slane %v4967_v47, 2  ;;  %v5278_v47 = vsel %vm352_vm1, %v383_v10, %v384_v41 }
  0x6e   : > { %8670 = vst [vmem:[#allocation33_spill] sm:$0xff] %v5278_v47 }
  0x6f   : > { %v5273_v4 = vsel %vm352_vm1, %v384_v41, %v386_v23  ;;  %v394_v23 = vrot.slane %v5008_v62, 2  ;;  %v393_v41 = vrot.slane %v5014_v3, 2 }
  0x70   : > { %573 = vrot.lane.b32.xlu1 %v5247_v51, %s4767_s30 }
  0x71   : > { %571 = vrot.lane.b32.xlu0 %v5252_v31, %s4767_s30  ;;  %v391_v31 = vrot.slane %v4989_v55, 2  ;;  %v5291_v55 = vsel %vm352_vm1, %v388_v7, %v389_v27 }
  0x72   : > { %8671 = vst [vmem:[#allocation34_spill] sm:$0xff] %v5291_v55 }
  0x73   : > { %v5286_v52 = vsel %vm352_vm1, %v389_v27, %v391_v31  ;;  %v399_v31 = vrot.slane %v5030_v16, 2  ;;  %v398_v27 = vrot.slane %v5036_v19, 2 }
  0x74   : > { %577 = vrot.lane.b32.xlu1 %v5260_v6, %s4767_s30 }
  0x75   : > { %575 = vrot.lane.b32.xlu0 %v5265_v39, %s4767_s30  ;;  %v396_v39 = vrot.slane %v5011_v63, 2  ;;  %v5304_v63 = vsel %vm352_vm1, %v393_v41, %v394_v23 }
  0x76   : > { %8672 = vst [vmem:[#allocation35_spill] sm:$0xff] %v5304_v63 }
  0x77   : > { %v5299_v10 = vsel %vm352_vm1, %v394_v23, %v396_v39  ;;  %v404_v39 = vrot.slane %v5052_v34, 2  ;;  %v403_v23 = vrot.slane %v5058_v37, 2 }
  0x78   : > { %581 = vrot.lane.b32.xlu1 %v5273_v4, %s4767_s30 }
  0x79   : > { %579 = vrot.lane.b32.xlu0 %v5278_v47, %s4767_s30  ;;  %v401_v47 = vrot.slane %v5033_v18, 2  ;;  %v5317_v18 = vsel %vm352_vm1, %v398_v27, %v399_v31 }
  0x7a   : > { %8674 = vst [vmem:[#allocation37_spill] sm:$0xff] %v5317_v18 }
  0x7b   : > { %v5312_v7 = vsel %vm352_vm1, %v399_v31, %v401_v47  ;;  %v409_v47 = vrot.slane %v5074_v53, 2  ;;  %v408_v31 = vrot.slane %v5080_v59, 2 }
  0x7c   : > { %585 = vrot.lane.b32.xlu1 %v5286_v52, %s4767_s30  ;;  %8673 = vst [vmem:[#allocation36_spill] sm:$0xff] %v5312_v7 }
  0x7d   : > { %583 = vrot.lane.b32.xlu0 %v5291_v55, %s4767_s30  ;;  %v406_v55 = vrot.slane %v5055_v35, 2  ;;  %v5330_v35 = vsel %vm352_vm1, %v403_v23, %v404_v39 }
  0x7e   : > { %8675 = vst [vmem:[#allocation38_spill] sm:$0xff] %v5330_v35 }
  0x7f   : > { %v5325_v41 = vsel %vm352_vm1, %v404_v39, %v406_v55  ;;  %v414_v55 = vrot.slane %v5096_v26, 2  ;;  %v413_v39 = vrot.slane %v5102_v50, 2 }
  0x80   : > { %589 = vrot.lane.b32.xlu1 %v5299_v10, %s4767_s30 }
  0x81   : > { %587 = vrot.lane.b32.xlu0 %v5304_v63, %s4767_s30  ;;  %v411_v63 = vrot.slane %v5077_v58, 2  ;;  %v5343_v58 = vsel %vm352_vm1, %v408_v31, %v409_v47 }
  0x82   : > { %8677 = vst [vmem:[#allocation40_spill] sm:$0xff] %v5343_v58 }
  0x83   : > { %v5338_v27 = vsel %vm352_vm1, %v409_v47, %v411_v63  ;;  %v419_v63 = vrot.slane %v5118_v20, 2  ;;  %v418_v47 = vrot.slane %v5124_v13, 2 }
  0x84   : > { %593 = vrot.lane.b32.xlu1 %v5312_v7, %s4767_s30  ;;  %8676 = vst [vmem:[#allocation39_spill] sm:$0xff] %v5338_v27 }
  0x85   : > { %591 = vrot.lane.b32.xlu0 %v5317_v18, %s4767_s30  ;;  %v416_v18 = vrot.slane %v5099_v29, 2  ;;  %v5356_v29 = vsel %vm352_vm1, %v413_v39, %v414_v55 }
  0x86   : > { %8678 = vst [vmem:[#allocation41_spill] sm:$0xff] %v5356_v29 }
  0x87   : > { %v5351_v23 = vsel %vm352_vm1, %v414_v55, %v416_v18  ;;  %v424_v18 = vrot.slane %v5140_v60, 2  ;;  %v423_v55 = vrot.slane %v5146_v42, 2 }
  0x88   : > { %597 = vrot.lane.b32.xlu1 %v5325_v41, %s4767_s30 }
  0x89   : > { %595 = vrot.lane.b32.xlu0 %v5330_v35, %s4767_s30  ;;  %v421_v35 = vrot.slane %v5121_v61, 2  ;;  %v5371_v61 = vsel %vm352_vm1, %v418_v47, %v419_v63  ;;  %v428_v47 = vrot.slane %v5168_v8, 2 }
  0x8a   : > { %8681 = vst [vmem:[#allocation44_spill] sm:$0xff] %v5371_v61 }
  0x8b   : > { %v5364_v31 = vsel %vm352_vm1, %v419_v63, %v421_v35  ;;  %v5388_v63 = vsel %vm352_vm1, %v423_v55, %v424_v18 }
  0x8c   : > { %601 = vrot.lane.b32.xlu1 %v5338_v27, %s4767_s30  ;;  %8679 = vst [vmem:[#allocation42_spill] sm:$0xff] %v5364_v31  ;;  %8684 = vst [vmem:[#allocation47_spill] sm:$0xff] %v5388_v63 }
  0x8d   : > { %599 = vrot.lane.b32.xlu0 %v5343_v58, %s4767_s30  ;;  %v426_v58 = vrot.slane %v5143_v45, 2  ;;  %v429_v45 = vrot.slane %v5162_v49, 2 }
  0x8f   : > { %v5381_v35 = vsel %vm352_vm1, %v424_v18, %v426_v58 }
  0x90   : > { %605 = vrot.lane.b32.xlu1 %v5351_v23, %s4767_s30 }
  0x91   : > { %603 = vrot.lane.b32.xlu0 %v5356_v29, %s4767_s30 }
  0x92   : > { %v5368_v27 = vpop.permute.xlu1 %463 }
  0x93   : > { %8680 = vst [vmem:[#allocation43_spill] sm:$0xff] %v5368_v27  ;;  %v5374_v39 = vpop.permute.xlu0 %459  ;;  %v431_v27 = vrot.slane %v5165_v44, 2  ;;  %v5403_v44 = vsel %vm352_vm1, %v428_v47, %v429_v45 }
  0x94   : > { %8682 = vst [vmem:[#allocation45_spill] sm:$0xff] %v5374_v39  ;;  %609 = vrot.lane.b32.xlu1 %v5364_v31, %s4767_s30 }
  0x95   : > { %607 = vrot.lane.b32.xlu0 %v5371_v61, %s4767_s30  ;;  %v5398_v58 = vsel %vm352_vm1, %v429_v45, %v431_v27 }
  0x96   : > { %v5385_v29 = vpop.permute.xlu1 %465 }
  0x97   : > { %8683 = vst [vmem:[#allocation46_spill] sm:$0xff] %v5385_v29  ;;  %v5391_v39 = vpop.permute.xlu0 %461 }
  0x98   : > { %8685 = vst [vmem:[#allocation48_spill] sm:$0xff] %v5391_v39  ;;  %613 = vrot.lane.b32.xlu1 %v5381_v35, %s4767_s30 }
  0x99   : > { %611 = vrot.lane.b32.xlu0 %v5388_v63, %s4767_s30 }
  0x9a   : > { %v5400_v61 = vpop.permute.xlu1 %469 }
  0x9b   : > { %8686 = vst [vmem:[#allocation49_spill] sm:$0xff] %v5400_v61  ;;  %v5405_v18 = vpop.permute.xlu0 %467  ;;  %v8734_v61 = vld [vmem:[#allocation9_spill] sm:$0xff] }
  0x9c   : > { %8687 = vst [vmem:[#allocation50_spill] sm:$0xff] %v5405_v18  ;;  %617 = vrot.lane.b32.xlu1 %v5398_v58, %s4767_s30 }
  0x9d   : > { %615 = vrot.lane.b32.xlu0 %v5403_v44, %s4767_s30 }
  0x9e   : > { %v5411_v55 = vpop.permute.xlu1 %473 }
  0x9f   : > { %8688 = vst [vmem:[#allocation51_spill] sm:$0xff] %v5411_v55  ;;  %v5413_v39 = vpop.permute.xlu0 %471  ;;  %v8730_v55 = vld [vmem:[#allocation7_spill] sm:$0xff] }
  0xa0   : > { %8689 = vst [vmem:[#allocation52_spill] sm:$0xff] %v5413_v39  ;;  %653 = vrot.lane.b32.xlu1 %v4855_v1, %s4768_s4 }
  0xa1   : > { %651 = vrot.lane.b32.xlu0 %v4852_v0, %s4768_s4 }
  0xa2   : > { %v5419_v27 = vpop.permute.xlu1 %477 }
  0xa3   : > { %8690 = vst [vmem:[#allocation53_spill] sm:$0xff] %v5419_v27  ;;  %v5421_v45 = vpop.permute.xlu0 %475 }
  0xa4   : > { %8691 = vst [vmem:[#allocation54_spill] sm:$0xff] %v5421_v45  ;;  %657 = vrot.lane.b32.xlu1 %v4875_v11, %s4768_s4 }
  0xa5   : > { %655 = vrot.lane.b32.xlu0 %v4885_v15, %s4768_s4 }
  0xa6   : > { %v5427_v47 = vpop.permute.xlu1 %481 }
  0xa7   : > { %8692 = vst [vmem:[#allocation55_spill] sm:$0xff] %v5427_v47  ;;  %v5429_v39 = vpop.permute.xlu0 %479 }
  0xa8   : > { %8693 = vst [vmem:[#allocation56_spill] sm:$0xff] %v5429_v39  ;;  %661 = vrot.lane.b32.xlu1 %v4899_v22, %s4768_s4 }
  0xa9   : > { %659 = vrot.lane.b32.xlu0 %v4905_v24, %s4768_s4 }
  0xaa   : > { %v5435_v0 = vpop.permute.xlu1 %485 }
  0xab   : > { %8694 = vst [vmem:[#allocation57_spill] sm:$0xff] %v5435_v0  ;;  %v5437_v1 = vpop.permute.xlu0 %483 }
  0xac   : > { %8695 = vst [vmem:[#allocation58_spill] sm:$0xff] %v5437_v1  ;;  %665 = vrot.lane.b32.xlu1 %v4920_v30, %s4768_s4 }
  0xad   : > { %663 = vrot.lane.b32.xlu0 %v4926_v32, %s4768_s4 }
  0xae   : > { %v5443_v45 = vpop.permute.xlu1 %489 }
  0xaf   : > { %8696 = vst [vmem:[#allocation59_spill] sm:$0xff] %v5443_v45  ;;  %v5445_v47 = vpop.permute.xlu0 %487 }
  0xb0   : > { %8697 = vst [vmem:[#allocation60_spill] sm:$0xff] %v5445_v47  ;;  %669 = vrot.lane.b32.xlu1 %v4942_v38, %s4768_s4 }
  0xb1   : > { %667 = vrot.lane.b32.xlu0 %v4948_v40, %s4768_s4 }
  0xb2   : > { %v5451_v39 = vpop.permute.xlu1 %493 }
  0xb3   : > { %8698 = vst [vmem:[#allocation61_spill] sm:$0xff] %v5451_v39  ;;  %v5453_v0 = vpop.permute.xlu0 %491 }
  0xb4   : > { %8699 = vst [vmem:[#allocation62_spill] sm:$0xff] %v5453_v0  ;;  %673 = vrot.lane.b32.xlu1 %v4964_v46, %s4768_s4 }
  0xb5   : > { %671 = vrot.lane.b32.xlu0 %v4970_v48, %s4768_s4 }
  0xb6   : > { %v5459_v1 = vpop.permute.xlu1 %497 }
  0xb7   : > { %8700 = vst [vmem:[#allocation63_spill] sm:$0xff] %v5459_v1  ;;  %v5461_v45 = vpop.permute.xlu0 %495 }
  0xb8   : > { %8701 = vst [vmem:[#allocation64_spill] sm:$0xff] %v5461_v45  ;;  %677 = vrot.lane.b32.xlu1 %v4986_v54, %s4768_s4 }
  0xb9   : > { %675 = vrot.lane.b32.xlu0 %v4992_v56, %s4768_s4 }
  0xba   : > { %v5467_v47 = vpop.permute.xlu1 %501 }
  0xbb   : > { %8702 = vst [vmem:[#allocation65_spill] sm:$0xff] %v5467_v47  ;;  %v5469_v39 = vpop.permute.xlu0 %499 }
  0xbc   : > { %8703 = vst [vmem:[#allocation66_spill] sm:$0xff] %v5469_v39  ;;  %681 = vrot.lane.b32.xlu1 %v5008_v62, %s4768_s4 }
  0xbd   : > { %679 = vrot.lane.b32.xlu0 %v5014_v3, %s4768_s4 }
  0xbe   : > { %v5475_v0 = vpop.permute.xlu1 %505 }
  0xbf   : > { %8704 = vst [vmem:[#allocation67_spill] sm:$0xff] %v5475_v0  ;;  %v5477_v1 = vpop.permute.xlu0 %503 }
  0xc0   : > { %8705 = vst [vmem:[#allocation68_spill] sm:$0xff] %v5477_v1  ;;  %685 = vrot.lane.b32.xlu1 %v5030_v16, %s4768_s4 }
  0xc1   : > { %683 = vrot.lane.b32.xlu0 %v5036_v19, %s4768_s4 }
  0xc2   : > { %v5483_v45 = vpop.permute.xlu1 %509 }
  0xc3   : > { %8706 = vst [vmem:[#allocation69_spill] sm:$0xff] %v5483_v45  ;;  %v5485_v47 = vpop.permute.xlu0 %507 }
  0xc4   : > { %8707 = vst [vmem:[#allocation70_spill] sm:$0xff] %v5485_v47  ;;  %689 = vrot.lane.b32.xlu1 %v5052_v34, %s4768_s4 }
  0xc5   : > { %687 = vrot.lane.b32.xlu0 %v5058_v37, %s4768_s4 }
  0xc6   : > { %v5491_v39 = vpop.permute.xlu1 %513 }
  0xc7   : > { %8708 = vst [vmem:[#allocation71_spill] sm:$0xff] %v5491_v39  ;;  %v5493_v0 = vpop.permute.xlu0 %511 }
  0xc8   : > { %8709 = vst [vmem:[#allocation72_spill] sm:$0xff] %v5493_v0  ;;  %693 = vrot.lane.b32.xlu1 %v5074_v53, %s4768_s4 }
  0xc9   : > { %691 = vrot.lane.b32.xlu0 %v5080_v59, %s4768_s4 }
  0xca   : > { %v5499_v1 = vpop.permute.xlu1 %517 }
  0xcb   : > { %8710 = vst [vmem:[#allocation73_spill] sm:$0xff] %v5499_v1  ;;  %v5501_v47 = vpop.permute.xlu0 %515 }
  0xcc   : > { %8711 = vst [vmem:[#allocation74_spill] sm:$0xff] %v5501_v47  ;;  %697 = vrot.lane.b32.xlu1 %v5096_v26, %s4768_s4 }
  0xcd   : > { %695 = vrot.lane.b32.xlu0 %v5102_v50, %s4768_s4 }
  0xce   : > { %v5507_v39 = vpop.permute.xlu1 %521 }
  0xcf   : > { %8712 = vst [vmem:[#allocation75_spill] sm:$0xff] %v5507_v39  ;;  %v5509_v0 = vpop.permute.xlu0 %519 }
  0xd0   : > { %8713 = vst [vmem:[#allocation76_spill] sm:$0xff] %v5509_v0  ;;  %701 = vrot.lane.b32.xlu1 %v5118_v20, %s4768_s4  ;;  %v5532_v0 = vld [vmem:[%s4849_s28 + $0x188] sm:$0xff] }
  0xd1   : > { %699 = vrot.lane.b32.xlu0 %v5124_v13, %s4768_s4 }
  0xd2   : > { %v5515_v1 = vpop.permute.xlu1 %557 }
  0xd3   : > { %8714 = vst [vmem:[#allocation77_spill] sm:$0xff] %v5515_v1  ;;  %v5517_v47 = vpop.permute.xlu0 %555 }
  0xd4   : > { %8715 = vst [vmem:[#allocation78_spill] sm:$0xff] %v5517_v47  ;;  %705 = vrot.lane.b32.xlu1 %v5140_v60, %s4768_s4  ;;  %v5537_v47 = vld [vmem:[%s4849_s28 + $0x180] sm:$0xff] }
  0xd5   : > { %703 = vrot.lane.b32.xlu0 %v5146_v42, %s4768_s4 }
  0xd6   : > { %v5523_v45 = vpop.permute.xlu1 %561 }
  0xd7   : > { %8716 = vst [vmem:[#allocation79_spill] sm:$0xff] %v5523_v45  ;;  %v5525_v39 = vpop.permute.xlu0 %559 }
  0xd8   : > { %8717 = vst [vmem:[#allocation80_spill] sm:$0xff] %v5525_v39  ;;  %709 = vrot.lane.b32.xlu1 %v5162_v49, %s4768_s4 }
  0xd9   : > { %707 = vrot.lane.b32.xlu0 %v5168_v8, %s4768_s4 }
  0xda   : > { %v5534_v1 = vpop.permute.xlu1 %565 }
  0xdb   : > { %8718 = vst [vmem:[#allocation81_spill] sm:$0xff] %v5534_v1  ;;  %v5539_v27 = vpop.permute.xlu0 %563 }
  0xdc   : > { %8719 = vst [vmem:[#allocation82_spill] sm:$0xff] %v5539_v27  ;;  %713 = vrot.lane.b32.xlu1 %v5532_v0, %s4768_s4 }
  0xdd   : > { %711 = vrot.lane.b32.xlu0 %v5537_v47, %s4768_s4 }
  0xde   : > { %v5545_v39 = vpop.permute.xlu1 %569 }
  0xdf   : > { %8720 = vst [vmem:[#allocation83_spill] sm:$0xff] %v5545_v39  ;;  %v5547_v45 = vpop.permute.xlu0 %567 }
  0xe0   : > { %8721 = vst [vmem:[#allocation84_spill] sm:$0xff] %v5547_v45  ;;  %749 = vrot.lane.b32.xlu1 %v4892_v17, %s4769_s5  ;;  %v8726_v17 = vld [vmem:[#allocation5_spill] sm:$0xff] }
  0xe1   : > { %747 = vrot.lane.b32.xlu0 %v4878_v12, %s4769_s5 }
  0xe2   : > { %v5553_v1 = vpop.permute.xlu1 %573 }
  0xe3   : > { %8722 = vst [vmem:[#allocation85_spill] sm:$0xff] %v5553_v1  ;;  %v5555_v27 = vpop.permute.xlu0 %571 }
  0xe4   : > { %8723 = vst [vmem:[#allocation86_spill] sm:$0xff] %v5555_v27  ;;  %753 = vrot.lane.b32.xlu1 %v4911_v25, %s4769_s5  ;;  %v8729_v27 = vld [vmem:[#allocation6_spill] sm:$0xff] }
  0xe5   : > { %751 = vrot.lane.b32.xlu0 %v4916_v28, %s4769_s5 }
  0xe6   : > { %v5561_v39 = vpop.permute.xlu1 %577 }
  0xe7   : > { %8724 = vst [vmem:[#allocation87_spill] sm:$0xff] %v5561_v39  ;;  %v5563_v45 = vpop.permute.xlu0 %575 }
  0xe8   : > { %8725 = vst [vmem:[#allocation88_spill] sm:$0xff] %v5563_v45  ;;  %757 = vrot.lane.b32.xlu1 %v4933_v33, %s4769_s5  ;;  %v8733_v45 = vld [vmem:[#allocation8_spill] sm:$0xff] }
  0xe9   : > { %755 = vrot.lane.b32.xlu0 %v8726_v17, %s4769_s5 }
  0xea   : > { %v5569_v12 = vpop.permute.xlu1 %581 }
  0xeb   : > { %8727 = vst [vmem:[#allocation5_spill] sm:$0xff] %v5569_v12  ;;  %v5571_v1 = vpop.permute.xlu0 %579 }
  0xec   : > { %8728 = vst [vmem:[#allocation89_spill] sm:$0xff] %v5571_v1  ;;  %761 = vrot.lane.b32.xlu1 %v8729_v27, %s4769_s5  ;;  %v8737_v1 = vld [vmem:[#allocation10_spill] sm:$0xff]  ;;  %v8738_v27 = vld [vmem:[#allocation11_spill] sm:$0xff] }
  0xed   : > { %759 = vrot.lane.b32.xlu0 %v8730_v55, %s4769_s5 }
  0xee   : > { %v5577_v18 = vpop.permute.xlu1 %585 }
  0xef   : > { %8731 = vst [vmem:[#allocation90_spill] sm:$0xff] %v5577_v18  ;;  %v5579_v39 = vpop.permute.xlu0 %583 }
  0xf0   : > { %8732 = vst [vmem:[#allocation91_spill] sm:$0xff] %v5579_v39  ;;  %765 = vrot.lane.b32.xlu1 %v8733_v45, %s4769_s5  ;;  %v8741_v39 = vld [vmem:[#allocation12_spill] sm:$0xff]  ;;  %v8742_v45 = vld [vmem:[#allocation13_spill] sm:$0xff] }
  0xf1   : > { %763 = vrot.lane.b32.xlu0 %v8734_v61, %s4769_s5 }
  0xf2   : > { %v5585_v29 = vpop.permute.xlu1 %589 }
  0xf3   : > { %8735 = vst [vmem:[#allocation92_spill] sm:$0xff] %v5585_v29  ;;  %v5587_v12 = vpop.permute.xlu0 %587 }
  0xf4   : > { %8736 = vst [vmem:[#allocation93_spill] sm:$0xff] %v5587_v12  ;;  %769 = vrot.lane.b32.xlu1 %v8737_v1, %s4769_s5  ;;  %v8745_v12 = vld [vmem:[#allocation14_spill] sm:$0xff]  ;;  %v8746_v1 = vld [vmem:[#allocation15_spill] sm:$0xff] }
  0xf5   : > { %767 = vrot.lane.b32.xlu0 %v8738_v27, %s4769_s5 }
  0xf6   : > { %v5593_v55 = vpop.permute.xlu1 %593 }
  0xf7   : > { %8739 = vst [vmem:[#allocation94_spill] sm:$0xff] %v5593_v55  ;;  %v5595_v18 = vpop.permute.xlu0 %591 }
  0xf8   : > { %8740 = vst [vmem:[#allocation95_spill] sm:$0xff] %v5595_v18  ;;  %773 = vrot.lane.b32.xlu1 %v8741_v39, %s4769_s5  ;;  %v8749_v18 = vld [vmem:[#allocation16_spill] sm:$0xff]  ;;  %v8750_v39 = vld [vmem:[#allocation17_spill] sm:$0xff] }
  0xf9   : > { %771 = vrot.lane.b32.xlu0 %v8742_v45, %s4769_s5 }
  0xfa   : > { %v5601_v61 = vpop.permute.xlu1 %597 }
  0xfb   : > { %8743 = vst [vmem:[#allocation96_spill] sm:$0xff] %v5601_v61  ;;  %v5603_v29 = vpop.permute.xlu0 %595 }
  0xfc   : > { %8744 = vst [vmem:[#allocation97_spill] sm:$0xff] %v5603_v29  ;;  %777 = vrot.lane.b32.xlu1 %v8745_v12, %s4769_s5  ;;  %v8753_v29 = vld [vmem:[#allocation18_spill] sm:$0xff] }
  0xfd   : > { %775 = vrot.lane.b32.xlu0 %v8746_v1, %s4769_s5  ;;  %v8754_v1 = vld [vmem:[#allocation19_spill] sm:$0xff]  ;;  %v8761_v12 = vld [vmem:[#allocation22_spill] sm:$0xff] }
  0xfe   : > { %v5609_v27 = vpop.permute.xlu1 %601 }
  0xff   : > { %8747 = vst [vmem:[#allocation98_spill] sm:$0xff] %v5609_v27  ;;  %v5611_v55 = vpop.permute.xlu0 %599 }
 0x100   : > { %8748 = vst [vmem:[#allocation99_spill] sm:$0xff] %v5611_v55  ;;  %781 = vrot.lane.b32.xlu1 %v8749_v18, %s4769_s5  ;;  %v8757_v18 = vld [vmem:[#allocation20_spill] sm:$0xff] }
 0x101   : > { %779 = vrot.lane.b32.xlu0 %v8750_v39, %s4769_s5  ;;  %v8758_v39 = vld [vmem:[#allocation21_spill] sm:$0xff] }
 0x102   : > { %v5617_v45 = vpop.permute.xlu1 %605 }
 0x103   : > { %8751 = vst [vmem:[#allocation100_spill] sm:$0xff] %v5617_v45  ;;  %v5619_v61 = vpop.permute.xlu0 %603 }
 0x104   : > { %8752 = vst [vmem:[#allocation101_spill] sm:$0xff] %v5619_v61  ;;  %785 = vrot.lane.b32.xlu1 %v8753_v29, %s4769_s5  ;;  %v8762_v29 = vld [vmem:[#allocation23_spill] sm:$0xff] }
 0x105   : > { %783 = vrot.lane.b32.xlu0 %v8754_v1, %s4769_s5 }
 0x106   : > { %v5625_v27 = vpop.permute.xlu1 %609 }
 0x107   : > { %8755 = vst [vmem:[#allocation102_spill] sm:$0xff] %v5625_v27  ;;  %v5627_v55 = vpop.permute.xlu0 %607 }
 0x108   : > { %8756 = vst [vmem:[#allocation103_spill] sm:$0xff] %v5627_v55  ;;  %789 = vrot.lane.b32.xlu1 %v8757_v18, %s4769_s5  ;;  %v8765_v55 = vld [vmem:[#allocation24_spill] sm:$0xff]  ;;  %v8766_v18 = vld [vmem:[#allocation25_spill] sm:$0xff] }
 0x109   : > { %787 = vrot.lane.b32.xlu0 %v8758_v39, %s4769_s5 }
 0x10a   : > { %v5633_v45 = vpop.permute.xlu1 %613 }
 0x10b   : > { %8759 = vst [vmem:[#allocation104_spill] sm:$0xff] %v5633_v45  ;;  %v5635_v61 = vpop.permute.xlu0 %611  ;;  %v5652_v45 = vld [vmem:[%s4849_s28 + $0x190] sm:$0x3] }
 0x10c   : > { %8760 = vst [vmem:[#allocation105_spill] sm:$0xff] %v5635_v61  ;;  %793 = vrot.lane.b32.xlu1 %v8761_v12, %s4769_s5 }
 0x10d   : > { %791 = vrot.lane.b32.xlu0 %v8762_v29, %s4769_s5  ;;  %v437_v29 = vrot.slane %v5532_v0, 1 }
 0x10e   : > { %v5641_v1 = vpop.permute.xlu1 %617 }
 0x10f   : > { %8763 = vst [vmem:[#allocation106_spill] sm:$0xff] %v5641_v1  ;;  %v5643_v27 = vpop.permute.xlu0 %615  ;;  %v436_v1 = vrot.slane %v5537_v47, 1 }
 0x110   : > { %8764 = vst [vmem:[#allocation107_spill] sm:$0xff] %v5643_v27  ;;  %797 = vrot.lane.b32.xlu1 %v8765_v55, %s4769_s5  ;;  %v439_v27 = vrot.slane %v5652_v45, 1 }
 0x111   : > { %795 = vrot.lane.b32.xlu0 %v8766_v18, %s4769_s5 }
 0x112   : > { %v5649_v39 = vpop.permute.xlu1 %653 }
 0x113   : > { %8767 = vst [vmem:[#allocation108_spill] sm:$0xff] %v5649_v39  ;;  %v5654_v61 = vpop.permute.xlu0 %651  ;;  %v5672_v39 = vsel %vm271_vm0, %v437_v29, %v439_v27 }
 0x114   : > { %8768 = vst [vmem:[#allocation109_spill] sm:$0xff] %v5654_v61  ;;  %801 = vrot.lane.b32.xlu1 %v5175_v21, %s4769_s5  ;;  %v8771_v61 = vld [vmem:[#allocation29_spill] sm:$0xff]  ;;  %8772 = vst [vmem:[#allocation112_spill] sm:$0xff] %v5672_v39 }
 0x115   : > { %799 = vrot.lane.b32.xlu0 %v5180_v9, %s4769_s5  ;;  %v5677_v9 = vsel %vm271_vm0, %v436_v1, %v437_v29 }
 0x116   : > { %v5663_v55 = vpop.permute.xlu1 %657  ;;  %8774 = vst [vmem:[#allocation114_spill] sm:$0xff] %v5677_v9 }
 0x117   : > { %8769 = vst [vmem:[#allocation110_spill] sm:$0xff] %v5663_v55  ;;  %v5665_v18 = vpop.permute.xlu0 %655 }
 0x118   : > { %8770 = vst [vmem:[#allocation111_spill] sm:$0xff] %v5665_v18  ;;  %805 = vrot.lane.b32.xlu1 %v5188_v57, %s4769_s5 }
 0x119   : > { %803 = vrot.lane.b32.xlu0 %v8771_v61, %s4769_s5 }
 0x11a   : > { %v5674_v21 = vpop.permute.xlu1 %661 }
 0x11b   : > { %8773 = vst [vmem:[#allocation113_spill] sm:$0xff] %v5674_v21  ;;  %v5679_v12 = vpop.permute.xlu0 %659 }
 0x11c   : > { %8775 = vst [vmem:[#allocation115_spill] sm:$0xff] %v5679_v12  ;;  %809 = vrot.lane.b32.xlu1 %v5672_v39, %s4769_s5 }
 0x11d   : > { %807 = vrot.lane.b32.xlu0 %v5677_v9, %s4769_s5 }
 0x11e   : > { %v5685_v18 = vpop.permute.xlu1 %665 }
 0x11f   : > { %8776 = vst [vmem:[#allocation116_spill] sm:$0xff] %v5685_v18  ;;  %v5687_v55 = vpop.permute.xlu0 %663 }
 0x120   : > { %8777 = vst [vmem:[#allocation117_spill] sm:$0xff] %v5687_v55  ;;  %845 = vrot.lane.b32.xlu1 %v5208_v2, %s4770_s6  ;;  %v8782_v2 = vld [vmem:[#allocation30_spill] sm:$0xff] }
 0x121   : > { %843 = vrot.lane.b32.xlu0 %v5213_v36, %s4770_s6 }
 0x122   : > { %v5693_v29 = vpop.permute.xlu1 %669 }
 0x123   : > { %8778 = vst [vmem:[#allocation118_spill] sm:$0xff] %v5693_v29  ;;  %v5695_v27 = vpop.permute.xlu0 %667 }
 0x124   : > { %8779 = vst [vmem:[#allocation119_spill] sm:$0xff] %v5695_v27  ;;  %849 = vrot.lane.b32.xlu1 %v5221_v43, %s4770_s6  ;;  %v8785_v27 = vld [vmem:[#allocation31_spill] sm:$0xff] }
 0x125   : > { %847 = vrot.lane.b32.xlu0 %v5226_v14, %s4770_s6 }
 0x126   : > { %v5701_v1 = vpop.permute.xlu1 %673 }
 0x127   : > { %8780 = vst [vmem:[#allocation120_spill] sm:$0xff] %v5701_v1  ;;  %v5703_v55 = vpop.permute.xlu0 %671 }
 0x128   : > { %8781 = vst [vmem:[#allocation121_spill] sm:$0xff] %v5703_v55  ;;  %853 = vrot.lane.b32.xlu1 %v5234_v5, %s4770_s6  ;;  %v8788_v55 = vld [vmem:[#allocation32_spill] sm:$0xff] }
 0x129   : > { %851 = vrot.lane.b32.xlu0 %v8782_v2, %s4770_s6 }
 0x12a   : > { %v5709_v36 = vpop.permute.xlu1 %677 }
 0x12b   : > { %8783 = vst [vmem:[#allocation30_spill] sm:$0xff] %v5709_v36  ;;  %v5711_v29 = vpop.permute.xlu0 %675 }
 0x12c   : > { %8784 = vst [vmem:[#allocation122_spill] sm:$0xff] %v5711_v29  ;;  %857 = vrot.lane.b32.xlu1 %v5247_v51, %s4770_s6  ;;  %v8791_v29 = vld [vmem:[#allocation33_spill] sm:$0xff] }
 0x12d   : > { %855 = vrot.lane.b32.xlu0 %v8785_v27, %s4770_s6 }
 0x12e   : > { %v5717_v18 = vpop.permute.xlu1 %681 }
 0x12f   : > { %8786 = vst [vmem:[#allocation31_spill] sm:$0xff] %v5717_v18  ;;  %v5719_v1 = vpop.permute.xlu0 %679 }
 0x130   : > { %8787 = vst [vmem:[#allocation123_spill] sm:$0xff] %v5719_v1  ;;  %861 = vrot.lane.b32.xlu1 %v5260_v6, %s4770_s6  ;;  %v8794_v1 = vld [vmem:[#allocation34_spill] sm:$0xff] }
 0x131   : > { %859 = vrot.lane.b32.xlu0 %v8788_v55, %s4770_s6 }
 0x132   : > { %v5725_v12 = vpop.permute.xlu1 %685 }
 0x133   : > { %8789 = vst [vmem:[#allocation32_spill] sm:$0xff] %v5725_v12  ;;  %v5727_v36 = vpop.permute.xlu0 %683 }
 0x134   : > { %8790 = vst [vmem:[#allocation124_spill] sm:$0xff] %v5727_v36  ;;  %865 = vrot.lane.b32.xlu1 %v5273_v4, %s4770_s6  ;;  %v8797_v36 = vld [vmem:[#allocation35_spill] sm:$0xff] }
 0x135   : > { %863 = vrot.lane.b32.xlu0 %v8791_v29, %s4770_s6 }
 0x136   : > { %v5733_v21 = vpop.permute.xlu1 %689 }
 0x137   : > { %8792 = vst [vmem:[#allocation33_spill] sm:$0xff] %v5733_v21  ;;  %v5735_v18 = vpop.permute.xlu0 %687 }
 0x138   : > { %8793 = vst [vmem:[#allocation125_spill] sm:$0xff] %v5735_v18  ;;  %869 = vrot.lane.b32.xlu1 %v5286_v52, %s4770_s6  ;;  %v8800_v18 = vld [vmem:[#allocation37_spill] sm:$0xff] }
 0x139   : > { %867 = vrot.lane.b32.xlu0 %v8794_v1, %s4770_s6 }
 0x13a   : > { %v5741_v9 = vpop.permute.xlu1 %693 }
 0x13b   : > { %8795 = vst [vmem:[#allocation34_spill] sm:$0xff] %v5741_v9  ;;  %v5743_v12 = vpop.permute.xlu0 %691 }
 0x13c   : > { %8796 = vst [vmem:[#allocation126_spill] sm:$0xff] %v5743_v12  ;;  %873 = vrot.lane.b32.xlu1 %v5299_v10, %s4770_s6  ;;  %v8803_v12 = vld [vmem:[#allocation38_spill] sm:$0xff] }
 0x13d   : > { %871 = vrot.lane.b32.xlu0 %v8797_v36, %s4770_s6 }
 0x13e   : > { %v5749_v39 = vpop.permute.xlu1 %697 }
 0x13f   : > { %8798 = vst [vmem:[#allocation35_spill] sm:$0xff] %v5749_v39  ;;  %v5751_v21 = vpop.permute.xlu0 %695 }
 0x140   : > { %8799 = vst [vmem:[#allocation127_spill] sm:$0xff] %v5751_v21  ;;  %877 = vrot.lane.b32.xlu1 %v5312_v7, %s4770_s6  ;;  %v8806_v21 = vld [vmem:[#allocation39_spill] sm:$0xff]  ;;  %v8807_v7 = vld [vmem:[#allocation40_spill] sm:$0xff] }
 0x141   : > { %875 = vrot.lane.b32.xlu0 %v8800_v18, %s4770_s6 }
 0x142   : > { %v5757_v61 = vpop.permute.xlu1 %701 }
 0x143   : > { %8801 = vst [vmem:[#allocation128_spill] sm:$0xff] %v5757_v61  ;;  %v5759_v9 = vpop.permute.xlu0 %699 }
 0x144   : > { %8802 = vst [vmem:[#allocation129_spill] sm:$0xff] %v5759_v9  ;;  %881 = vrot.lane.b32.xlu1 %v5325_v41, %s4770_s6  ;;  %v8810_v9 = vld [vmem:[#allocation41_spill] sm:$0xff] }
 0x145   : > { %879 = vrot.lane.b32.xlu0 %v8803_v12, %s4770_s6 }
 0x146   : > { %v5765_v57 = vpop.permute.xlu1 %705 }
 0x147   : > { %8804 = vst [vmem:[#allocation130_spill] sm:$0xff] %v5765_v57  ;;  %v5767_v39 = vpop.permute.xlu0 %703 }
 0x148   : > { %8805 = vst [vmem:[#allocation131_spill] sm:$0xff] %v5767_v39  ;;  %885 = vrot.lane.b32.xlu1 %v8806_v21, %s4770_s6  ;;  %v8813_v39 = vld [vmem:[#allocation44_spill] sm:$0xff] }
 0x149   : > { %883 = vrot.lane.b32.xlu0 %v8807_v7, %s4770_s6 }
 0x14a   : > { %v5773_v18 = vpop.permute.xlu1 %709 }
 0x14b   : > { %8808 = vst [vmem:[#allocation39_spill] sm:$0xff] %v5773_v18  ;;  %v5775_v61 = vpop.permute.xlu0 %707 }
 0x14c   : > { %8809 = vst [vmem:[#allocation132_spill] sm:$0xff] %v5775_v61  ;;  %889 = vrot.lane.b32.xlu1 %v5351_v23, %s4770_s6  ;;  %v442_v61 = vrot.slane %v5532_v0, 2 }
 0x14d   : > { %887 = vrot.lane.b32.xlu0 %v8810_v9, %s4770_s6 }
 0x14e   : > { %v5781_v12 = vpop.permute.xlu1 %713 }
 0x14f   : > { %8811 = vst [vmem:[#allocation133_spill] sm:$0xff] %v5781_v12  ;;  %v5783_v57 = vpop.permute.xlu0 %711  ;;  %v441_v12 = vrot.slane %v5537_v47, 2 }
 0x150   : > { %8812 = vst [vmem:[#allocation134_spill] sm:$0xff] %v5783_v57  ;;  %893 = vrot.lane.b32.xlu1 %v5364_v31, %s4770_s6  ;;  %v444_v57 = vrot.slane %v5652_v45, 2 }
 0x151   : > { %891 = vrot.lane.b32.xlu0 %v8813_v39, %s4770_s6 }
 0x152   : > { %v5789_v7 = vpop.permute.xlu1 %749 }
 0x153   : > { %8814 = vst [vmem:[#allocation44_spill] sm:$0xff] %v5789_v7  ;;  %v5791_v18 = vpop.permute.xlu0 %747 }
 0x154   : > { %8815 = vst [vmem:[#allocation135_spill] sm:$0xff] %v5791_v18  ;;  %897 = vrot.lane.b32.xlu1 %v5381_v35, %s4770_s6  ;;  %v5809_v18 = vsel %vm352_vm1, %v442_v61, %v444_v57 }
 0x155   : > { %895 = vrot.lane.b32.xlu0 %v5388_v63, %s4770_s6  ;;  %v5814_v63 = vsel %vm352_vm1, %v441_v12, %v442_v61 }
 0x156   : > { %v5800_v31 = vpop.permute.xlu1 %753 }
 0x157   : > { %8816 = vst [vmem:[#allocation136_spill] sm:$0xff] %v5800_v31  ;;  %v5802_v9 = vpop.permute.xlu0 %751 }
 0x158   : > { %8817 = vst [vmem:[#allocation137_spill] sm:$0xff] %v5802_v9  ;;  %901 = vrot.lane.b32.xlu1 %v5398_v58, %s4770_s6 }
 0x159   : > { %899 = vrot.lane.b32.xlu0 %v5403_v44, %s4770_s6 }
 0x15a   : > { %v5811_v7 = vpop.permute.xlu1 %757 }
 0x15b   : > { %v5816_v45 = vpop.permute.xlu0 %755 }
 0x15c   : > { %905 = vrot.lane.b32.xlu1 %v5809_v18, %s4770_s6 }
 0x15d   : > { %903 = vrot.lane.b32.xlu0 %v5814_v63, %s4770_s6 }
 0x15e   : > { %v5822_v9 = vpop.permute.xlu1 %761 }
 0x15f   : > { %v5824_v31 = vpop.permute.xlu0 %759 }
 0x160   : > { %8818 = vst [vmem:[#allocation138_spill] sm:$0xff] %v5824_v31  ;;  %941 = vrot.lane.b32.xlu1 %v4875_v11, %s4771_s7 }
 0x161   : > { %939 = vrot.lane.b32.xlu0 %v4885_v15, %s4771_s7 }
 0x162   : > { %v5830_v57 = vpop.permute.xlu1 %765 }
 0x163   : > { %v5832_v61 = vpop.permute.xlu0 %763 }
 0x164   : > { %945 = vrot.lane.b32.xlu1 %v4899_v22, %s4771_s7 }
 0x165   : > { %943 = vrot.lane.b32.xlu0 %v4905_v24, %s4771_s7 }
 0x166   : > { %v5838_v12 = vpop.permute.xlu1 %769 }
 0x167   : > { %v5840_v31 = vpop.permute.xlu0 %767 }
 0x168   : > { %949 = vrot.lane.b32.xlu1 %v4920_v30, %s4771_s7 }
 0x169   : > { %947 = vrot.lane.b32.xlu0 %v4926_v32, %s4771_s7 }
 0x16a   : > { %v5846_v11 = vpop.permute.xlu1 %773 }
 0x16b   : > { %8819 = vst [vmem:[#allocation139_spill] sm:$0xff] %v5846_v11  ;;  %v5848_v15 = vpop.permute.xlu0 %771 }
 0x16c   : > { %8820 = vst [vmem:[#allocation140_spill] sm:$0xff] %v5848_v15  ;;  %953 = vrot.lane.b32.xlu1 %v4942_v38, %s4771_s7 }
 0x16d   : > { %951 = vrot.lane.b32.xlu0 %v4948_v40, %s4771_s7 }
 0x16e   : > { %v5854_v22 = vpop.permute.xlu1 %777 }
 0x16f   : > { %8821 = vst [vmem:[#allocation141_spill] sm:$0xff] %v5854_v22  ;;  %v5856_v24 = vpop.permute.xlu0 %775  ;;  %v4674_v22 = vld [vmem:[%s4849_s28 + $0x38] sm:$0xff] }
 0x170   : > { %8822 = vst [vmem:[#allocation142_spill] sm:$0xff] %v5856_v24  ;;  %957 = vrot.lane.b32.xlu1 %v4964_v46, %s4771_s7  ;;  %v8922_v24 = vld [vmem:[#allocation48_spill] sm:$0xff] }
 0x171   : > { %955 = vrot.lane.b32.xlu0 %v4970_v48, %s4771_s7 }
 0x172   : > { %v5862_v30 = vpop.permute.xlu1 %781 }
 0x173   : > { %8823 = vst [vmem:[#allocation143_spill] sm:$0xff] %v5862_v30  ;;  %v5864_v32 = vpop.permute.xlu0 %779  ;;  %v4671_v30 = vld [vmem:[%s4849_s28] sm:$0xff] }
 0x174   : > { %8824 = vst [vmem:[#allocation144_spill] sm:$0xff] %v5864_v32  ;;  %961 = vrot.lane.b32.xlu1 %v4986_v54, %s4771_s7 }
 0x175   : > { %959 = vrot.lane.b32.xlu0 %v4992_v56, %s4771_s7 }
 0x176   : > { %v5870_v38 = vpop.permute.xlu1 %785 }
 0x177   : > { %8825 = vst [vmem:[#allocation145_spill] sm:$0xff] %v5870_v38  ;;  %v5872_v40 = vpop.permute.xlu0 %783 }
 0x178   : > { %8826 = vst [vmem:[#allocation146_spill] sm:$0xff] %v5872_v40  ;;  %965 = vrot.lane.b32.xlu1 %v5008_v62, %s4771_s7  ;;  %v1494_v40 = vld [vmem:[%s8435_s1 + $0x18] sm:$0xff] }
 0x179   : > { %963 = vrot.lane.b32.xlu0 %v5014_v3, %s4771_s7 }
 0x17a   : > { %v5878_v46 = vpop.permute.xlu1 %789 }
 0x17b   : > { %8827 = vst [vmem:[#allocation147_spill] sm:$0xff] %v5878_v46  ;;  %v5880_v48 = vpop.permute.xlu0 %787  ;;  %v8851_v46 = vld [vmem:[#allocation12_spill] sm:$0xff] }
 0x17c   : > { %8828 = vst [vmem:[#allocation148_spill] sm:$0xff] %v5880_v48  ;;  %969 = vrot.lane.b32.xlu1 %v5030_v16, %s4771_s7 }
 0x17d   : > { %967 = vrot.lane.b32.xlu0 %v5036_v19, %s4771_s7 }
 0x17e   : > { %v5886_v54 = vpop.permute.xlu1 %793 }
 0x17f   : > { %8829 = vst [vmem:[#allocation149_spill] sm:$0xff] %v5886_v54  ;;  %v5888_v56 = vpop.permute.xlu0 %791 }
 0x180   : > { %8830 = vst [vmem:[#allocation150_spill] sm:$0xff] %v5888_v56  ;;  %973 = vrot.lane.b32.xlu1 %v5052_v34, %s4771_s7  ;;  %v8847_v56 = vld [vmem:[#allocation10_spill] sm:$0xff] }
 0x181   : > { %971 = vrot.lane.b32.xlu0 %v5058_v37, %s4771_s7 }
 0x182   : > { %v5894_v62 = vpop.permute.xlu1 %797 }
 0x183   : > { %8831 = vst [vmem:[#allocation151_spill] sm:$0xff] %v5894_v62  ;;  %v5896_v3 = vpop.permute.xlu0 %795 }
 0x184   : > { %8832 = vst [vmem:[#allocation152_spill] sm:$0xff] %v5896_v3  ;;  %977 = vrot.lane.b32.xlu1 %v5074_v53, %s4771_s7  ;;  %v8843_v3 = vld [vmem:[#allocation8_spill] sm:$0xff] }
 0x185   : > { %975 = vrot.lane.b32.xlu0 %v5080_v59, %s4771_s7 }
 0x186   : > { %v5902_v16 = vpop.permute.xlu1 %801 }
 0x187   : > { %8833 = vst [vmem:[#allocation153_spill] sm:$0xff] %v5902_v16  ;;  %v5904_v19 = vpop.permute.xlu0 %799 }
 0x188   : > { %8834 = vst [vmem:[#allocation154_spill] sm:$0xff] %v5904_v19  ;;  %981 = vrot.lane.b32.xlu1 %v5096_v26, %s4771_s7  ;;  %v8839_v19 = vld [vmem:[#allocation6_spill] sm:$0xff] }
 0x189   : > { %979 = vrot.lane.b32.xlu0 %v5102_v50, %s4771_s7 }
 0x18a   : > { %v5910_v34 = vpop.permute.xlu1 %805 }
 0x18b   : > { %8835 = vst [vmem:[#allocation155_spill] sm:$0xff] %v5910_v34  ;;  %v5912_v37 = vpop.permute.xlu0 %803 }
 0x18c   : > { %8836 = vst [vmem:[#allocation156_spill] sm:$0xff] %v5912_v37  ;;  %985 = vrot.lane.b32.xlu1 %v5118_v20, %s4771_s7 }
 0x18d   : > { %983 = vrot.lane.b32.xlu0 %v5124_v13, %s4771_s7 }
 0x18e   : > { %v5918_v53 = vpop.permute.xlu1 %809 }
 0x18f   : > { %8837 = vst [vmem:[#allocation157_spill] sm:$0xff] %v5918_v53  ;;  %v5920_v59 = vpop.permute.xlu0 %807 }
 0x190   : > { %8838 = vst [vmem:[#allocation158_spill] sm:$0xff] %v5920_v59  ;;  %989 = vrot.lane.b32.xlu1 %v5140_v60, %s4771_s7  ;;  %v5943_v60 = vld [vmem:[%s4849_s28 + $0x1a0] sm:$0xff]  ;;  %v5948_v59 = vld [vmem:[%s4849_s28 + $0x198] sm:$0xff] }
 0x191   : > { %987 = vrot.lane.b32.xlu0 %v5146_v42, %s4771_s7 }
 0x192   : > { %v5926_v50 = vpop.permute.xlu1 %845 }
 0x193   : > { %v5928_v26 = vpop.permute.xlu0 %843 }
 0x194   : > { %993 = vrot.lane.b32.xlu1 %v5162_v49, %s4771_s7 }
 0x195   : > { %991 = vrot.lane.b32.xlu0 %v5168_v8, %s4771_s7 }
 0x196   : > { %v5934_v20 = vpop.permute.xlu1 %849 }
 0x197   : > { %v5936_v13 = vpop.permute.xlu0 %847 }
 0x198   : > { %997 = vrot.lane.b32.xlu1 %v5532_v0, %s4771_s7 }
 0x199   : > { %995 = vrot.lane.b32.xlu0 %v5537_v47, %s4771_s7 }
 0x19a   : > { %v5945_v42 = vpop.permute.xlu1 %853 }
 0x19b   : > { %v5950_v49 = vpop.permute.xlu0 %851 }
 0x19c   : > { %1001 = vrot.lane.b32.xlu1 %v5943_v60, %s4771_s7 }
 0x19d   : > { %999 = vrot.lane.b32.xlu0 %v5948_v59, %s4771_s7 }
 0x19e   : > { %v5956_v8 = vpop.permute.xlu1 %857 }
 0x19f   : > { %v5958_v0 = vpop.permute.xlu0 %855 }
 0x1a0   : > { %1037 = vrot.lane.b32.xlu1 %v4911_v25, %s4772_s8  ;;  %v8840_v25 = vld [vmem:[#allocation7_spill] sm:$0xff] }
 0x1a1   : > { %1035 = vrot.lane.b32.xlu0 %v4916_v28, %s4772_s8 }
 0x1a2   : > { %v5964_v47 = vpop.permute.xlu1 %861 }
 0x1a3   : > { %v5966_v53 = vpop.permute.xlu0 %859 }
 0x1a4   : > { %1041 = vrot.lane.b32.xlu1 %v4933_v33, %s4772_s8  ;;  %v8844_v33 = vld [vmem:[#allocation9_spill] sm:$0xff] }
 0x1a5   : > { %1039 = vrot.lane.b32.xlu0 %v8726_v17, %s4772_s8 }
 0x1a6   : > { %v5972_v37 = vpop.permute.xlu1 %865 }
 0x1a7   : > { %v5974_v34 = vpop.permute.xlu0 %863 }
 0x1a8   : > { %1045 = vrot.lane.b32.xlu1 %v8839_v19, %s4772_s8  ;;  %v8848_v19 = vld [vmem:[#allocation11_spill] sm:$0xff] }
 0x1a9   : > { %1043 = vrot.lane.b32.xlu0 %v8840_v25, %s4772_s8  ;;  %v1491_v25 = vld [vmem:[%s8435_s1] sm:$0xff] }
 0x1aa   : > { %v5980_v28 = vpop.permute.xlu1 %869 }
 0x1ab   : > { %8841 = vst [vmem:[#allocation6_spill] sm:$0xff] %v5980_v28  ;;  %v5982_v16 = vpop.permute.xlu0 %867  ;;  %v8930_v28 = vld [vmem:[#allocation54_spill] sm:$0xff] }
 0x1ac   : > { %8842 = vst [vmem:[#allocation7_spill] sm:$0xff] %v5982_v16  ;;  %1049 = vrot.lane.b32.xlu1 %v8843_v3, %s4772_s8  ;;  %v1492_v3 = vld [vmem:[%s8435_s1 + $0x8] sm:$0xff] }
 0x1ad   : > { %1047 = vrot.lane.b32.xlu0 %v8844_v33, %s4772_s8  ;;  %v3845_v33 = vpack.c.bf16 %v1492_v3, %v1491_v25  ;;  %v8927_v16 = vld [vmem:[#allocation52_spill] sm:$0xff] }
 0x1ae   : > { %v5988_v17 = vpop.permute.xlu1 %873 }
 0x1af   : > { %8845 = vst [vmem:[#allocation8_spill] sm:$0xff] %v5988_v17  ;;  %v5990_v62 = vpop.permute.xlu0 %871  ;;  %3846 = vmatprep.subr.bf16.mxu0 %v3845_v33  ;;  %v4673_v17 = vld [vmem:[%s4849_s28 + $0x8] sm:$0xff] }
 0x1b0   : > { %8846 = vst [vmem:[#allocation9_spill] sm:$0xff] %v5990_v62  ;;  %1053 = vrot.lane.b32.xlu1 %v8847_v56, %s4772_s8  ;;  %v8852_v56 = vld [vmem:[#allocation13_spill] sm:$0xff]  ;;  %3848 = vmatpush3.bf16.msra.mxu0 %v3845_v33  ;;  %v8921_v62 = vld [vmem:[#allocation46_spill] sm:$0xff] }
 0x1b1   : > { %1051 = vrot.lane.b32.xlu0 %v8848_v19, %s4772_s8  ;;  %v1493_v19 = vld [vmem:[%s8435_s1 + $0x10] sm:$0xff] }
 0x1b2   : > { %v6002_v54 = vpop.permute.xlu1 %877  ;;  %v3849_v25 = vpack.c.bf16 %v1494_v40, %v1493_v19  ;;  %v8859_v40 = vld [vmem:[#allocation16_spill] sm:$0xff]  ;;  %v8860_v19 = vld [vmem:[#allocation17_spill] sm:$0xff] }
 0x1b3   : > { %8849 = vst [vmem:[#allocation10_spill] sm:$0xff] %v6002_v54  ;;  %v6004_v48 = vpop.permute.xlu0 %875  ;;  %v1495_v54 = vld [vmem:[%s8435_s1 + $0x20] sm:$0xf] }
 0x1b4   : > { %8850 = vst [vmem:[#allocation11_spill] sm:$0xff] %v6004_v48  ;;  %1057 = vrot.lane.b32.xlu1 %v8851_v46, %s4772_s8  ;;  %v8855_v46 = vld [vmem:[#allocation14_spill] sm:$0xff]  ;;  %3850 = vmatprep.subr.bf16.mxu0 %v3849_v25 }
 0x1b5   : > { %1055 = vrot.lane.b32.xlu0 %v8852_v56, %s4772_s8  ;;  %v8856_v56 = vld [vmem:[#allocation15_spill] sm:$0xff]  ;;  %3852 = vmatpush3.bf16.msra.mxu0 %v3849_v25 }
 0x1b6   : > { %v6016_v38 = vpop.permute.xlu1 %881  ;;  %3795 = vmatprep.subr.msk.mxu0 %vm1593_vm2, %v1495_v54 }
 0x1b7   : > { %8853 = vst [vmem:[#allocation12_spill] sm:$0xff] %v6016_v38  ;;  %v6018_v3 = vpop.permute.xlu0 %879  ;;  %v8894_v38 = vld [vmem:[#allocation42_spill] sm:$0xff] }
 0x1b8   : > { %8854 = vst [vmem:[#allocation13_spill] sm:$0xff] %v6018_v3  ;;  %1061 = vrot.lane.b32.xlu1 %v8855_v46, %s4772_s8 }
 0x1b9   : > { %1059 = vrot.lane.b32.xlu0 %v8856_v56, %s4772_s8  ;;  %3796 = vmatpush3.msk.msra.mxu0 %vm1593_vm2, %v1495_v54  ;;  %v8863_v56 = vld [vmem:[#allocation18_spill] sm:$0xff] }
 0x1ba   : > { %v6024_v33 = vpop.permute.xlu1 %885 }
 0x1bb   : > { %8857 = vst [vmem:[#allocation14_spill] sm:$0xff] %v6024_v33  ;;  %v6026_v48 = vpop.permute.xlu0 %883 }
 0x1bc   : > { %8858 = vst [vmem:[#allocation15_spill] sm:$0xff] %v6026_v48  ;;  %1065 = vrot.lane.b32.xlu1 %v8859_v40, %s4772_s8  ;;  %v8864_v48 = vld [vmem:[#allocation19_spill] sm:$0xff]  ;;  %v8867_v40 = vld [vmem:[#allocation20_spill] sm:$0xff] }
 0x1bd   : > { %1063 = vrot.lane.b32.xlu0 %v8860_v19, %s4772_s8  ;;  %v8868_v19 = vld [vmem:[#allocation21_spill] sm:$0xff] }
 0x1be   : > { %v6035_v46 = vpop.permute.xlu1 %889 }
 0x1bf   : > { %8861 = vst [vmem:[#allocation16_spill] sm:$0xff] %v6035_v46  ;;  %v6037_v25 = vpop.permute.xlu0 %887 }
 0x1c0   : > { %8862 = vst [vmem:[#allocation17_spill] sm:$0xff] %v6037_v25  ;;  %1069 = vrot.lane.b32.xlu1 %v8863_v56, %s4772_s8 }
 0x1c1   : > { %1067 = vrot.lane.b32.xlu0 %v8864_v48, %s4772_s8 }
 0x1c2   : > { %v6043_v33 = vpop.permute.xlu1 %893 }
 0x1c3   : > { %8865 = vst [vmem:[#allocation18_spill] sm:$0xff] %v6043_v33  ;;  %v6045_v3 = vpop.permute.xlu0 %891  ;;  %v8890_v33 = vld [vmem:[#allocation24_spill] sm:$0xff] }
 0x1c4   : > { %8866 = vst [vmem:[#allocation19_spill] sm:$0xff] %v6045_v3  ;;  %1073 = vrot.lane.b32.xlu1 %v8867_v40, %s4772_s8 }
 0x1c5   : > { %1071 = vrot.lane.b32.xlu0 %v8868_v19, %s4772_s8 }
 0x1c6   : > { %v6051_v54 = vpop.permute.xlu1 %897 }
 0x1c7   : > { %8869 = vst [vmem:[#allocation20_spill] sm:$0xff] %v6051_v54  ;;  %v6053_v46 = vpop.permute.xlu0 %895 }
 0x1c8   : > { %8870 = vst [vmem:[#allocation21_spill] sm:$0xff] %v6053_v46  ;;  %1133 = vrot.lane.b32.xlu1 %v5221_v43, %s4773_s9  ;;  %v8883_v46 = vld [vmem:[#allocation22_spill] sm:$0xff] }
 0x1c9   : > { %1131 = vrot.lane.b32.xlu0 %v5226_v14, %s4773_s9 }
 0x1ca   : > { %v6059_v48 = vpop.permute.xlu1 %901 }
 0x1cb   : > { %8871 = vst [vmem:[#allocation159_spill] sm:$0xff] %v6059_v48  ;;  %v6061_v56 = vpop.permute.xlu0 %899 }
 0x1cc   : > { %8872 = vst [vmem:[#allocation160_spill] sm:$0xff] %v6061_v56  ;;  %1137 = vrot.lane.b32.xlu1 %v5234_v5, %s4773_s9 }
 0x1cd   : > { %1135 = vrot.lane.b32.xlu0 %v8782_v2, %s4773_s9 }
 0x1ce   : > { %v6067_v40 = vpop.permute.xlu1 %905 }
 0x1cf   : > { %8873 = vst [vmem:[#allocation161_spill] sm:$0xff] %v6067_v40  ;;  %v6069_v19 = vpop.permute.xlu0 %903 }
 0x1d0   : > { %8874 = vst [vmem:[#allocation162_spill] sm:$0xff] %v6069_v19  ;;  %1141 = vrot.lane.b32.xlu1 %v5247_v51, %s4773_s9  ;;  %v8875_v19 = vld [vmem:[#allocation36_spill] sm:$0xff] }
 0x1d1   : > { %1139 = vrot.lane.b32.xlu0 %v8785_v27, %s4773_s9 }
 0x1d2   : > { %v6075_v43 = vpop.permute.xlu1 %941 }
 0x1d3   : > { %v6077_v14 = vpop.permute.xlu0 %939 }
 0x1d4   : > { %1145 = vrot.lane.b32.xlu1 %v5260_v6, %s4773_s9 }
 0x1d5   : > { %1143 = vrot.lane.b32.xlu0 %v8788_v55, %s4773_s9 }
 0x1d6   : > { %v6083_v5 = vpop.permute.xlu1 %945 }
 0x1d7   : > { %v6085_v2 = vpop.permute.xlu0 %943 }
 0x1d8   : > { %1149 = vrot.lane.b32.xlu1 %v5273_v4, %s4773_s9 }
 0x1d9   : > { %1147 = vrot.lane.b32.xlu0 %v8791_v29, %s4773_s9 }
 0x1da   : > { %v6091_v51 = vpop.permute.xlu1 %949 }
 0x1db   : > { %v6093_v27 = vpop.permute.xlu0 %947 }
 0x1dc   : > { %1153 = vrot.lane.b32.xlu1 %v5286_v52, %s4773_s9  ;;  %v8876_v52 = vld [vmem:[#allocation37_spill] sm:$0xff] }
 0x1dd   : > { %1151 = vrot.lane.b32.xlu0 %v8794_v1, %s4773_s9 }
 0x1de   : > { %v6099_v6 = vpop.permute.xlu1 %953 }
 0x1df   : > { %v6101_v55 = vpop.permute.xlu0 %951 }
 0x1e0   : > { %1157 = vrot.lane.b32.xlu1 %v5299_v10, %s4773_s9  ;;  %v8877_v10 = vld [vmem:[#allocation38_spill] sm:$0xff] }
 0x1e1   : > { %1155 = vrot.lane.b32.xlu0 %v8797_v36, %s4773_s9 }
 0x1e2   : > { %v6107_v4 = vpop.permute.xlu1 %957 }
 0x1e3   : > { %v6109_v29 = vpop.permute.xlu0 %955 }
 0x1e4   : > { %1161 = vrot.lane.b32.xlu1 %v8875_v19, %s4773_s9  ;;  %v8880_v19 = vld [vmem:[#allocation40_spill] sm:$0xff] }
 0x1e5   : > { %1159 = vrot.lane.b32.xlu0 %v8876_v52, %s4773_s9 }
 0x1e6   : > { %v6115_v1 = vpop.permute.xlu1 %961 }
 0x1e7   : > { %v6117_v40 = vpop.permute.xlu0 %959 }
 0x1e8   : > { %1165 = vrot.lane.b32.xlu1 %v5325_v41, %s4773_s9  ;;  %v8884_v41 = vld [vmem:[#allocation23_spill] sm:$0xff] }
 0x1e9   : > { %1163 = vrot.lane.b32.xlu0 %v8877_v10, %s4773_s9 }
 0x1ea   : > { %v6123_v36 = vpop.permute.xlu1 %965 }
 0x1eb   : > { %8878 = vst [vmem:[#allocation36_spill] sm:$0xff] %v6123_v36  ;;  %v6125_v56 = vpop.permute.xlu0 %963 }
 0x1ec   : > { %8879 = vst [vmem:[#allocation37_spill] sm:$0xff] %v6125_v56  ;;  %1169 = vrot.lane.b32.xlu1 %v8806_v21, %s4773_s9  ;;  %v8887_v21 = vld [vmem:[#allocation41_spill] sm:$0xff]  ;;  %v8925_v56 = vld [vmem:[#allocation50_spill] sm:$0xff] }
 0x1ed   : > { %1167 = vrot.lane.b32.xlu0 %v8880_v19, %s4773_s9 }
 0x1ee   : > { %v6131_v52 = vpop.permute.xlu1 %969 }
 0x1ef   : > { %8881 = vst [vmem:[#allocation38_spill] sm:$0xff] %v6131_v52  ;;  %v6133_v48 = vpop.permute.xlu0 %967 }
 0x1f0   : > { %8882 = vst [vmem:[#allocation40_spill] sm:$0xff] %v6133_v48  ;;  %1077 = vrot.lane.b32.xlu1 %v8883_v46, %s4772_s8  ;;  %v8891_v46 = vld [vmem:[#allocation25_spill] sm:$0xff] }
 0x1f1   : > { %1075 = vrot.lane.b32.xlu0 %v8884_v41, %s4772_s8  ;;  %v8920_v48 = vld [vmem:[#allocation45_spill] sm:$0xff] }
 0x1f2   : > { %v6139_v10 = vpop.permute.xlu1 %973  ;;  %v1228_v52 = vsel %vm1227_vm3, %v4671_v30, %v8920_v48  ;;  %v4676_v30 = vld [vmem:[%s4849_s28 + $0x50] sm:$0xff]  ;;  %v8926_v48 = vld [vmem:[#allocation51_spill] sm:$0xff] }
 0x1f3   : > { %8885 = vst [vmem:[#allocation22_spill] sm:$0xff] %v6139_v10  ;;  %v6141_v54 = vpop.permute.xlu0 %971  ;;  %v8919_v10 = vld [vmem:[#allocation43_spill] sm:$0xff] }
 0x1f4   : > { %8886 = vst [vmem:[#allocation23_spill] sm:$0xff] %v6141_v54  ;;  %1173 = vrot.lane.b32.xlu1 %v5351_v23, %s4773_s9  ;;  %v4670_v54 = vld [vmem:[%s4849_s28 + $0x18] sm:$0xff] }
 0x1f5   : > { %1171 = vrot.lane.b32.xlu0 %v8887_v21, %s4773_s9  ;;  %v1230_v32 = vsel %vm1227_vm3, %v4670_v54, %v8919_v10  ;;  %v4675_v10 = vld [vmem:[%s4849_s28 + $0x30] sm:$0xff] }
 0x1f6   : > { %v6147_v19 = vpop.permute.xlu1 %977  ;;  %v1232_v36 = vsel %vm1227_vm3, %v4675_v10, %v8925_v56  ;;  %v4679_v10 = vld [vmem:[%s4849_s28 + $0x60] sm:$0xff] }
 0x1f7   : > { %8888 = vst [vmem:[#allocation41_spill] sm:$0xff] %v6147_v19  ;;  %v6149_v3 = vpop.permute.xlu0 %975 }
 0x1f8   : > { %8889 = vst [vmem:[#allocation163_spill] sm:$0xff] %v6149_v3  ;;  %1081 = vrot.lane.b32.xlu1 %v8890_v33, %s4772_s8  ;;  %v8897_v3 = vld [vmem:[#allocation26_spill] sm:$0xff]  ;;  %v8898_v33 = vld [vmem:[#allocation27_spill] sm:$0xff] }
 0x1f9   : > { %1079 = vrot.lane.b32.xlu0 %v8891_v46, %s4772_s8 }
 0x1fa   : > { %v6155_v41 = vpop.permute.xlu1 %981 }
 0x1fb   : > { %8892 = vst [vmem:[#allocation24_spill] sm:$0xff] %v6155_v41  ;;  %v6157_v25 = vpop.permute.xlu0 %979 }
 0x1fc   : > { %8893 = vst [vmem:[#allocation25_spill] sm:$0xff] %v6157_v25  ;;  %1177 = vrot.lane.b32.xlu1 %v8894_v38, %s4773_s9 }
 0x1fd   : > { %1175 = vrot.lane.b32.xlu0 %v8813_v39, %s4773_s9  ;;  %v8901_v39 = vld [vmem:[#allocation47_spill] sm:$0xff] }
 0x1fe   : > { %v6163_v23 = vpop.permute.xlu1 %985 }
 0x1ff   : > { %8895 = vst [vmem:[#allocation42_spill] sm:$0xff] %v6163_v23  ;;  %v6165_v21 = vpop.permute.xlu0 %983  ;;  %v8904_v23 = vld [vmem:[#allocation28_spill] sm:$0xff] }
 0x200   : > { %8896 = vst [vmem:[#allocation164_spill] sm:$0xff] %v6165_v21  ;;  %1085 = vrot.lane.b32.xlu1 %v8897_v3, %s4772_s8  ;;  %v8905_v3 = vld [vmem:[#allocation29_spill] sm:$0xff] }
 0x201   : > { %1083 = vrot.lane.b32.xlu0 %v8898_v33, %s4772_s8 }
 0x202   : > { %v6171_v46 = vpop.permute.xlu1 %989 }
 0x203   : > { %8899 = vst [vmem:[#allocation26_spill] sm:$0xff] %v6171_v46  ;;  %v6173_v25 = vpop.permute.xlu0 %987 }
 0x204   : > { %8900 = vst [vmem:[#allocation27_spill] sm:$0xff] %v6173_v25  ;;  %1181 = vrot.lane.b32.xlu1 %v5381_v35, %s4773_s9 }
 0x205   : > { %1179 = vrot.lane.b32.xlu0 %v8901_v39, %s4773_s9  ;;  %v222_v39 = vld [vmem:[%s4849_s28 + $0x1a8] sm:$0x3] }
 0x206   : > { %v6179_v38 = vpop.permute.xlu1 %993 }
 0x207   : > { %8902 = vst [vmem:[#allocation47_spill] sm:$0xff] %v6179_v38  ;;  %v6181_v21 = vpop.permute.xlu0 %991  ;;  %v449_v38 = vrot.slane %v5948_v59, 1 }
 0x208   : > { %8903 = vst [vmem:[#allocation165_spill] sm:$0xff] %v6181_v21  ;;  %1089 = vrot.lane.b32.xlu1 %v8904_v23, %s4772_s8  ;;  %v8910_v23 = vld [vmem:[#allocation112_spill] sm:$0xff] }
 0x209   : > { %1087 = vrot.lane.b32.xlu0 %v8905_v3, %s4772_s8  ;;  %v450_v3 = vrot.slane %v5943_v60, 1 }
 0x20a   : > { %v6187_v33 = vpop.permute.xlu1 %997 }
 0x20b   : > { %8906 = vst [vmem:[#allocation28_spill] sm:$0xff] %v6187_v33  ;;  %v6189_v46 = vpop.permute.xlu0 %995  ;;  %v8911_v33 = vld [vmem:[#allocation114_spill] sm:$0xff]  ;;  %v451_v41 = vsel %vm271_vm0, %v449_v38, %v450_v3 }
 0x20c   : > { %8907 = vst [vmem:[#allocation29_spill] sm:$0xff] %v6189_v46  ;;  %1185 = vrot.lane.b32.xlu1 %v5398_v58, %s4773_s9  ;;  %v452_v46 = vrot.slane %v222_v39, 1 }
 0x20d   : > { %1183 = vrot.lane.b32.xlu0 %v5403_v44, %s4773_s9  ;;  %v455_v44 = vrot.slane %v5943_v60, 2 }
 0x20e   : > { %v6195_v35 = vpop.permute.xlu1 %1001 }
 0x20f   : > { %8908 = vst [vmem:[#allocation166_spill] sm:$0xff] %v6195_v35  ;;  %v6198_v21 = vpop.permute.xlu0 %999 }
 0x210   : > { %8909 = vst [vmem:[#allocation167_spill] sm:$0xff] %v6198_v21  ;;  %1093 = vrot.lane.b32.xlu1 %v8910_v23, %s4772_s8  ;;  %v453_v23 = vsel %vm271_vm0, %v450_v3, %v452_v46  ;;  %v457_v21 = vrot.slane %v222_v39, 2 }
 0x211   : > { %1091 = vrot.lane.b32.xlu0 %v8911_v33, %s4772_s8  ;;  %v454_v33 = vrot.slane %v5948_v59, 2 }
 0x212   : > { %v6206_v58 = vpop.permute.xlu1 %1037 }
 0x213   : > { %v6208_v25 = vpop.permute.xlu0 %1035 }
 0x214   : > { %1189 = vrot.lane.b32.xlu1 %v5809_v18, %s4773_s9  ;;  %v458_v18 = vsel %vm352_vm1, %v455_v44, %v457_v21 }
 0x215   : > { %1187 = vrot.lane.b32.xlu0 %v5814_v63, %s4773_s9  ;;  %v456_v63 = vsel %vm352_vm1, %v454_v33, %v455_v44 }
 0x216   : > { %v6217_v35 = vpop.permute.xlu1 %1041 }
 0x217   : > { %v6220_v19 = vpop.permute.xlu0 %1039 }
 0x218   : > { %1097 = vrot.lane.b32.xlu1 %v453_v23, %s4772_s8 }
 0x219   : > { %1095 = vrot.lane.b32.xlu0 %v451_v41, %s4772_s8 }
 0x21a   : > { %v6225_v60 = vpop.permute.xlu1 %1045 }
 0x21b   : > { %v6228_v46 = vpop.permute.xlu0 %1043 }
 0x21c   : > { %1193 = vrot.lane.b32.xlu1 %v458_v18, %s4773_s9 }
 0x21d   : > { %1191 = vrot.lane.b32.xlu0 %v456_v63, %s4773_s9 }
 0x21e   : > { %v6232_v59 = vpop.permute.xlu1 %1049 }
 0x21f   : > { %v6234_v38 = vpop.permute.xlu0 %1047 }
 0x222   : > { %v6236_v39 = vpop.permute.xlu1 %1053 }
 0x223   : > { %v6238_v41 = vpop.permute.xlu0 %1051 }
 0x226   : > { %v6240_v21 = vpop.permute.xlu1 %1057 }
 0x227   : > { %8912 = vst [vmem:[#allocation112_spill] sm:$0xff] %v6240_v21  ;;  %v6242_v3 = vpop.permute.xlu0 %1055  ;;  %v8936_v21 = vld [vmem:[#allocation44_spill] sm:$0xff] }
 0x228   : > { %8913 = vst [vmem:[#allocation114_spill] sm:$0xff] %v6242_v3 }
 0x22a   : > { %v6244_v44 = vpop.permute.xlu1 %1061 }
 0x22b   : > { %8914 = vst [vmem:[#allocation168_spill] sm:$0xff] %v6244_v44  ;;  %v6246_v23 = vpop.permute.xlu0 %1059  ;;  %v8924_v44 = vld [vmem:[#allocation49_spill] sm:$0xff] }
 0x22c   : > { %8915 = vst [vmem:[#allocation169_spill] sm:$0xff] %v6246_v23  ;;  %v1229_v23 = vsel %vm1227_vm3, %v4673_v17, %v8922_v24  ;;  %v1233_v54 = vsel %vm1227_vm3, %v4674_v22, %v8924_v44  ;;  %v4678_v17 = vld [vmem:[%s4849_s28 + $0x68] sm:$0xff]  ;;  %v8929_v44 = vld [vmem:[#allocation77_spill] sm:$0xff] }
 0x22d   : > { %v1262_v56 = vsel %vm1260_vm4, %v1229_v23, %v8929_v44  ;;  %v8935_v23 = vld [vmem:[#allocation109_spill] sm:$0xff] }
 0x22e   : > { %v6248_v33 = vpop.permute.xlu1 %1065 }
 0x22f   : > { %8916 = vst [vmem:[#allocation170_spill] sm:$0xff] %v6248_v33  ;;  %v6250_v18 = vpop.permute.xlu0 %1063  ;;  %v4672_v33 = vld [vmem:[%s4849_s28 + $0x20] sm:$0xff] }
 0x230   : > { %8917 = vst [vmem:[#allocation171_spill] sm:$0xff] %v6250_v18  ;;  %v1231_v18 = vsel %vm1227_vm3, %v4672_v33, %v8921_v62  ;;  %v6277_v62 = vsel %vm1227_vm3, %v4676_v30, %v8926_v48  ;;  %v4677_v33 = vld [vmem:[%s4849_s28 + $0x48] sm:$0xff]  ;;  %v6294_v30 = vsel %vm1227_vm3, %v4679_v10, %v8930_v28  ;;  %v8931_v48 = vld [vmem:[#allocation78_spill] sm:$0xff] }
 0x231   : > { %v6282_v24 = vsel %vm1227_vm3, %v4677_v33, %v8927_v16  ;;  %v1261_v15 = vsel %vm1260_vm4, %v1228_v52, %v8931_v48  ;;  %v8932_v16 = vld [vmem:[#allocation108_spill] sm:$0xff]  ;;  %v4681_v52 = vld [vmem:[%s4849_s28 + $0x78] sm:$0xff] }
 0x232   : > { %v6252_v63 = vpop.permute.xlu1 %1069  ;;  %v1295_v33 = vsel %vm1293_vm5, %v1262_v56, %v8932_v16  ;;  %v1294_v44 = vsel %vm1293_vm5, %v1261_v15, %v8935_v23  ;;  %v8937_v48 = vld [vmem:[#allocation56_spill] sm:$0xff]  ;;  %v8938_v16 = vld [vmem:[#allocation135_spill] sm:$0xff] }
 0x233   : > { %8918 = vst [vmem:[#allocation172_spill] sm:$0xff] %v6252_v63  ;;  %v6266_v63 = vpop.permute.xlu0 %1067  ;;  %v1328_v28 = vsel %vm1326_vm6, %v1295_v33, %v8936_v21  ;;  %v6316_v56 = vsel %vm1227_vm3, %v4681_v52, %v8937_v48  ;;  %v8939_v15 = vld [vmem:[#allocation79_spill] sm:$0xff]  ;;  %v8940_v21 = vld [vmem:[#allocation80_spill] sm:$0xff]  ;;  %v8941_v48 = vld [vmem:[#allocation110_spill] sm:$0xff] }
 0x234   : > { %8923 = vst [vmem:[#allocation43_spill] sm:$0xff] %v6266_v63  ;;  %v8928_v63 = vld [vmem:[#allocation53_spill] sm:$0xff]  ;;  %v1263_v33 = vsel %vm1260_vm4, %v1230_v32, %v8940_v21 }
 0x235   : > { %v6287_v22 = vsel %vm1227_vm3, %v4678_v17, %v8928_v63  ;;  %v4680_v63 = vld [vmem:[%s4849_s28 + $0x80] sm:$0xff] }
 0x236   : > { %v6300_v3 = vpop.permute.xlu1 %1073  ;;  %v8934_v17 = vld [vmem:[#allocation55_spill] sm:$0xff] }
 0x237   : > { %8933 = vst [vmem:[#allocation45_spill] sm:$0xff] %v6300_v3  ;;  %v6305_v11 = vsel %vm1227_vm3, %v4680_v63, %v8934_v17  ;;  %v6311_v10 = vpop.permute.xlu0 %1071  ;;  %v1327_v3 = vsel %vm1326_vm6, %v1294_v44, %v8938_v16  ;;  %v1361_v63 = vsel %vm1359_vm7, %v1328_v28, %v5926_v50  ;;  %v1264_v17 = vsel %vm1260_vm4, %v1231_v18, %v8939_v15  ;;  %v8942_v18 = vld [vmem:[#allocation111_spill] sm:$0xff]  ;;  %v8943_v15 = vld [vmem:[#allocation136_spill] sm:$0xff] }
 0x238   : > { %v1360_v23 = vsel %vm1359_vm7, %v1327_v3, %v5928_v26  ;;  %v1394_v52 = vsel %vm1392_vm8, %v1361_v63, %v6075_v43  ;;  %v1297_v44 = vsel %vm1293_vm5, %v1264_v17, %v8941_v48  ;;  %v1296_v32 = vsel %vm1293_vm5, %v1263_v33, %v8942_v18  ;;  %v4682_v17 = vld [vmem:[%s4849_s28 + $0x98] sm:$0xff]  ;;  %v8948_v48 = vld [vmem:[#allocation81_spill] sm:$0xff] }
 0x239   : > { %v1393_v50 = vsel %vm1392_vm8, %v1360_v23, %v6077_v14  ;;  %v1427_v28 = vsel %vm1425_vm9, %v1394_v52, %v6206_v58  ;;  %v1330_v26 = vsel %vm1326_vm6, %v1297_v44, %v8943_v15  ;;  %v8945_v14 = vld [vmem:[#allocation57_spill] sm:$0xff]  ;;  %v8951_v15 = vld [vmem:[#allocation115_spill] sm:$0xff] }
 0x23a   : > { %v1134_v16 = vpop.permute.xlu1 %1133  ;;  %v1426_v43 = vsel %vm1425_vm9, %v1393_v50, %v6208_v25  ;;  %v6348_v21 = vsel %vm1227_vm3, %v4682_v17, %v8945_v14  ;;  %v8946_v58 = vld [vmem:[#allocation137_spill] sm:$0xff]  ;;  %v1363_v33 = vsel %vm1359_vm7, %v1330_v26, %v5934_v20  ;;  %v1266_v25 = vsel %vm1260_vm4, %v1233_v54, %v8948_v48  ;;  %v8949_v20 = vld [vmem:[#allocation82_spill] sm:$0xff] }
 0x23b   : > { %v6343_v3 = vsel %vm1458_vm10, %v1427_v28, %v1134_v16  ;;  %v1132_v63 = vpop.permute.xlu0 %1131  ;;  %v1329_v23 = vsel %vm1326_vm6, %v1296_v32, %v8946_v58  ;;  %v1396_v50 = vsel %vm1392_vm8, %v1363_v33, %v6083_v5  ;;  %v1265_v16 = vsel %vm1260_vm4, %v1232_v36, %v8949_v20  ;;  %v8950_v18 = vld [vmem:[#allocation113_spill] sm:$0xff]  ;;  %v8953_v14 = vld [vmem:[#allocation58_spill] sm:$0xff]  ;;  %v8955_v33 = vld [vmem:[#allocation83_spill] sm:$0xff] }
 0x23c   : > { %8944 = vst [vmem:[#allocation46_spill] sm:$0xff] %v6343_v3  ;;  %v6355_v52 = vsel %vm1458_vm10, %v1426_v43, %v1132_v63  ;;  %v1362_v44 = vsel %vm1359_vm7, %v1329_v23, %v5936_v13  ;;  %v1299_v32 = vsel %vm1293_vm5, %v1266_v25, %v8950_v18  ;;  %v1429_v13 = vsel %vm1425_vm9, %v1396_v50, %v6217_v35  ;;  %v4683_v17 = vld [vmem:[%s4849_s28 + $0x90] sm:$0xff]  ;;  %v8957_v50 = vld [vmem:[#allocation116_spill] sm:$0xff] }
 0x23d   : > { %8947 = vst [vmem:[#allocation48_spill] sm:$0xff] %v6355_v52  ;;  %3797 = vmatprep.mubr.msk.f32.mxu0 %vm1496_vm11, %v6355_v52  ;;  %v1395_v54 = vsel %vm1392_vm8, %v1362_v44, %v6085_v2  ;;  %v1298_v26 = vsel %vm1293_vm5, %v1265_v16, %v8951_v15  ;;  %v1332_v43 = vsel %vm1326_vm6, %v1299_v32, %v5811_v7  ;;  %v8958_v16 = vld [vmem:[#allocation117_spill] sm:$0xff]  ;;  %v8961_v15 = vld [vmem:[#allocation138_spill] sm:$0xff] }
 0x23e   : > { %3798 = vmatmul.mubr.msk.f32.vlgmr.msra.gmra.mrb[0].mxu0 %vm1496_vm11, %v6343_v3  ;;  %v1138_v5 = vpop.permute.xlu1 %1137  ;;  %v1428_v36 = vsel %vm1425_vm9, %v1395_v54, %v6220_v19  ;;  %v6389_v35 = vsel %vm1227_vm3, %v4683_v17, %v8953_v14  ;;  %v1331_v58 = vsel %vm1326_vm6, %v1298_v26, %v5816_v45  ;;  %v1365_v23 = vsel %vm1359_vm7, %v1332_v43, %v5945_v42  ;;  %v8956_v42 = vld [vmem:[#allocation84_spill] sm:$0xff] }
 0x23f   : > { %v6384_v63 = vsel %vm1458_vm10, %v1429_v13, %v1138_v5  ;;  %v1136_v2 = vpop.permute.xlu0 %1135  ;;  %v1268_v19 = vsel %vm1260_vm4, %v6277_v62, %v8955_v33  ;;  %v1364_v48 = vsel %vm1359_vm7, %v1331_v58, %v5950_v49  ;;  %v1398_v25 = vsel %vm1392_vm8, %v1365_v23, %v6091_v51  ;;  %v4684_v13 = vld [vmem:[%s4849_s28 + $0xb0] sm:$0xff]  ;;  %v8960_v5 = vld [vmem:[#allocation59_spill] sm:$0xff]  ;;  %v8965_v23 = vld [vmem:[#allocation118_spill] sm:$0xff] }
 0x240   : > { %8952 = vst [vmem:[#allocation49_spill] sm:$0xff] %v6384_v63  ;;  %v6396_v7 = vsel %vm1458_vm10, %v1428_v36, %v1136_v2  ;;  %v1267_v44 = vsel %vm1260_vm4, %v6282_v24, %v8956_v42  ;;  %v1301_v62 = vsel %vm1293_vm5, %v1268_v19, %v8957_v50  ;;  %v1397_v20 = vsel %vm1392_vm8, %v1364_v48, %v6093_v27  ;;  %v8963_v36 = vld [vmem:[#allocation85_spill] sm:$0xff]  ;;  %v8966_v19 = vld [vmem:[#allocation119_spill] sm:$0xff]  ;;  %v8968_v50 = vld [vmem:[#allocation60_spill] sm:$0xff] }
 0x241   : > { %8954 = vst [vmem:[#allocation50_spill] sm:$0xff] %v6396_v7  ;;  %3800 = vmatprep.mubr.msk.f32.mxu0 %vm1496_vm11, %v6396_v7  ;;  %v1431_v49 = vsel %vm1425_vm9, %v1398_v25, %v6225_v60  ;;  %v1300_v18 = vsel %vm1293_vm5, %v1267_v44, %v8958_v16  ;;  %v1334_v32 = vsel %vm1326_vm6, %v1301_v62, %v5822_v9  ;;  %v4685_v44 = vld [vmem:[%s4849_s28 + $0xa8] sm:$0xff] }
 0x242   : > { %3801 = vmatmul.mubr.msk.f32.gmra.mrb[2].mxu0 %vm1496_vm11, %v6384_v63  ;;  %v1142_v51 = vpop.permute.xlu1 %1141  ;;  %v1430_v24 = vsel %vm1425_vm9, %v1397_v20, %v6228_v46  ;;  %v6432_v60 = vsel %vm1227_vm3, %v4684_v13, %v8960_v5  ;;  %v1333_v26 = vsel %vm1326_vm6, %v1300_v18, %v8961_v15  ;;  %v1367_v43 = vsel %vm1359_vm7, %v1334_v32, %v5956_v8  ;;  %v8964_v8 = vld [vmem:[#allocation86_spill] sm:$0xff]  ;;  %v8972_v32 = vld [vmem:[#allocation120_spill] sm:$0xff] }
 0x243   : > { %v6427_v54 = vsel %vm1458_vm10, %v1431_v49, %v1142_v51  ;;  %v1140_v27 = vpop.permute.xlu0 %1139  ;;  %v1270_v46 = vsel %vm1260_vm4, %v6287_v22, %v8963_v36  ;;  %v1366_v2 = vsel %vm1359_vm7, %v1333_v26, %v5958_v0  ;;  %v1400_v17 = vsel %vm1392_vm8, %v1367_v43, %v6099_v6  ;;  %v4686_v26 = vld [vmem:[%s4849_s28 + $0xc8] sm:$0xff]  ;;  %v8975_v43 = vld [vmem:[#allocation61_spill] sm:$0xff] }
 0x244   : > { %8959 = vst [vmem:[#allocation51_spill] sm:$0xff] %v6427_v54  ;;  %v6439_v9 = vsel %vm1458_vm10, %v1430_v24, %v1140_v27  ;;  %v1269_v58 = vsel %vm1260_vm4, %v6294_v30, %v8964_v8  ;;  %v1303_v22 = vsel %vm1293_vm5, %v1270_v46, %v8965_v23  ;;  %v1399_v33 = vsel %vm1392_vm8, %v1366_v2, %v6101_v55  ;;  %v8973_v27 = vld [vmem:[#allocation121_spill] sm:$0xff]  ;;  %v8979_v23 = vld [vmem:[#allocation30_spill] sm:$0xff] }
 0x245   : > { %8962 = vst [vmem:[#allocation52_spill] sm:$0xff] %v6439_v9  ;;  %3803 = vmatprep.mubr.msk.f32.mxu0 %vm1496_vm11, %v6439_v9  ;;  %v1433_v0 = vsel %vm1425_vm9, %v1400_v17, %v6232_v59  ;;  %v1302_v48 = vsel %vm1293_vm5, %v1269_v58, %v8966_v19  ;;  %v1336_v25 = vsel %vm1326_vm6, %v1303_v22, %v5830_v57  ;;  %v8970_v57 = vld [vmem:[#allocation87_spill] sm:$0xff] }
 0x246   : > { %3804 = vmatmul.mubr.msk.f32.gmra.mrb[4].mxu0 %vm1496_vm11, %v6427_v54  ;;  %v1146_v6 = vpop.permute.xlu1 %1145  ;;  %v1432_v30 = vsel %vm1425_vm9, %v1399_v33, %v6234_v38  ;;  %v1242_v59 = vsel %vm1227_vm3, %v4685_v44, %v8968_v50  ;;  %v1335_v62 = vsel %vm1326_vm6, %v1302_v48, %v5832_v61  ;;  %v1369_v20 = vsel %vm1359_vm7, %v1336_v25, %v5964_v47  ;;  %v8971_v47 = vld [vmem:[#allocation88_spill] sm:$0xff]  ;;  %v8982_v19 = vld [vmem:[#allocation139_spill] sm:$0xff]  ;;  %v8985_v44 = vld [vmem:[#allocation62_spill] sm:$0xff] }
 0x247   : > { %v6470_v42 = vsel %vm1458_vm10, %v1433_v0, %v1146_v6  ;;  %v1144_v55 = vpop.permute.xlu0 %1143  ;;  %v1272_v38 = vsel %vm1260_vm4, %v6305_v11, %v8970_v57  ;;  %v1368_v51 = vsel %vm1359_vm7, %v1335_v62, %v5966_v53  ;;  %v1402_v16 = vsel %vm1392_vm8, %v1369_v20, %v6107_v4  ;;  %v8981_v0 = vld [vmem:[#allocation122_spill] sm:$0xff]  ;;  %v8986_v62 = vld [vmem:[#allocation140_spill] sm:$0xff] }
 0x248   : > { %8967 = vst [vmem:[#allocation53_spill] sm:$0xff] %v6470_v42  ;;  %v6480_v49 = vsel %vm1458_vm10, %v1432_v30, %v1144_v55  ;;  %v1271_v18 = vsel %vm1260_vm4, %v6316_v56, %v8971_v47  ;;  %v1305_v11 = vsel %vm1293_vm5, %v1272_v38, %v8972_v32  ;;  %v1401_v24 = vsel %vm1392_vm8, %v1368_v51, %v6109_v29  ;;  %v4687_v55 = vld [vmem:[%s4849_s28 + $0xc0] sm:$0xff]  ;;  %v8987_v57 = vld [vmem:[#allocation6_spill] sm:$0xff] }
 0x249   : > { %8969 = vst [vmem:[#allocation77_spill] sm:$0xff] %v6480_v49  ;;  %3806 = vmatprep.mubr.msk.f32.mxu0 %vm1496_vm11, %v6480_v49  ;;  %v1435_v53 = vsel %vm1425_vm9, %v1402_v16, %v6236_v39  ;;  %v1304_v13 = vsel %vm1293_vm5, %v1271_v18, %v8973_v27  ;;  %v1338_v5 = vsel %vm1326_vm6, %v1305_v11, %v5838_v12  ;;  %v8977_v12 = vld [vmem:[#allocation5_spill] sm:$0xff]  ;;  %v8989_v16 = vld [vmem:[#allocation90_spill] sm:$0xff]  ;;  %v8990_v18 = vld [vmem:[#allocation7_spill] sm:$0xff] }
 0x24a   : > { %3807 = vmatmul.mubr.msk.f32.gmra.mrb[6].mxu0 %vm1496_vm11, %v6470_v42  ;;  %v1150_v4 = vpop.permute.xlu1 %1149  ;;  %v1434_v56 = vsel %vm1425_vm9, %v1401_v24, %v6238_v41  ;;  %v1245_v39 = vsel %vm1227_vm3, %v4686_v26, %v8975_v43  ;;  %v1337_v36 = vsel %vm1326_vm6, %v1304_v13, %v5840_v31  ;;  %v1371_v46 = vsel %vm1359_vm7, %v1338_v5, %v5972_v37  ;;  %v8978_v37 = vld [vmem:[#allocation89_spill] sm:$0xff]  ;;  %v8991_v11 = vld [vmem:[#allocation36_spill] sm:$0xff]  ;;  %v8993_v13 = vld [vmem:[#allocation31_spill] sm:$0xff] }
 0x24b   : > { %v6511_v15 = vsel %vm1458_vm10, %v1435_v53, %v1150_v4  ;;  %v1148_v29 = vpop.permute.xlu0 %1147  ;;  %v1274_v41 = vsel %vm1260_vm4, %v6348_v21, %v8977_v12  ;;  %v1370_v17 = vsel %vm1359_vm7, %v1337_v36, %v5974_v34  ;;  %v1404_v8 = vsel %vm1392_vm8, %v1371_v46, %v6115_v1  ;;  %v8980_v34 = vld [vmem:[#allocation112_spill] sm:$0xff]  ;;  %v8992_v4 = vld [vmem:[#allocation91_spill] sm:$0xff]  ;;  %v8997_v12 = vld [vmem:[#allocation141_spill] sm:$0xff] }
 0x24c   : > { %8974 = vst [vmem:[#allocation54_spill] sm:$0xff] %v6511_v15  ;;  %v6521_v2 = vsel %vm1458_vm10, %v1434_v56, %v1148_v29  ;;  %v1273_v58 = vsel %vm1260_vm4, %v6389_v35, %v8978_v37  ;;  %v1307_v21 = vsel %vm1293_vm5, %v1274_v41, %v8979_v23  ;;  %v1403_v22 = vsel %vm1392_vm8, %v1370_v17, %v6117_v40  ;;  %v8983_v35 = vld [vmem:[#allocation114_spill] sm:$0xff]  ;;  %v8995_v29 = vld [vmem:[#allocation168_spill] sm:$0xff]  ;;  %v8996_v36 = vld [vmem:[#allocation123_spill] sm:$0xff] }
 0x24d   : > { %8976 = vst [vmem:[#allocation78_spill] sm:$0xff] %v6521_v2  ;;  %3809 = vmatprep.mubr.msk.f32.mxu0 %vm1496_vm11, %v6521_v2  ;;  %v1437_v33 = vsel %vm1425_vm9, %v1404_v8, %v8980_v34  ;;  %v1306_v6 = vsel %vm1293_vm5, %v1273_v58, %v8981_v0  ;;  %v1340_v48 = vsel %vm1326_vm6, %v1307_v21, %v8982_v19  ;;  %v4688_v58 = vld [vmem:[%s4849_s28 + $0xe0] sm:$0xff] }
 0x24e   : > { %3810 = vmatmul.mubr.msk.f32.gmra.mrb[8].mxu0 %vm1496_vm11, %v6511_v15  ;;  %v1154_v1 = vpop.permute.xlu1 %1153  ;;  %v1436_v25 = vsel %vm1425_vm9, %v1403_v22, %v8983_v35  ;;  %v1244_v50 = vsel %vm1227_vm3, %v4687_v55, %v8985_v44  ;;  %v1339_v20 = vsel %vm1326_vm6, %v1306_v6, %v8986_v62  ;;  %v1373_v38 = vsel %vm1359_vm7, %v1340_v48, %v8987_v57  ;;  %v9000_v23 = vld [vmem:[#allocation63_spill] sm:$0xff]  ;;  %v9001_v22 = vld [vmem:[#allocation142_spill] sm:$0xff]  ;;  %v9004_v6 = vld [vmem:[#allocation92_spill] sm:$0xff] }
 0x24f   : > { %v6552_v30 = vsel %vm1458_vm10, %v1437_v33, %v1154_v1  ;;  %v1152_v40 = vpop.permute.xlu0 %1151  ;;  %v1276_v47 = vsel %vm1260_vm4, %v6432_v60, %v8989_v16  ;;  %v1372_v32 = vsel %vm1359_vm7, %v1339_v20, %v8990_v18  ;;  %v1406_v24 = vsel %vm1392_vm8, %v1373_v38, %v8991_v11  ;;  %v8994_v60 = vld [vmem:[#allocation37_spill] sm:$0xff]  ;;  %v9002_v33 = vld [vmem:[#allocation8_spill] sm:$0xff]  ;;  %v9010_v16 = vld [vmem:[#allocation170_spill] sm:$0xff] }
 0x250   : > { %8984 = vst [vmem:[#allocation108_spill] sm:$0xff] %v6552_v30  ;;  %v6562_v51 = vsel %vm1458_vm10, %v1436_v25, %v1152_v40  ;;  %v1275_v27 = vsel %vm1260_vm4, %v1242_v59, %v8992_v4  ;;  %v1309_v5 = vsel %vm1293_vm5, %v1276_v47, %v8993_v13  ;;  %v1405_v56 = vsel %vm1392_vm8, %v1372_v32, %v8994_v60  ;;  %v8998_v59 = vld [vmem:[#allocation169_spill] sm:$0xff]  ;;  %v9006_v25 = vld [vmem:[#allocation38_spill] sm:$0xff]  ;;  %v9008_v20 = vld [vmem:[#allocation32_spill] sm:$0xff] }
 0x251   : > { %8988 = vst [vmem:[#allocation55_spill] sm:$0xff] %v6562_v51  ;;  %3812 = vmatprep.mubr.msk.f32.mxu0 %vm1496_vm11, %v6562_v51  ;;  %v1439_v26 = vsel %vm1425_vm9, %v1406_v24, %v8995_v29  ;;  %v1308_v46 = vsel %vm1293_vm5, %v1275_v27, %v8996_v36  ;;  %v1342_v41 = vsel %vm1326_vm6, %v1309_v5, %v8997_v12  ;;  %v9005_v48 = vld [vmem:[#allocation9_spill] sm:$0xff]  ;;  %v9011_v32 = vld [vmem:[#allocation124_spill] sm:$0xff]  ;;  %v9012_v24 = vld [vmem:[#allocation143_spill] sm:$0xff] }
 0x252   : > { %3813 = vmatmul.mubr.msk.f32.gmra.mrb[10].mxu0 %vm1496_vm11, %v6552_v30  ;;  %v1158_v43 = vpop.permute.xlu1 %1157  ;;  %v1438_v17 = vsel %vm1425_vm9, %v1405_v56, %v8998_v59  ;;  %v1247_v21 = vsel %vm1227_vm3, %v4688_v58, %v9000_v23  ;;  %v1341_v34 = vsel %vm1326_vm6, %v1308_v46, %v9001_v22  ;;  %v1375_v1 = vsel %vm1359_vm7, %v1342_v41, %v9002_v33  ;;  %v9007_v44 = vld [vmem:[#allocation93_spill] sm:$0xff]  ;;  %v4689_v60 = vld [vmem:[%s4849_s28 + $0xd8] sm:$0xff]  ;;  %v9015_v56 = vld [vmem:[#allocation64_spill] sm:$0xff] }
 0x253   : > { %v6592_v8 = vsel %vm1458_vm10, %v1439_v26, %v1158_v43  ;;  %v1156_v37 = vpop.permute.xlu0 %1155  ;;  %v1278_v19 = vsel %vm1260_vm4, %v1245_v39, %v9004_v6  ;;  %v1374_v35 = vsel %vm1359_vm7, %v1341_v34, %v9005_v48  ;;  %v1408_v40 = vsel %vm1392_vm8, %v1375_v1, %v9006_v25  ;;  %v9009_v39 = vld [vmem:[#allocation40_spill] sm:$0xff]  ;;  %v9017_v36 = vld [vmem:[#allocation10_spill] sm:$0xff]  ;;  %v9022_v34 = vld [vmem:[#allocation95_spill] sm:$0xff] }
 0x254   : > { %8999 = vst [vmem:[#allocation109_spill] sm:$0xff] %v6592_v8  ;;  %v6602_v0 = vsel %vm1458_vm10, %v1438_v17, %v1156_v37  ;;  %v1277_v62 = vsel %vm1260_vm4, %v1244_v50, %v9007_v44  ;;  %v1311_v57 = vsel %vm1293_vm5, %v1278_v19, %v9008_v20  ;;  %v1407_v38 = vsel %vm1392_vm8, %v1374_v35, %v9009_v39  ;;  %v9013_v50 = vld [vmem:[#allocation171_spill] sm:$0xff]  ;;  %v9016_v26 = vld [vmem:[#allocation144_spill] sm:$0xff]  ;;  %v9019_v41 = vld [vmem:[#allocation94_spill] sm:$0xff] }
 0x255   : > { %9003 = vst [vmem:[#allocation44_spill] sm:$0xff] %v6602_v0  ;;  %3815 = vmatprep.mubr.msk.f32.mxu0 %vm1496_vm11, %v6602_v0  ;;  %v1441_v47 = vsel %vm1425_vm9, %v1408_v40, %v9010_v16  ;;  %v1310_v11 = vsel %vm1293_vm5, %v1277_v62, %v9011_v32  ;;  %v1344_v4 = vsel %vm1326_vm6, %v1311_v57, %v9012_v24  ;;  %v9020_v17 = vld [vmem:[#allocation11_spill] sm:$0xff]  ;;  %v9021_v58 = vld [vmem:[#allocation22_spill] sm:$0xff]  ;;  %v9023_v1 = vld [vmem:[#allocation33_spill] sm:$0xff] }
 0x256   : > { %3816 = vmatmul.mubr.msk.f32.gmra.mrb[12].mxu0 %vm1496_vm11, %v6592_v8  ;;  %v1162_v18 = vpop.permute.xlu1 %1161  ;;  %v1440_v27 = vsel %vm1425_vm9, %v1407_v38, %v9013_v50  ;;  %v1246_v29 = vsel %vm1227_vm3, %v4689_v60, %v9015_v56  ;;  %v1343_v43 = vsel %vm1326_vm6, %v1310_v11, %v9016_v26  ;;  %v1377_v46 = vsel %vm1359_vm7, %v1344_v4, %v9017_v36  ;;  %v9024_v19 = vld [vmem:[#allocation23_spill] sm:$0xff]  ;;  %v9025_v48 = vld [vmem:[#allocation172_spill] sm:$0xff]  ;;  %v9026_v40 = vld [vmem:[#allocation125_spill] sm:$0xff] }
 0x257   : > { %v6631_v13 = vsel %vm1458_vm10, %v1441_v47, %v1162_v18  ;;  %v1160_v5 = vpop.permute.xlu0 %1159  ;;  %v1280_v59 = vsel %vm1260_vm4, %v1247_v21, %v9019_v41  ;;  %v1376_v37 = vsel %vm1359_vm7, %v1343_v43, %v9020_v17  ;;  %v1410_v23 = vsel %vm1392_vm8, %v1377_v46, %v9021_v58  ;;  %v9027_v62 = vld [vmem:[#allocation145_spill] sm:$0xff]  ;;  %v9028_v57 = vld [vmem:[#allocation43_spill] sm:$0xff]  ;;  %v9030_v47 = vld [vmem:[#allocation146_spill] sm:$0xff] }
 0x258   : > { %9014 = vst [vmem:[#allocation56_spill] sm:$0xff] %v6631_v13  ;;  %v6641_v12 = vsel %vm1458_vm10, %v1440_v27, %v1160_v5  ;;  %v1279_v33 = vsel %vm1260_vm4, %v1246_v29, %v9022_v34  ;;  %v1313_v6 = vsel %vm1293_vm5, %v1280_v59, %v9023_v1  ;;  %v1409_v21 = vsel %vm1392_vm8, %v1376_v37, %v9024_v19  ;;  %v9031_v32 = vld [vmem:[#allocation12_spill] sm:$0xff]  ;;  %v9033_v4 = vld [vmem:[#allocation13_spill] sm:$0xff]  ;;  %v9035_v56 = vld [vmem:[#allocation163_spill] sm:$0xff] }
 0x259   : > { %9018 = vst [vmem:[#allocation135_spill] sm:$0xff] %v6641_v12  ;;  %3818 = vmatprep.mubr.msk.f32.mxu0 %vm1496_vm11, %v6641_v12  ;;  %v1443_v35 = vsel %vm1425_vm9, %v1410_v23, %v9025_v48  ;;  %v1312_v44 = vsel %vm1293_vm5, %v1279_v33, %v9026_v40  ;;  %v1346_v20 = vsel %vm1326_vm6, %v1313_v6, %v9027_v62  ;;  %v9034_v27 = vld [vmem:[#allocation41_spill] sm:$0xff]  ;;  %v4690_v17 = vld [vmem:[%s4849_s28 + $0xf8] sm:$0xff]  ;;  %v9041_v6 = vld [vmem:[#allocation96_spill] sm:$0xff] }
 0x25a   : > { %3819 = vmatmul.mubr.msk.f32.gmra.mrb[14].mxu0 %vm1496_vm11, %v6631_v13  ;;  %v1166_v25 = vpop.permute.xlu1 %1165  ;;  %v1442_v39 = vsel %vm1425_vm9, %v1409_v21, %v9028_v57  ;;  %v1345_v18 = vsel %vm1326_vm6, %v1312_v44, %v9030_v47  ;;  %v1379_v11 = vsel %vm1359_vm7, %v1346_v20, %v9031_v32  ;;  %v9036_v26 = vld [vmem:[#allocation45_spill] sm:$0xff]  ;;  %v9040_v33 = vld [vmem:[#allocation66_spill] sm:$0xff]  ;;  %v9045_v20 = vld [vmem:[#allocation147_spill] sm:$0xff] }
 0x25b   : > { %v6670_v38 = vsel %vm1458_vm10, %v1443_v35, %v1166_v25  ;;  %v1164_v16 = vpop.permute.xlu0 %1163  ;;  %v1378_v50 = vsel %vm1359_vm7, %v1345_v18, %v9033_v4  ;;  %v1412_v5 = vsel %vm1392_vm8, %v1379_v11, %v9034_v27  ;;  %v9038_v37 = vld [vmem:[#allocation65_spill] sm:$0xff]  ;;  %v9043_v35 = vld [vmem:[#allocation34_spill] sm:$0xff]  ;;  %v9048_v11 = vld [vmem:[#allocation15_spill] sm:$0xff] }
 0x25c   : > { %9029 = vst [vmem:[#allocation79_spill] sm:$0xff] %v6670_v38  ;;  %v6677_v24 = vsel %vm1458_vm10, %v1442_v39, %v1164_v16  ;;  %v1411_v29 = vsel %vm1392_vm8, %v1378_v50, %v9035_v56  ;;  %v1445_v43 = vsel %vm1425_vm9, %v1412_v5, %v9036_v26  ;;  %v1249_v58 = vsel %vm1227_vm3, %v4690_v17, %v9038_v37  ;;  %v4691_v34 = vld [vmem:[%s4849_s28 + $0xf0] sm:$0xff]  ;;  %v9044_v44 = vld [vmem:[#allocation126_spill] sm:$0xff]  ;;  %v9046_v16 = vld [vmem:[#allocation148_spill] sm:$0xff] }
 0x25d   : > { %9032 = vst [vmem:[#allocation80_spill] sm:$0xff] %v6677_v24  ;;  %3821 = vmatprep.mubr.msk.f32.mxu0 %vm1496_vm11, %v6677_v24  ;;  %v1444_v46 = vsel %vm1425_vm9, %v1411_v29, %v6311_v10  ;;  %v1248_v1 = vsel %vm1227_vm3, %v4691_v34, %v9040_v33  ;;  %v1282_v19 = vsel %vm1260_vm4, %v1249_v58, %v9041_v6  ;;  %v9042_v21 = vld [vmem:[#allocation97_spill] sm:$0xff]  ;;  %v9047_v18 = vld [vmem:[#allocation14_spill] sm:$0xff]  ;;  %v9049_v50 = vld [vmem:[#allocation24_spill] sm:$0xff] }
 0x25e   : > { %3822 = vmatmul.mubr.msk.f32.gmra.mrb[16].mxu0 %vm1496_vm11, %v6670_v38  ;;  %v1170_v36 = vpop.permute.xlu1 %1169  ;;  %v1281_v48 = vsel %vm1260_vm4, %v1248_v1, %v9042_v21  ;;  %v1315_v25 = vsel %vm1293_vm5, %v1282_v19, %v9043_v35  ;;  %v9050_v5 = vld [vmem:[#allocation25_spill] sm:$0xff]  ;;  %v9052_v17 = vld [vmem:[#allocation67_spill] sm:$0xff]  ;;  %v4693_v34 = vld [vmem:[%s4849_s28 + $0x108] sm:$0xff] }
 0x25f   : > { %v6696_v41 = vsel %vm1458_vm10, %v1445_v43, %v1170_v36  ;;  %v1168_v59 = vpop.permute.xlu0 %1167  ;;  %v1314_v62 = vsel %vm1293_vm5, %v1281_v48, %v9044_v44  ;;  %v1348_v57 = vsel %vm1326_vm6, %v1315_v25, %v9045_v20  ;;  %v9054_v33 = vld [vmem:[#allocation68_spill] sm:$0xff]  ;;  %v9055_v6 = vld [vmem:[#allocation98_spill] sm:$0xff]  ;;  %v9056_v48 = vld [vmem:[#allocation99_spill] sm:$0xff] }
 0x260   : > { %9037 = vst [vmem:[#allocation110_spill] sm:$0xff] %v6696_v41  ;;  %v6702_v23 = vsel %vm1458_vm10, %v1444_v46, %v1168_v59  ;;  %v1347_v47 = vsel %vm1326_vm6, %v1314_v62, %v9046_v16  ;;  %v1381_v32 = vsel %vm1359_vm7, %v1348_v57, %v9047_v18  ;;  %v4692_v59 = vld [vmem:[%s4849_s28 + $0x110] sm:$0xff]  ;;  %v1250_v1 = vsel %vm1227_vm3, %v4693_v34, %v9054_v33  ;;  %v9057_v25 = vld [vmem:[#allocation35_spill] sm:$0xff] }
 0x261   : > { %9039 = vst [vmem:[#allocation111_spill] sm:$0xff] %v6702_v23  ;;  %3824 = vmatprep.mubr.msk.f32.mxu0 %vm1496_vm11, %v6702_v23  ;;  %v1380_v4 = vsel %vm1359_vm7, %v1347_v47, %v9048_v11  ;;  %v1414_v27 = vsel %vm1392_vm8, %v1381_v32, %v9049_v50  ;;  %v1251_v37 = vsel %vm1227_vm3, %v4692_v59, %v9052_v17  ;;  %v9058_v62 = vld [vmem:[#allocation127_spill] sm:$0xff]  ;;  %v9059_v57 = vld [vmem:[#allocation149_spill] sm:$0xff]  ;;  %v9060_v47 = vld [vmem:[#allocation150_spill] sm:$0xff] }
 0x262   : > { %3825 = vmatmul.mubr.msk.f32.gmra.mrb[18].mxu0 %vm1496_vm11, %v6696_v41  ;;  %v1078_v40 = vpop.permute.xlu1 %1077  ;;  %v1413_v56 = vsel %vm1392_vm8, %v1380_v4, %v9050_v5  ;;  %v1284_v19 = vsel %vm1260_vm4, %v1251_v37, %v9055_v6  ;;  %v1283_v35 = vsel %vm1260_vm4, %v1250_v1, %v9056_v48  ;;  %v9061_v32 = vld [vmem:[#allocation16_spill] sm:$0xff]  ;;  %v9062_v4 = vld [vmem:[#allocation17_spill] sm:$0xff]  ;;  %v4695_v6 = vld [vmem:[%s4849_s28 + $0x120] sm:$0xff] }
 0x263   : > { %v1076_v39 = vpop.permute.xlu0 %1075  ;;  %v1447_v29 = vsel %vm1425_vm9, %v1414_v27, %v1078_v40  ;;  %v1317_v40 = vsel %vm1293_vm5, %v1284_v19, %v9057_v25  ;;  %v1316_v20 = vsel %vm1293_vm5, %v1283_v35, %v9058_v62  ;;  %v9063_v27 = vld [vmem:[#allocation42_spill] sm:$0xff]  ;;  %v4694_v37 = vld [vmem:[%s4849_s28 + $0x128] sm:$0xff]  ;;  %v9066_v34 = vld [vmem:[#allocation69_spill] sm:$0xff] }
 0x264   : > { %v1446_v43 = vsel %vm1425_vm9, %v1413_v56, %v1076_v39  ;;  %v1350_v39 = vsel %vm1326_vm6, %v1317_v40, %v9059_v57  ;;  %v1349_v18 = vsel %vm1326_vm6, %v1316_v20, %v9060_v47  ;;  %v9064_v56 = vld [vmem:[#allocation164_spill] sm:$0xff]  ;;  %v1253_v33 = vsel %vm1227_vm3, %v4694_v37, %v9066_v34  ;;  %v9068_v19 = vld [vmem:[#allocation70_spill] sm:$0xff] }
 0x265   : > { %v1383_v11 = vsel %vm1359_vm7, %v1350_v39, %v9061_v32  ;;  %v1382_v50 = vsel %vm1359_vm7, %v1349_v18, %v9062_v4  ;;  %v1252_v48 = vsel %vm1227_vm3, %v4695_v6, %v9068_v19  ;;  %v9069_v35 = vld [vmem:[#allocation100_spill] sm:$0xff]  ;;  %v9073_v18 = vld [vmem:[#allocation151_spill] sm:$0xff] }
 0x266   : > { %v1174_v26 = vpop.permute.xlu1 %1173  ;;  %v1416_v5 = vsel %vm1392_vm8, %v1383_v11, %v9063_v27  ;;  %v1286_v25 = vsel %vm1260_vm4, %v1253_v33, %v9069_v35  ;;  %v9071_v20 = vld [vmem:[#allocation128_spill] sm:$0xff]  ;;  %v9075_v27 = vld [vmem:[#allocation18_spill] sm:$0xff]  ;;  %v9080_v35 = vld [vmem:[#allocation71_spill] sm:$0xff] }
 0x267   : > { %v6736_v36 = vsel %vm1458_vm10, %v1447_v29, %v1174_v26  ;;  %v1172_v46 = vpop.permute.xlu0 %1171  ;;  %v1415_v29 = vsel %vm1392_vm8, %v1382_v50, %v9064_v56  ;;  %v1319_v57 = vsel %vm1293_vm5, %v1286_v25, %v9071_v20  ;;  %v9074_v4 = vld [vmem:[#allocation152_spill] sm:$0xff]  ;;  %v9076_v56 = vld [vmem:[#allocation19_spill] sm:$0xff] }
 0x268   : > { %9051 = vst [vmem:[#allocation136_spill] sm:$0xff] %v6736_v36  ;;  %v6742_v58 = vsel %vm1458_vm10, %v1446_v43, %v1172_v46  ;;  %v1352_v32 = vsel %vm1326_vm6, %v1319_v57, %v9073_v18  ;;  %v9082_v20 = vld [vmem:[#allocation72_spill] sm:$0xff]  ;;  %v9084_v18 = vld [vmem:[#allocation103_spill] sm:$0xff] }
 0x269   : > { %9053 = vst [vmem:[#allocation57_spill] sm:$0xff] %v6742_v58  ;;  %3827 = vmatprep.mubr.msk.f32.mxu0 %vm1496_vm11, %v6742_v58 }
 0x26a   : > { %3828 = vmatmul.mubr.msk.f32.gmra.mrb[20].mxu0 %vm1496_vm11, %v6736_v36  ;;  %v1082_v44 = vpop.permute.xlu1 %1081 }
 0x26b   : > { %v1080_v16 = vpop.permute.xlu0 %1079  ;;  %v1449_v26 = vsel %vm1425_vm9, %v1416_v5, %v1082_v44  ;;  %v9070_v44 = vld [vmem:[#allocation101_spill] sm:$0xff]  ;;  %v1385_v5 = vsel %vm1359_vm7, %v1352_v32, %v9075_v27  ;;  %v9086_v27 = vld [vmem:[#allocation131_spill] sm:$0xff] }
 0x26c   : > { %v1448_v46 = vsel %vm1425_vm9, %v1415_v29, %v1080_v16  ;;  %v1285_v62 = vsel %vm1260_vm4, %v1252_v48, %v9070_v44  ;;  %v9072_v16 = vld [vmem:[#allocation129_spill] sm:$0xff]  ;;  %v4696_v48 = vld [vmem:[%s4849_s28 + $0x140] sm:$0xff] }
 0x26d   : > { %v1318_v47 = vsel %vm1293_vm5, %v1285_v62, %v9072_v16  ;;  %v1255_v25 = vsel %vm1227_vm3, %v4696_v48, %v9080_v35  ;;  %v4697_v62 = vld [vmem:[%s4849_s28 + $0x138] sm:$0xff]  ;;  %v9092_v35 = vld [vmem:[#allocation165_spill] sm:$0xff] }
 0x26e   : > { %v1178_v43 = vpop.permute.xlu1 %1177  ;;  %v1351_v50 = vsel %vm1326_vm6, %v1318_v47, %v9074_v4  ;;  %v1254_v57 = vsel %vm1227_vm3, %v4697_v62, %v9082_v20  ;;  %v9083_v16 = vld [vmem:[#allocation102_spill] sm:$0xff] }
 0x26f   : > { %v6776_v59 = vsel %vm1458_vm10, %v1449_v26, %v1178_v43  ;;  %v1176_v17 = vpop.permute.xlu0 %1175  ;;  %v1384_v29 = vsel %vm1359_vm7, %v1351_v50, %v9076_v56  ;;  %v9077_v26 = vld [vmem:[#allocation26_spill] sm:$0xff]  ;;  %v1287_v32 = vsel %vm1260_vm4, %v1254_v57, %v9084_v18  ;;  %v9087_v56 = vld [vmem:[#allocation153_spill] sm:$0xff] }
 0x270   : > { %9065 = vst [vmem:[#allocation137_spill] sm:$0xff] %v6776_v59  ;;  %v6782_v1 = vsel %vm1458_vm10, %v1448_v46, %v1176_v17  ;;  %v1418_v43 = vsel %vm1392_vm8, %v1385_v5, %v9077_v26  ;;  %v9078_v46 = vld [vmem:[#allocation27_spill] sm:$0xff]  ;;  %v1320_v5 = vsel %vm1293_vm5, %v1287_v32, %v9086_v27  ;;  %v4698_v18 = vld [vmem:[%s4849_s28 + $0x158] sm:$0xff]  ;;  %v9094_v32 = vld [vmem:[#allocation73_spill] sm:$0xff] }
 0x271   : > { %9067 = vst [vmem:[#allocation81_spill] sm:$0xff] %v6782_v1  ;;  %3830 = vmatprep.mubr.msk.f32.mxu0 %vm1496_vm11, %v6782_v1  ;;  %v1417_v17 = vsel %vm1392_vm8, %v1384_v29, %v9078_v46  ;;  %v4699_v27 = vld [vmem:[%s4849_s28 + $0x150] sm:$0xff] }
 0x272   : > { %3831 = vmatmul.mubr.msk.f32.gmra.mrb[22].mxu0 %vm1496_vm11, %v6776_v59  ;;  %v1086_v39 = vpop.permute.xlu1 %1085 }
 0x273   : > { %v1084_v11 = vpop.permute.xlu0 %1083  ;;  %v1451_v37 = vsel %vm1425_vm9, %v1418_v43, %v1086_v39  ;;  %v1288_v39 = vsel %vm1260_vm4, %v1255_v25, %v9083_v16  ;;  %v9088_v43 = vld [vmem:[#allocation154_spill] sm:$0xff] }
 0x274   : > { %v1450_v33 = vsel %vm1425_vm9, %v1417_v17, %v1084_v11  ;;  %v9085_v11 = vld [vmem:[#allocation130_spill] sm:$0xff]  ;;  %v1353_v46 = vsel %vm1326_vm6, %v1320_v5, %v9088_v43  ;;  %v9089_v17 = vld [vmem:[#allocation20_spill] sm:$0xff]  ;;  %v9098_v43 = vld [vmem:[#allocation105_spill] sm:$0xff] }
 0x275   : > { %v1321_v4 = vsel %vm1293_vm5, %v1288_v39, %v9085_v11  ;;  %v1257_v11 = vsel %vm1227_vm3, %v4698_v18, %v9094_v32  ;;  %v9096_v5 = vld [vmem:[#allocation74_spill] sm:$0xff]  ;;  %v9104_v18 = vld [vmem:[#allocation160_spill] sm:$0xff] }
 0x276   : > { %v1182_v34 = vpop.permute.xlu1 %1181  ;;  %v1354_v29 = vsel %vm1326_vm6, %v1321_v4, %v9087_v56  ;;  %v1256_v56 = vsel %vm1227_vm3, %v4699_v27, %v9096_v5  ;;  %v9106_v5 = vld [vmem:[#allocation29_spill] sm:$0xff] }
 0x277   : > { %v6816_v6 = vsel %vm1458_vm10, %v1451_v37, %v1182_v34  ;;  %v1180_v19 = vpop.permute.xlu0 %1179  ;;  %v1387_v37 = vsel %vm1359_vm7, %v1354_v29, %v9089_v17  ;;  %v9090_v34 = vld [vmem:[#allocation21_spill] sm:$0xff]  ;;  %v9097_v29 = vld [vmem:[#allocation104_spill] sm:$0xff]  ;;  %v9099_v17 = vld [vmem:[#allocation39_spill] sm:$0xff] }
 0x278   : > { %9079 = vst [vmem:[#allocation82_spill] sm:$0xff] %v6816_v6  ;;  %v6822_v44 = vsel %vm1458_vm10, %v1450_v33, %v1180_v19  ;;  %v1386_v33 = vsel %vm1359_vm7, %v1353_v46, %v9090_v34  ;;  %v9091_v19 = vld [vmem:[#allocation47_spill] sm:$0xff]  ;;  %v1289_v46 = vsel %vm1260_vm4, %v1256_v56, %v9098_v43 }
 0x279   : > { %9081 = vst [vmem:[#allocation113_spill] sm:$0xff] %v6822_v44  ;;  %3833 = vmatprep.mubr.msk.f32.mxu0 %vm1496_vm11, %v6822_v44  ;;  %v1420_v48 = vsel %vm1392_vm8, %v1387_v37, %v9091_v19  ;;  %v1419_v25 = vsel %vm1392_vm8, %v1386_v33, %v9092_v35  ;;  %v9100_v33 = vld [vmem:[#allocation132_spill] sm:$0xff] }
 0x27a   : > { %3834 = vmatmul.mubr.msk.f32.gmra.mrb[24].mxu0 %vm1496_vm11, %v6816_v6  ;;  %v1090_v50 = vpop.permute.xlu1 %1089  ;;  %v1322_v19 = vsel %vm1293_vm5, %v1289_v46, %v9100_v33  ;;  %v9108_v33 = vld [vmem:[#allocation75_spill] sm:$0xff] }
 0x27b   : > { %v1088_v26 = vpop.permute.xlu0 %1087  ;;  %v1453_v62 = vsel %vm1425_vm9, %v1420_v48, %v1090_v50  ;;  %v1290_v50 = vsel %vm1260_vm4, %v1257_v11, %v9097_v29  ;;  %v9101_v48 = vld [vmem:[#allocation155_spill] sm:$0xff]  ;;  %v9105_v11 = vld [vmem:[#allocation28_spill] sm:$0xff] }
 0x27c   : > { %v1452_v57 = vsel %vm1425_vm9, %v1419_v25, %v1088_v26  ;;  %v1323_v37 = vsel %vm1293_vm5, %v1290_v50, %v9099_v17 }
 0x27d   : > { %v1356_v35 = vsel %vm1326_vm6, %v1323_v37, %v9101_v48  ;;  %v4700_v37 = vld [vmem:[%s4849_s28 + $0x170] sm:$0xff] }
 0x27e   : > { %v1186_v20 = vpop.permute.xlu1 %1185 }
 0x27f   : > { %v6856_v16 = vsel %vm1458_vm10, %v1453_v62, %v1186_v20  ;;  %v1184_v39 = vpop.permute.xlu0 %1183  ;;  %v9102_v62 = vld [vmem:[#allocation156_spill] sm:$0xff] }
 0x280   : > { %9093 = vst [vmem:[#allocation115_spill] sm:$0xff] %v6856_v16  ;;  %v6862_v4 = vsel %vm1458_vm10, %v1452_v57, %v1184_v39  ;;  %v1355_v20 = vsel %vm1326_vm6, %v1322_v19, %v9102_v62  ;;  %v9103_v57 = vld [vmem:[#allocation159_spill] sm:$0xff]  ;;  %v1259_v19 = vsel %vm1227_vm3, %v4700_v37, %v9108_v33  ;;  %v9110_v62 = vld [vmem:[#allocation76_spill] sm:$0xff]  ;;  %v9117_v33 = vld [vmem:[#allocation161_spill] sm:$0xff] }
 0x281   : > { %9095 = vst [vmem:[#allocation58_spill] sm:$0xff] %v6862_v4  ;;  %3836 = vmatprep.mubr.msk.f32.mxu0 %vm1496_vm11, %v6862_v4  ;;  %v1389_v39 = vsel %vm1359_vm7, %v1356_v35, %v9103_v57  ;;  %v1388_v32 = vsel %vm1359_vm7, %v1355_v20, %v9104_v18  ;;  %v4701_v35 = vld [vmem:[%s4849_s28 + $0x168] sm:$0xff]  ;;  %v9111_v57 = vld [vmem:[#allocation106_spill] sm:$0xff] }
 0x282   : > { %3837 = vmatmul.mubr.msk.f32.gmra.mrb[26].mxu0 %vm1496_vm11, %v6856_v16  ;;  %v1094_v34 = vpop.permute.xlu1 %1093  ;;  %v1422_v27 = vsel %vm1392_vm8, %v1389_v39, %v9105_v11  ;;  %v1421_v56 = vsel %vm1392_vm8, %v1388_v32, %v9106_v5  ;;  %v1258_v20 = vsel %vm1227_vm3, %v4701_v35, %v9110_v62  ;;  %v9112_v39 = vld [vmem:[#allocation107_spill] sm:$0xff]  ;;  %v9113_v32 = vld [vmem:[#allocation133_spill] sm:$0xff]  ;;  %v9114_v5 = vld [vmem:[#allocation134_spill] sm:$0xff] }
 0x283   : > { %v1092_v25 = vpop.permute.xlu0 %1091  ;;  %v1455_v29 = vsel %vm1425_vm9, %v1422_v27, %v1094_v34  ;;  %v1292_v34 = vsel %vm1260_vm4, %v1259_v19, %v9111_v57  ;;  %v1291_v18 = vsel %vm1260_vm4, %v1258_v20, %v9112_v39  ;;  %v9118_v35 = vld [vmem:[#allocation162_spill] sm:$0xff] }
 0x284   : > { %v1454_v43 = vsel %vm1425_vm9, %v1421_v56, %v1092_v25  ;;  %v1325_v11 = vsel %vm1293_vm5, %v1292_v34, %v9113_v32  ;;  %v1324_v56 = vsel %vm1293_vm5, %v1291_v18, %v9114_v5  ;;  %v9119_v20 = vld [vmem:[#allocation166_spill] sm:$0xff]  ;;  %v9120_v34 = vld [vmem:[#allocation167_spill] sm:$0xff] }
 0x286   : > { %v1190_v50 = vpop.permute.xlu1 %1189 }
 0x287   : > { %v6896_v46 = vsel %vm1458_vm10, %v1455_v29, %v1190_v50  ;;  %v1188_v17 = vpop.permute.xlu0 %1187  ;;  %v9115_v29 = vld [vmem:[#allocation157_spill] sm:$0xff] }
 0x288   : > { %9107 = vst [vmem:[#allocation83_spill] sm:$0xff] %v6896_v46  ;;  %v6902_v48 = vsel %vm1458_vm10, %v1454_v43, %v1188_v17  ;;  %v1358_v50 = vsel %vm1326_vm6, %v1325_v11, %v9115_v29  ;;  %v9116_v17 = vld [vmem:[#allocation158_spill] sm:$0xff] }
 0x289   : > { %9109 = vst [vmem:[#allocation84_spill] sm:$0xff] %v6902_v48  ;;  %3839 = vmatprep.mubr.msk.f32.mxu0 %vm1496_vm11, %v6902_v48  ;;  %v1357_v37 = vsel %vm1326_vm6, %v1324_v56, %v9116_v17  ;;  %v1391_v19 = vsel %vm1359_vm7, %v1358_v50, %v9117_v33 }
 0x28a   : > { %3840 = vmatmul.mubr.msk.f32.gmra.mrb[28].mxu0 %vm1496_vm11, %v6896_v46  ;;  %v1098_v27 = vpop.permute.xlu1 %1097  ;;  %v1390_v62 = vsel %vm1359_vm7, %v1357_v37, %v9118_v35  ;;  %v1424_v57 = vsel %vm1392_vm8, %v1391_v19, %v9119_v20 }
 0x28b   : > { %v1096_v43 = vpop.permute.xlu0 %1095  ;;  %v1423_v39 = vsel %vm1392_vm8, %v1390_v62, %v9120_v34  ;;  %v1457_v18 = vsel %vm1425_vm9, %v1424_v57, %v1098_v27  ;;  %v4774_v27 = vmov 0.0  }
 0x28c   : > { %v1456_v11 = vsel %vm1425_vm9, %v1423_v39, %v1096_v43  ;;  %v6947_v17 = vrot.slane %v4774_v27, 7 }
 0x28e   : > { %v1194_v32 = vpop.permute.xlu1 %1193  ;;  %9123 = vst [vmem:[#allocation59_spill] sm:$0xff] %v6947_v17  ;;  %v6951_v43 = vsel %vm1887_vm12, 0.0, %v6947_v17  ;;  %v6955_v37 = vsel %vm1887_vm12, %v6947_v17, 0.0  ;;  %v2054_v19 = vrot.slane %v6947_v17, 1 }
 0x28f   : > { %v6936_v5 = vsel %vm1458_vm10, %v1457_v18, %v1194_v32  ;;  %v1192_v56 = vpop.permute.xlu0 %1191  ;;  %9124 = vst [vmem:[#allocation138_spill] sm:$0xff] %v6951_v43  ;;  %v2053_v33 = vrot.slane %v6951_v43, 1  ;;  %v2056_v35 = vrot.slane %v6955_v37, 1 }
 0x290   : > { %9121 = vst [vmem:[#allocation116_spill] sm:$0xff] %v6936_v5  ;;  %v6939_v29 = vsel %vm1458_vm10, %v1456_v11, %v1192_v56 }
 0x291   : > { %9122 = vst [vmem:[#allocation117_spill] sm:$0xff] %v6939_v29  ;;  %3842 = vmatprep.mubr.msk.f32.mxu0 %vm1496_vm11, %v6939_v29  ;;  %v2055_v62 = vsel %vm271_vm0, %v2053_v33, %v2054_v19  ;;  %v2057_v20 = vsel %vm271_vm0, %v2054_v19, %v2056_v35 }
 0x292   : > { %3843 = vmatmul.mubr.msk.f32.gmra.mrb[30].mxu0 %vm1496_vm11, %v6936_v5  ;;  %v6962_v57 = vpack.i.bf16 %v2057_v20, %v2055_v62 }
 0x294   : > { %9125 = vst [vmem:[#allocation85_spill] sm:$0xff] %v6962_v57  ;;  %3951 = vrot.lane.b32.xlu0 %v6962_v57, %s4766_s29 }
 0x311   : > { %v3799_v34 = vpop.f32.mrb[0].mxu0 }
 0x312   : > { %v1823_v39 = vmax.f32 %v3799_v34, 0.0  ;;  %v1663_v18 = vpop.f32.mrb[1].mxu0 }
 0x313   : > { %v1822_v32 = vmax.f32 %v1663_v18, 0.0 }
 0x314   : > { %v1891_v11 = vrot.slane %v1823_v39, 7 }
 0x315   : > { %v1890_v56 = vrot.slane %v1822_v32, 7  ;;  %v3802_v27 = vpop.f32.mrb[2].mxu0 }
 0x316   : > { %v6967_v22 = vsel %vm1887_vm12, %v1891_v11, 0.0  ;;  %v1825_v50 = vmax.f32 %v3802_v27, 0.0  ;;  %v1673_v25 = vpop.f32.mrb[3].mxu0 }
 0x317   : > { %v2061_v33 = vrot.slane %v6967_v22, 1  ;;  %v6971_v19 = vsel %vm1887_vm12, %v1890_v56, %v1891_v11  ;;  %v6974_v35 = vsel %vm1887_vm12, 0.0, %v1890_v56  ;;  %v1824_v39 = vmax.f32 %v1673_v25, 0.0 }
 0x318   : > { %v2058_v62 = vrot.slane %v6974_v35, 1  ;;  %v2059_v20 = vrot.slane %v6971_v19, 1  ;;  %v1894_v34 = vrot.slane %v1825_v50, 7 }
 0x319   : > { %v3805_v18 = vpop.f32.mrb[4].mxu0  ;;  %v1893_v11 = vrot.slane %v1824_v39, 7 }
 0x31a   : > { %v1827_v32 = vmax.f32 %v3805_v18, 0.0  ;;  %v1683_v55 = vpop.f32.mrb[5].mxu0  ;;  %v2060_v27 = vsel %vm271_vm0, %v2058_v62, %v2059_v20  ;;  %v2062_v53 = vsel %vm271_vm0, %v2059_v20, %v2061_v33  ;;  %v6981_v26 = vsel %vm1887_vm12, %v1894_v34, 0.0 }
 0x31b   : > { %v1826_v47 = vmax.f32 %v1683_v55, 0.0  ;;  %v6983_v56 = vpack.i.bf16 %v2062_v53, %v2060_v27  ;;  %v6986_v61 = vsel %vm1887_vm12, %v1893_v11, %v1894_v34  ;;  %v6989_v25 = vsel %vm1887_vm12, 0.0, %v1893_v11 }
 0x31c   : > { %v1897_v31 = vrot.slane %v1827_v32, 7  ;;  %v2066_v33 = vrot.slane %v6981_v26, 1  ;;  %v2063_v20 = vrot.slane %v6989_v25, 1  ;;  %v2064_v55 = vrot.slane %v6986_v61, 1 }
 0x31d   : > { %9126 = vst [vmem:[#allocation86_spill] sm:$0xff] %v6983_v56  ;;  %v1896_v50 = vrot.slane %v1826_v47, 7  ;;  %3956 = vrot.lane.b32.xlu1 %v6983_v56, %s4766_s29  ;;  %v3808_v62 = vpop.f32.mrb[6].mxu0 }
 0x31e   : > { %v1693_v53 = vpop.f32.mrb[7].mxu0  ;;  %v6997_v39 = vsel %vm1887_vm12, %v1897_v31, 0.0  ;;  %v1829_v47 = vmax.f32 %v3808_v62, 0.0  ;;  %v2065_v45 = vsel %vm271_vm0, %v2063_v20, %v2064_v55  ;;  %v2067_v10 = vsel %vm271_vm0, %v2064_v55, %v2066_v33 }
 0x31f   : > { %v7000_v34 = vsel %vm1887_vm12, %v1896_v50, %v1897_v31  ;;  %v7003_v18 = vsel %vm1887_vm12, 0.0, %v1896_v50  ;;  %v2071_v32 = vrot.slane %v6997_v39, 1  ;;  %v1828_v21 = vmax.f32 %v1693_v53, 0.0 }
 0x320   : > { %9127 = vst [vmem:[#allocation118_spill] sm:$0xff] %v7000_v34  ;;  %9128 = vst [vmem:[#allocation119_spill] sm:$0xff] %v7003_v18  ;;  %v2068_v27 = vrot.slane %v7003_v18, 1  ;;  %v2069_v11 = vrot.slane %v7000_v34, 1  ;;  %v1900_v40 = vrot.slane %v1829_v47, 7  ;;  %v7014_v12 = vpack.i.bf16 %v2067_v10, %v2065_v45 }
 0x321   : > { %v3811_v14 = vpop.f32.mrb[8].mxu0  ;;  %v1899_v62 = vrot.slane %v1828_v21, 7 }
 0x322   : > { %v1831_v60 = vmax.f32 %v3811_v14, 0.0  ;;  %v1703_v31 = vpop.f32.mrb[9].mxu0  ;;  %v2070_v28 = vsel %vm271_vm0, %v2068_v27, %v2069_v11  ;;  %v7012_v50 = vsel %vm1887_vm12, %v1900_v40, 0.0  ;;  %9129 = vst [vmem:[#allocation60_spill] sm:$0xff] %v7014_v12  ;;  %v2072_v47 = vsel %vm271_vm0, %v2069_v11, %v2071_v32  ;;  %3961 = vrot.lane.b32.xlu0 %v7014_v12, %s4766_s29 }
 0x323   : > { %v1830_v13 = vmax.f32 %v1703_v31, 0.0  ;;  %v7018_v53 = vsel %vm1887_vm12, %v1899_v62, %v1900_v40  ;;  %v7021_v20 = vsel %vm1887_vm12, 0.0, %v1899_v62  ;;  %v7025_v33 = vpack.i.bf16 %v2072_v47, %v2070_v28 }
 0x324   : > { %v1903_v29 = vrot.slane %v1831_v60, 7  ;;  %9130 = vst [vmem:[#allocation87_spill] sm:$0xff] %v7018_v53  ;;  %9131 = vst [vmem:[#allocation88_spill] sm:$0xff] %v7021_v20  ;;  %v2076_v45 = vrot.slane %v7012_v50, 1  ;;  %v2073_v10 = vrot.slane %v7021_v20, 1  ;;  %v2074_v60 = vrot.slane %v7018_v53, 1 }
 0x325   : > { %v1902_v14 = vrot.slane %v1830_v13, 7  ;;  %9132 = vst [vmem:[#allocation120_spill] sm:$0xff] %v7025_v33  ;;  %v3814_v55 = vpop.f32.mrb[10].mxu0  ;;  %3966 = vrot.lane.b32.xlu1 %v7025_v33, %s4766_s29 }
 0x326   : > { %v1713_v21 = vpop.f32.mrb[11].mxu0  ;;  %v7031_v40 = vsel %vm1887_vm12, %v1903_v29, 0.0  ;;  %v1833_v28 = vmax.f32 %v3814_v55, 0.0  ;;  %v2075_v57 = vsel %vm271_vm0, %v2073_v10, %v2074_v60 }
 0x327   : > { %v7034_v32 = vsel %vm1887_vm12, %v1902_v14, %v1903_v29  ;;  %v7037_v27 = vsel %vm1887_vm12, 0.0, %v1902_v14  ;;  %v2081_v13 = vrot.slane %v7031_v40, 1  ;;  %v1832_v47 = vmax.f32 %v1713_v21, 0.0 }
 0x328   : > { %9133 = vst [vmem:[#allocation121_spill] sm:$0xff] %v7034_v32  ;;  %9134 = vst [vmem:[#allocation61_spill] sm:$0xff] %v7037_v27  ;;  %v2078_v11 = vrot.slane %v7037_v27, 1  ;;  %v2079_v31 = vrot.slane %v7034_v32, 1  ;;  %v1906_v62 = vrot.slane %v1833_v28, 7  ;;  %v2077_v29 = vsel %vm271_vm0, %v2074_v60, %v2076_v45 }
 0x329   : > { %v3817_v5 = vpop.f32.mrb[12].mxu0  ;;  %v1905_v55 = vrot.slane %v1832_v47, 7  ;;  %v7050_v8 = vpack.i.bf16 %v2077_v29, %v2075_v57 }
 0x32a   : > { %v1835_v48 = vmax.f32 %v3817_v5, 0.0  ;;  %v1723_v14 = vpop.f32.mrb[13].mxu0  ;;  %v2080_v46 = vsel %vm271_vm0, %v2078_v11, %v2079_v31  ;;  %v7048_v0 = vsel %vm1887_vm12, %v1906_v62, 0.0  ;;  %v2082_v28 = vsel %vm271_vm0, %v2079_v31, %v2081_v13 }
 0x32b   : > { %9135 = vst [vmem:[#allocation5_spill] sm:$0xff] %v7050_v8  ;;  %v1834_v51 = vmax.f32 %v1723_v14, 0.0  ;;  %v7054_v21 = vsel %vm1887_vm12, %v1905_v55, %v1906_v62  ;;  %v7057_v10 = vsel %vm1887_vm12, 0.0, %v1905_v55  ;;  %3971 = vrot.lane.b32.xlu0 %v7050_v8, %s4766_s29  ;;  %v7061_v45 = vpack.i.bf16 %v2082_v28, %v2080_v46 }
 0x32c   : > { %v1909_v30 = vrot.slane %v1835_v48, 7  ;;  %9136 = vst [vmem:[#allocation89_spill] sm:$0xff] %v7054_v21  ;;  %9137 = vst [vmem:[#allocation30_spill] sm:$0xff] %v7057_v10  ;;  %v2086_v57 = vrot.slane %v7048_v0, 1  ;;  %v2083_v11 = vrot.slane %v7057_v10, 1  ;;  %v2084_v48 = vrot.slane %v7054_v21, 1 }
 0x32d   : > { %v1908_v5 = vrot.slane %v1834_v51, 7  ;;  %9138 = vst [vmem:[#allocation112_spill] sm:$0xff] %v7061_v45  ;;  %v3820_v60 = vpop.f32.mrb[14].mxu0  ;;  %3976 = vrot.lane.b32.xlu1 %v7061_v45, %s4766_s29  ;;  %v2166_v52 = vrot.slane %v7048_v0, 2  ;;  %v2163_v3 = vrot.slane %v7057_v10, 2 }
 0x32e   : > { %v1733_v13 = vpop.f32.mrb[15].mxu0  ;;  %v7067_v31 = vsel %vm1887_vm12, %v1909_v30, 0.0  ;;  %v1837_v51 = vmax.f32 %v3820_v60, 0.0  ;;  %v2085_v16 = vsel %vm271_vm0, %v2083_v11, %v2084_v48  ;;  %v2134_v11 = vrot.slane %v6947_v17, 2 }
 0x32f   : > { %v7070_v62 = vsel %vm1887_vm12, %v1908_v5, %v1909_v30  ;;  %v7073_v47 = vsel %vm1887_vm12, 0.0, %v1908_v5  ;;  %v2091_v46 = vrot.slane %v7067_v31, 1  ;;  %v1836_v28 = vmax.f32 %v1733_v13, 0.0 }
 0x330   : > { %9139 = vst [vmem:[#allocation122_spill] sm:$0xff] %v7070_v62  ;;  %9140 = vst [vmem:[#allocation139_spill] sm:$0xff] %v7073_v47  ;;  %v2088_v29 = vrot.slane %v7073_v47, 1  ;;  %v2089_v14 = vrot.slane %v7070_v62, 1  ;;  %v1912_v55 = vrot.slane %v1837_v51, 7  ;;  %v2087_v30 = vsel %vm271_vm0, %v2084_v48, %v2086_v57 }
 0x331   : > { %v3823_v4 = vpop.f32.mrb[16].mxu0  ;;  %v1911_v60 = vrot.slane %v1836_v28, 7  ;;  %v7086_v15 = vpack.i.bf16 %v2087_v30, %v2085_v16  ;;  %v2133_v13 = vrot.slane %v6951_v43, 2  ;;  %v2136_v43 = vrot.slane %v6955_v37, 2 }
 0x332   : > { %v1839_v44 = vmax.f32 %v3823_v4, 0.0  ;;  %v1743_v5 = vpop.f32.mrb[17].mxu0  ;;  %v2090_v6 = vsel %vm271_vm0, %v2088_v29, %v2089_v14  ;;  %v7084_v2 = vsel %vm1887_vm12, %v1912_v55, 0.0  ;;  %v2092_v51 = vsel %vm271_vm0, %v2089_v14, %v2091_v46 }
 0x333   : > { %9141 = vst [vmem:[#allocation114_spill] sm:$0xff] %v7086_v15  ;;  %v1838_v49 = vmax.f32 %v1743_v5, 0.0  ;;  %v7092_v57 = vsel %vm1887_vm12, %v1911_v60, %v1912_v55  ;;  %v7095_v4 = vsel %vm1887_vm12, 0.0, %v1911_v60  ;;  %3981 = vrot.lane.b32.xlu0 %v7086_v15, %s4766_s29  ;;  %v7099_v16 = vpack.i.bf16 %v2092_v51, %v2090_v6 }
 0x334   : > { %v1915_v42 = vrot.slane %v1839_v44, 7  ;;  %9142 = vst [vmem:[#allocation62_spill] sm:$0xff] %v7092_v57  ;;  %9143 = vst [vmem:[#allocation140_spill] sm:$0xff] %v7095_v4  ;;  %v2096_v44 = vrot.slane %v7084_v2, 1  ;;  %v2093_v46 = vrot.slane %v7095_v4, 1  ;;  %v2094_v14 = vrot.slane %v7092_v57, 1 }
 0x335   : > { %v1914_v48 = vrot.slane %v1838_v49, 7  ;;  %9144 = vst [vmem:[#allocation6_spill] sm:$0xff] %v7099_v16  ;;  %v3826_v29 = vpop.f32.mrb[18].mxu0  ;;  %3986 = vrot.lane.b32.xlu1 %v7099_v16, %s4766_s29  ;;  %v2138_v37 = vrot.slane %v6974_v35, 2  ;;  %v2174_v0 = vrot.slane %v7092_v57, 2 }
 0x336   : > { %v1753_v28 = vpop.f32.mrb[19].mxu0  ;;  %v7105_v55 = vsel %vm1887_vm12, %v1915_v42, 0.0  ;;  %v1841_v49 = vmax.f32 %v3826_v29, 0.0  ;;  %v2095_v59 = vsel %vm271_vm0, %v2093_v46, %v2094_v14 }
 0x337   : > { %v7108_v30 = vsel %vm1887_vm12, %v1914_v48, %v1915_v42  ;;  %v7111_v5 = vsel %vm1887_vm12, 0.0, %v1914_v48  ;;  %v2101_v6 = vrot.slane %v7105_v55, 1  ;;  %v1840_v1 = vmax.f32 %v1753_v28, 0.0 }
 0x338   : > { %v2098_v60 = vrot.slane %v7111_v5, 1  ;;  %v2099_v51 = vrot.slane %v7108_v30, 1  ;;  %v1918_v17 = vrot.slane %v1841_v49, 7  ;;  %v2135_v42 = vsel %vm352_vm1, %v2133_v13, %v2134_v11 }
 0x339   : > { %v2097_v48 = vsel %vm271_vm0, %v2094_v14, %v2096_v44  ;;  %v1917_v9 = vrot.slane %v1840_v1, 7  ;;  %v2139_v13 = vrot.slane %v6971_v19, 2  ;;  %v2137_v44 = vsel %vm352_vm1, %v2134_v11, %v2136_v43 }
 0x33a   : > { %v2100_v58 = vsel %vm271_vm0, %v2098_v60, %v2099_v51  ;;  %v2102_v29 = vsel %vm271_vm0, %v2099_v51, %v2101_v6  ;;  %v7125_v36 = vsel %vm1887_vm12, %v1918_v17, 0.0  ;;  %v7127_v54 = vpack.i.bf16 %v2097_v48, %v2095_v59 }
 0x33b   : > { %v7129_v7 = vpack.i.bf16 %v2102_v29, %v2100_v58  ;;  %v2106_v46 = vrot.slane %v7125_v36, 1  ;;  %v2141_v14 = vrot.slane %v6967_v22, 2  ;;  %v7137_v28 = vsel %vm1887_vm12, %v1917_v9, %v1918_v17 }
 0x33c   : > { %9145 = vst [vmem:[#allocation90_spill] sm:$0xff] %v7127_v54  ;;  %v7140_v49 = vsel %vm1887_vm12, 0.0, %v1917_v9  ;;  %3991 = vrot.lane.b32.xlu0 %v7127_v54, %s4766_s29  ;;  %v2104_v1 = vrot.slane %v7137_v28, 1  ;;  %v7148_v6 = vpack.i.bf16 %v2137_v44, %v2135_v42  ;;  %v2146_v17 = vrot.slane %v6981_v26, 2 }
 0x33d   : > { %9146 = vst [vmem:[#allocation7_spill] sm:$0xff] %v7129_v7  ;;  %3996 = vrot.lane.b32.xlu1 %v7129_v7, %s4766_s29  ;;  %v3829_v58 = vpop.f32.mrb[20].mxu0  ;;  %v2103_v59 = vrot.slane %v7140_v49, 1  ;;  %v7154_v51 = vsel %vm352_vm1, %v2138_v37, %v2139_v13  ;;  %v7159_v23 = vsel %vm352_vm1, %v2139_v13, %v2141_v14  ;;  %v2144_v42 = vrot.slane %v6986_v61, 2 }
 0x33e   : > { %v1763_v43 = vpop.f32.mrb[21].mxu0  ;;  %v1843_v11 = vmax.f32 %v3829_v58, 0.0  ;;  %9147 = vst [vmem:[#allocation36_spill] sm:$0xff] %v7148_v6  ;;  %v2107_v60 = vsel %vm271_vm0, %v2104_v1, %v2106_v46  ;;  %v2143_v58 = vrot.slane %v6989_v25, 2  ;;  %v2151_v26 = vrot.slane %v6997_v39, 2 }
 0x33f   : > { %v1842_v22 = vmax.f32 %v1763_v43, 0.0  ;;  %v2105_v9 = vsel %vm271_vm0, %v2103_v59, %v2104_v1  ;;  %v2148_v44 = vrot.slane %v7003_v18, 2  ;;  %v2149_v46 = vrot.slane %v7000_v34, 2 }
 0x340   : > { %v1921_v48 = vrot.slane %v1843_v11, 7  ;;  %v7156_v63 = vpack.i.bf16 %v2107_v60, %v2105_v9  ;;  %v2156_v13 = vrot.slane %v7012_v50, 2  ;;  %v2153_v11 = vrot.slane %v7021_v20, 2 }
 0x341   : > { %v1920_v29 = vrot.slane %v1842_v22, 7  ;;  %v2154_v22 = vrot.slane %v7018_v53, 2  ;;  %v2164_v9 = vrot.slane %v7054_v21, 2  ;;  %v2186_v15 = vrot.slane %v7125_v36, 2 }
 0x342   : > { %9148 = vst [vmem:[#allocation91_spill] sm:$0xff] %v7156_v63  ;;  %v7167_v37 = vsel %vm1887_vm12, %v1921_v48, 0.0  ;;  %4001 = vrot.lane.b32.xlu0 %v7156_v63, %s4766_s29  ;;  %v2147_v8 = vsel %vm352_vm1, %v2144_v42, %v2146_v17  ;;  %v2152_v17 = vsel %vm352_vm1, %v2149_v46, %v2151_v26 }
 0x343   : > { %v7170_v59 = vsel %vm1887_vm12, %v1920_v29, %v1921_v48  ;;  %v7173_v1 = vsel %vm1887_vm12, 0.0, %v1920_v29  ;;  %v2111_v39 = vrot.slane %v7167_v37, 1  ;;  %v2155_v16 = vsel %vm352_vm1, %v2153_v11, %v2154_v22 }
 0x344   : > { %9149 = vst [vmem:[#allocation31_spill] sm:$0xff] %v7170_v59  ;;  %9150 = vst [vmem:[#allocation37_spill] sm:$0xff] %v7173_v1  ;;  %v2108_v14 = vrot.slane %v7173_v1, 1  ;;  %v2109_v43 = vrot.slane %v7170_v59, 1  ;;  %v2157_v12 = vsel %vm352_vm1, %v2154_v22, %v2156_v13  ;;  %v2167_v56 = vsel %vm352_vm1, %v2164_v9, %v2166_v52 }
 0x345   : > { %v3832_v48 = vpop.f32.mrb[22].mxu0  ;;  %v2184_v13 = vrot.slane %v7137_v28, 2  ;;  %v7235_v22 = vpack.i.bf16 %v2157_v12, %v2155_v16  ;;  %v7239_v52 = vpack.i.bf16 %v7159_v23, %v7154_v51  ;;  %v2189_v16 = vrot.slane %v7170_v59, 2 }
 0x346   : > { %v1845_v41 = vmax.f32 %v3832_v48, 0.0  ;;  %v1773_v24 = vpop.f32.mrb[23].mxu0  ;;  %v2110_v50 = vsel %vm271_vm0, %v2108_v14, %v2109_v43  ;;  %v2112_v38 = vsel %vm271_vm0, %v2109_v43, %v2111_v39  ;;  %v2176_v14 = vrot.slane %v7084_v2, 2 }
 0x347   : > { %v1844_v63 = vmax.f32 %v1773_v24, 0.0  ;;  %v7190_v54 = vpack.i.bf16 %v2112_v38, %v2110_v50  ;;  %v2173_v39 = vrot.slane %v7095_v4, 2  ;;  %v2178_v24 = vrot.slane %v7111_v5, 2 }
 0x348   : > { %v1924_v29 = vrot.slane %v1845_v41, 7  ;;  %v2179_v41 = vrot.slane %v7108_v30, 2 }
 0x349   : > { %9151 = vst [vmem:[#allocation168_spill] sm:$0xff] %v7190_v54  ;;  %v1923_v43 = vrot.slane %v1844_v63, 7  ;;  %4006 = vrot.lane.b32.xlu1 %v7190_v54, %s4766_s29  ;;  %v2145_v54 = vsel %vm352_vm1, %v2143_v58, %v2144_v42  ;;  %v2150_v58 = vsel %vm352_vm1, %v2148_v44, %v2149_v46  ;;  %v2183_v42 = vrot.slane %v7140_v49, 2 }
 0x34a   : > { %v7204_v50 = vsel %vm1887_vm12, %v1924_v29, 0.0  ;;  %v7246_v44 = vpack.i.bf16 %v2152_v17, %v2150_v58 }
 0x34b   : > { %v2116_v60 = vrot.slane %v7204_v50, 1  ;;  %v7209_v2 = vsel %vm1887_vm12, %v1923_v43, %v1924_v29  ;;  %v7212_v63 = vsel %vm1887_vm12, 0.0, %v1923_v43  ;;  %v2165_v29 = vsel %vm352_vm1, %v2163_v3, %v2164_v9 }
 0x34c   : > { %9152 = vst [vmem:[#allocation123_spill] sm:$0xff] %v7209_v2  ;;  %9153 = vst [vmem:[#allocation141_spill] sm:$0xff] %v7212_v63  ;;  %v2113_v48 = vrot.slane %v7212_v63, 1  ;;  %v2114_v38 = vrot.slane %v7209_v2, 1 }
 0x34d   : > { %v3835_v7 = vpop.f32.mrb[24].mxu0 }
 0x34e   : > { %v1847_v45 = vmax.f32 %v3835_v7, 0.0  ;;  %v1783_v43 = vpop.f32.mrb[25].mxu0  ;;  %v2115_v33 = vsel %vm271_vm0, %v2113_v48, %v2114_v38  ;;  %v2117_v36 = vsel %vm271_vm0, %v2114_v38, %v2116_v60  ;;  %v7231_v7 = vpack.i.bf16 %v2147_v8, %v2145_v54 }
 0x34f   : > { %v1846_v57 = vmax.f32 %v1783_v43, 0.0  ;;  %v7225_v4 = vpack.i.bf16 %v2117_v36, %v2115_v33  ;;  %v7241_v33 = vpack.i.bf16 %v2167_v56, %v2165_v29  ;;  %v2175_v54 = vsel %vm352_vm1, %v2173_v39, %v2174_v0 }
 0x350   : > { %v1927_v3 = vrot.slane %v1847_v45, 7  ;;  %v2177_v8 = vsel %vm352_vm1, %v2174_v0, %v2176_v14  ;;  %v2191_v45 = vrot.slane %v7167_v37, 2  ;;  %v2188_v56 = vrot.slane %v7173_v1, 2 }
 0x351   : > { %9154 = vst [vmem:[#allocation169_spill] sm:$0xff] %v7225_v4  ;;  %v1926_v11 = vrot.slane %v1846_v57, 7  ;;  %4011 = vrot.lane.b32.xlu0 %v7225_v4, %s4766_s29  ;;  %v7262_v60 = vpack.i.bf16 %v2177_v8, %v2175_v54  ;;  %v9157_v37 = vrot.slane %v7034_v32, 2  ;;  %v9158_v48 = vrot.slane %v7037_v27, 2 }
 0x352   : > { %v7244_v26 = vsel %vm1887_vm12, %v1927_v3, 0.0  ;;  %v9159_v43 = vrot.slane %v7031_v40, 2  ;;  %v2187_v54 = vsel %vm352_vm1, %v2184_v13, %v2186_v15 }
 0x353   : > { %v2121_v12 = vrot.slane %v7244_v26, 1  ;;  %v7253_v57 = vsel %vm1887_vm12, %v1926_v11, %v1927_v3  ;;  %v7256_v23 = vsel %vm1887_vm12, 0.0, %v1926_v11  ;;  %v2160_v14 = vsel %vm352_vm1, %v9158_v48, %v9157_v37 }
 0x354   : > { %9155 = vst [vmem:[#allocation63_spill] sm:$0xff] %v7253_v57  ;;  %9156 = vst [vmem:[#allocation142_spill] sm:$0xff] %v7256_v23  ;;  %v2118_v51 = vrot.slane %v7256_v23, 1  ;;  %v2119_v46 = vrot.slane %v7253_v57, 1  ;;  %v9160_v36 = vmov %v9157_v37  ;;  %v2185_v11 = vsel %vm352_vm1, %v2183_v42, %v2184_v13 }
 0x355   : > { %v3838_v9 = vpop.f32.mrb[26].mxu0  ;;  %v2162_v58 = vsel %vm352_vm1, %v9160_v36, %v9159_v43  ;;  %v2190_v43 = vsel %vm352_vm1, %v2188_v56, %v2189_v16  ;;  %v2194_v36 = vrot.slane %v7209_v2, 2  ;;  %v9169_v56 = vrot.slane %v7067_v31, 2 }
 0x356   : > { %v1849_v39 = vmax.f32 %v3838_v9, 0.0  ;;  %v1793_v0 = vpop.f32.mrb[27].mxu0  ;;  %v2120_v38 = vsel %vm271_vm0, %v2118_v51, %v2119_v46  ;;  %v2122_v29 = vsel %vm271_vm0, %v2119_v46, %v2121_v12  ;;  %v2180_v9 = vsel %vm352_vm1, %v2178_v24, %v2179_v41 }
 0x357   : > { %v1848_v17 = vmax.f32 %v1793_v0, 0.0  ;;  %v7276_v3 = vpack.i.bf16 %v2122_v29, %v2120_v38  ;;  %v9162_v12 = vrot.slane %v7105_v55, 2  ;;  %v7296_v24 = vpack.i.bf16 %v2162_v58, %v2160_v14 }
 0x358   : > { %v1930_v8 = vrot.slane %v1849_v39, 7  ;;  %v7300_v39 = vpack.i.bf16 %v2187_v54, %v2185_v11  ;;  %v9165_v55 = vrot.slane %v7070_v62, 2  ;;  %v2193_v38 = vrot.slane %v7212_v63, 2 }
 0x359   : > { %9161 = vst [vmem:[#allocation8_spill] sm:$0xff] %v7276_v3  ;;  %v1929_v37 = vrot.slane %v1848_v17, 7  ;;  %4016 = vrot.lane.b32.xlu1 %v7276_v3, %s4766_s29  ;;  %v2182_v51 = vsel %vm352_vm1, %v2179_v41, %v9162_v12  ;;  %v9166_v41 = vrot.slane %v7073_v47, 2  ;;  %v2192_v12 = vsel %vm352_vm1, %v2189_v16, %v2191_v45 }
 0x35a   : > { %v7284_v40 = vsel %vm1887_vm12, %v1930_v8, 0.0  ;;  %v7311_v14 = vpack.i.bf16 %v2182_v51, %v2180_v9  ;;  %v9170_v9 = vrot.slane %v7070_v62, 2  ;;  %v2195_v16 = vsel %vm352_vm1, %v2193_v38, %v2194_v36 }
 0x35b   : > { %v2126_v46 = vrot.slane %v7284_v40, 1  ;;  %v7291_v42 = vsel %vm1887_vm12, %v1929_v37, %v1930_v8  ;;  %v7294_v15 = vsel %vm1887_vm12, 0.0, %v1929_v37  ;;  %v7307_v0 = vsel %vm352_vm1, %v9166_v41, %v9165_v55 }
 0x35c   : > { %9163 = vst [vmem:[#allocation92_spill] sm:$0xff] %v7291_v42  ;;  %9164 = vst [vmem:[#allocation9_spill] sm:$0xff] %v7294_v15  ;;  %v2123_v13 = vrot.slane %v7294_v15, 1  ;;  %v2124_v48 = vrot.slane %v7291_v42, 1  ;;  %v2196_v55 = vrot.slane %v7204_v50, 2  ;;  %v2172_v51 = vsel %vm352_vm1, %v9170_v9, %v9169_v56 }
 0x35d   : > { %v3841_v29 = vpop.f32.mrb[28].mxu0  ;;  %9167 = vst [vmem:[#allocation38_spill] sm:$0xff] %v7311_v14 }
 0x35e   : > { %v1851_v58 = vmax.f32 %v3841_v29, 0.0  ;;  %v1803_v17 = vpop.f32.mrb[29].mxu0  ;;  %v2125_v11 = vsel %vm271_vm0, %v2123_v13, %v2124_v48  ;;  %v2127_v54 = vsel %vm271_vm0, %v2124_v48, %v2126_v46  ;;  %v7328_v13 = vpack.i.bf16 %v2192_v12, %v2190_v43 }
 0x35f   : > { %v1850_v8 = vmax.f32 %v1803_v17, 0.0  ;;  %v7316_v37 = vpack.i.bf16 %v2127_v54, %v2125_v11  ;;  %v2201_v29 = vrot.slane %v7244_v26, 2  ;;  %v2197_v17 = vsel %vm352_vm1, %v2194_v36, %v2196_v55 }
 0x360   : > { %v1933_v41 = vrot.slane %v1851_v58, 7  ;;  %v2198_v43 = vrot.slane %v7256_v23, 2  ;;  %v2199_v11 = vrot.slane %v7253_v57, 2  ;;  %v2204_v55 = vrot.slane %v7291_v42, 2 }
 0x361   : > { %9168 = vst [vmem:[#allocation93_spill] sm:$0xff] %v7316_v37  ;;  %v1932_v3 = vrot.slane %v1850_v8, 7  ;;  %4021 = vrot.lane.b32.xlu0 %v7316_v37, %s4766_s29 }
 0x362   : > { %v2019_v46 = vsel %vm1887_vm12, %v1933_v41, 0.0 }
 0x363   : > { %v2131_v48 = vrot.slane %v2019_v46, 1  ;;  %v7331_v45 = vsel %vm1887_vm12, %v1932_v3, %v1933_v41  ;;  %v7334_v50 = vsel %vm1887_vm12, 0.0, %v1932_v3  ;;  %v2206_v3 = vrot.slane %v7284_v40, 2 }
 0x364   : > { %9171 = vst [vmem:[#allocation32_spill] sm:$0xff] %v7331_v45  ;;  %9172 = vst [vmem:[#allocation40_spill] sm:$0xff] %v7334_v50  ;;  %v2128_v31 = vrot.slane %v7334_v50, 1  ;;  %v2129_v58 = vrot.slane %v7331_v45, 1  ;;  %v2203_v41 = vrot.slane %v7294_v15, 2  ;;  %v2208_v9 = vrot.slane %v7334_v50, 2 }
 0x365   : > { %4031 = vrot.lane.b32.xlu0 %v7148_v6, %s4767_s30  ;;  %v3844_v54 = vpop.f32.mrb[30].mxu0  ;;  %v2209_v6 = vrot.slane %v7331_v45, 2  ;;  %v2211_v40 = vrot.slane %v2019_v46, 2  ;;  %v2207_v46 = vsel %vm352_vm1, %v2204_v55, %v2206_v3 }
 0x366   : > { %v1853_v8 = vmax.f32 %v3844_v54, 0.0  ;;  %v1813_v38 = vpop.f32.mrb[31].mxu0  ;;  %v2130_v26 = vsel %vm271_vm0, %v2128_v31, %v2129_v58  ;;  %v2132_v12 = vsel %vm271_vm0, %v2129_v58, %v2131_v48  ;;  %v7358_v48 = vpack.i.bf16 %v2197_v17, %v2195_v16 }
 0x367   : > { %v1852_v56 = vmax.f32 %v1813_v38, 0.0  ;;  %v7349_v36 = vpack.i.bf16 %v2132_v12, %v2130_v26  ;;  %v2200_v54 = vsel %vm352_vm1, %v2198_v43, %v2199_v11  ;;  %v2205_v12 = vsel %vm352_vm1, %v2203_v41, %v2204_v55 }
 0x368   : > { %v1936_v37 = vrot.slane %v1853_v8, 7  ;;  %v2202_v8 = vsel %vm352_vm1, %v2199_v11, %v2201_v29  ;;  %v2212_v16 = vsel %vm352_vm1, %v2209_v6, %v2211_v40 }
 0x369   : > { %v1935_v4 = vrot.slane %v1852_v56, 7  ;;  %4041 = vrot.lane.b32.xlu0 %v7231_v7, %s4767_s30  ;;  %4026 = vrot.lane.b32.xlu1 %v7349_v36, %s4766_s29  ;;  %v7375_v29 = vpack.i.bf16 %v2202_v8, %v2200_v54  ;;  %v7381_v56 = vpack.i.bf16 %v2207_v46, %v2205_v12  ;;  %v4115_v12 = vpack.i.bf16 %v6986_v61, %v6989_v25 }
 0x36a   : > { %v2020_v38 = vsel %vm1887_vm12, %v1936_v37, 0.0  ;;  %v7436_v46 = vpack.i.bf16 %v7070_v62, %v7073_v47  ;;  %v9176_v47 = vld [vmem:[#allocation120_spill] sm:$0xff] }
 0x36b   : > { %v1937_v31 = vsel %vm1887_vm12, %v1935_v4, %v1936_v37  ;;  %v2003_v58 = vsel %vm1887_vm12, 0.0, %v1935_v4  ;;  %v2210_v4 = vsel %vm352_vm1, %v2208_v9, %v2209_v6  ;;  %v2218_v17 = vrot.slane %v2020_v38, 1  ;;  %v9177_v62 = vld [vmem:[#allocation112_spill] sm:$0xff] }
 0x36c   : > { %v7365_v26 = vpack.i.bf16 %v1937_v31, %v2003_v58  ;;  %v2215_v37 = vrot.slane %v2003_v58, 1  ;;  %v2220_v43 = vrot.slane %v2003_v58, 2  ;;  %v2216_v11 = vrot.slane %v1937_v31, 1 }
 0x36d   : > { %4051 = vrot.lane.b32.xlu0 %v7235_v22, %s4767_s30  ;;  %4036 = vrot.lane.b32.xlu1 %v7239_v52, %s4767_s30  ;;  %v2221_v41 = vrot.slane %v1937_v31, 2  ;;  %v2223_v3 = vrot.slane %v2020_v38, 2  ;;  %v7383_v55 = vpack.i.bf16 %v2212_v16, %v2210_v4  ;;  %v7386_v6 = vpack.i.bf16 %v2172_v51, %v7307_v0 }
 0x36e   : > { %v2217_v9 = vsel %vm271_vm0, %v2215_v37, %v2216_v11  ;;  %v2219_v40 = vsel %vm271_vm0, %v2216_v11, %v2218_v17  ;;  %v4110_v0 = vpack.i.bf16 %v6971_v19, %v6974_v35  ;;  %v7419_v51 = vpack.i.bf16 %v7000_v34, %v7003_v18  ;;  %v9174_v11 = vld [vmem:[#allocation62_spill] sm:$0xff] }
 0x36f   : > { %v2222_v31 = vsel %vm352_vm1, %v2220_v43, %v2221_v41  ;;  %v7395_v58 = vpack.i.bf16 %v2219_v40, %v2217_v9  ;;  %v2224_v54 = vsel %vm352_vm1, %v2221_v41, %v2223_v3  ;;  %v7427_v38 = vpack.i.bf16 %v7034_v32, %v7037_v27  ;;  %v9173_v43 = vld [vmem:[#allocation140_spill] sm:$0xff] }
 0x370   : > { %v7398_v8 = vpack.i.bf16 %v2224_v54, %v2222_v31  ;;  %v7440_v4 = vpack.i.bf16 %v7018_v53, %v7021_v20  ;;  %v7448_v16 = vpack.i.bf16 %v7108_v30, %v7111_v5  ;;  %v7452_v17 = vpack.i.bf16 %v7054_v21, %v7057_v10  ;;  %v9182_v10 = vld [vmem:[#allocation114_spill] sm:$0xff]  ;;  %v9190_v53 = vld [vmem:[#allocation48_spill] sm:$0xff] }
 0x371   : > { %4061 = vrot.lane.b32.xlu0 %v7241_v33, %s4767_s30  ;;  %4046 = vrot.lane.b32.xlu1 %v7246_v44, %s4767_s30  ;;  %v4160_v37 = vpack.i.bf16 %v7170_v59, %v7173_v1  ;;  %v7462_v41 = vpack.i.bf16 %v9174_v11, %v9173_v43  ;;  %v7469_v3 = vpack.i.bf16 %v7253_v57, %v7256_v23  ;;  %v9183_v21 = vld [vmem:[#allocation90_spill] sm:$0xff] }
 0x372   : > { %v4155_v9 = vpack.i.bf16 %v7137_v28, %v7140_v49  ;;  %v7478_v40 = vpack.i.bf16 %v7331_v45, %v7334_v50  ;;  %v7482_v31 = vpack.i.bf16 %v7209_v2, %v7212_v63  ;;  %v7490_v54 = vpack.i.bf16 %v7291_v42, %v7294_v15  ;;  %v9178_v50 = vld [vmem:[#allocation60_spill] sm:$0xff]  ;;  %v9179_v45 = vld [vmem:[#allocation6_spill] sm:$0xff]  ;;  %v7508_v15 = vpop.permute.xlu0 %3951  ;;  %v9181_v42 = vld [vmem:[#allocation7_spill] sm:$0xff] }
 0x373   : > { %v9189_v20 = vld [vmem:[#allocation46_spill] sm:$0xff] }
 0x375   : > { %4071 = vrot.lane.b32.xlu0 %v7262_v60, %s4767_s30  ;;  %4056 = vrot.lane.b32.xlu1 %v7296_v24, %s4767_s30 }
 0x379   : > { %4081 = vrot.lane.b32.xlu0 %v7300_v39, %s4767_s30  ;;  %4066 = vrot.lane.b32.xlu1 %v7386_v6, %s4767_s30 }
 0x37d   : > { %4091 = vrot.lane.b32.xlu0 %v7358_v48, %s4767_s30  ;;  %4076 = vrot.lane.b32.xlu1 %v7311_v14, %s4767_s30 }
 0x381   : > { %4101 = vrot.lane.b32.xlu0 %v7381_v56, %s4767_s30  ;;  %4086 = vrot.lane.b32.xlu1 %v7328_v13, %s4767_s30 }
 0x385   : > { %4111 = vrot.lane.b32.xlu0 %v4110_v0, %s4768_s4  ;;  %4096 = vrot.lane.b32.xlu1 %v7375_v29, %s4767_s30  ;;  %v9175_v0 = vld [vmem:[#allocation86_spill] sm:$0xff] }
 0x389   : > { %4121 = vrot.lane.b32.xlu0 %v7419_v51, %s4768_s4  ;;  %4106 = vrot.lane.b32.xlu1 %v7383_v55, %s4767_s30  ;;  %s161_s30 = sand.u32 1, %s4756_s13  }
 0x38a   : > { %s3565_s17 = scalar_lea.sflag [#allocation3], %s161_s30 }
 0x38d   : > { %4131 = vrot.lane.b32.xlu0 %v7427_v38, %s4768_s4  ;;  %4116 = vrot.lane.b32.xlu1 %v4115_v12, %s4768_s4 }
 0x38f   : > { %v7523_v32 = vpop.permute.xlu1 %3956 }
 0x391   : > { %4141 = vrot.lane.b32.xlu0 %v7436_v46, %s4768_s4  ;;  %4126 = vrot.lane.b32.xlu1 %v7440_v4, %s4768_s4 }
 0x394   : > { %v7518_v27 = vpop.permute.xlu0 %3961 }
 0x395   : > { %4151 = vrot.lane.b32.xlu0 %v7448_v16, %s4768_s4  ;;  %4136 = vrot.lane.b32.xlu1 %v7452_v17, %s4768_s4 }
 0x399   : > { %4161 = vrot.lane.b32.xlu0 %v4160_v37, %s4768_s4  ;;  %4146 = vrot.lane.b32.xlu1 %v7462_v41, %s4768_s4 }
 0x39d   : > { %4171 = vrot.lane.b32.xlu0 %v7469_v3, %s4768_s4  ;;  %4156 = vrot.lane.b32.xlu1 %v4155_v9, %s4768_s4  ;;  %v7525_v23 = vpop.permute.xlu0 %3971 }
 0x39e   : > { %9184 = vst [vmem:[#allocation170_spill] sm:$0xff] %v7525_v23  ;;  %v9193_v23 = vld [vmem:[#allocation79_spill] sm:$0xff] }
 0x3a1   : > { %4181 = vrot.lane.b32.xlu0 %v7478_v40, %s4768_s4  ;;  %4166 = vrot.lane.b32.xlu1 %v7482_v31, %s4768_s4 }
 0x3a5   : > { %4191 = vrot.lane.b32.xlu0 %v9175_v0, %s4769_s5  ;;  %4176 = vrot.lane.b32.xlu1 %v7490_v54, %s4768_s4  ;;  %v9180_v0 = vld [vmem:[#allocation5_spill] sm:$0xff]  ;;  %v7532_v57 = vpop.permute.xlu0 %3981 }
 0x3a6   : > { %9186 = vst [vmem:[#allocation143_spill] sm:$0xff] %v7532_v57 }
 0x3a9   : > { %4201 = vrot.lane.b32.xlu0 %v9176_v47, %s4769_s5  ;;  %4186 = vrot.lane.b32.xlu1 %v7365_v26, %s4768_s4  ;;  %s3642_s4 = sshll.u32 %s161_s30, 3 }
 0x3ad   : > { %4211 = vrot.lane.b32.xlu0 %v9177_v62, %s4769_s5  ;;  %4196 = vrot.lane.b32.xlu1 %v9178_v50, %s4769_s5 }
 0x3ae   : > { %v7540_v2 = vpop.permute.xlu0 %3991 }
 0x3b1   : > { %4221 = vrot.lane.b32.xlu0 %v9179_v45, %s4769_s5  ;;  %4206 = vrot.lane.b32.xlu1 %v9180_v0, %s4769_s5 }
 0x3b4   : > { %v7550_v57 = vpop.permute.xlu0 %4001 }
 0x3b5   : > { %4231 = vrot.lane.b32.xlu0 %v9181_v42, %s4769_s5  ;;  %4216 = vrot.lane.b32.xlu1 %v9182_v10, %s4769_s5 }
 0x3b9   : > { %4241 = vrot.lane.b32.xlu0 %v7239_v52, %s4770_s6  ;;  %4226 = vrot.lane.b32.xlu1 %v9183_v21, %s4769_s5  ;;  %v7530_v52 = vpop.permute.xlu1 %3966 }
 0x3ba   : > { %9185 = vst [vmem:[#allocation124_spill] sm:$0xff] %v7530_v52 }
 0x3bd   : > { %4251 = vrot.lane.b32.xlu0 %v4115_v12, %s4771_s7  ;;  %4236 = vrot.lane.b32.xlu1 %v7311_v14, %s4770_s6  ;;  %v9187_v12 = vld [vmem:[#allocation91_spill] sm:$0xff]  ;;  %v7538_v63 = vpop.permute.xlu1 %3976 }
 0x3be   : > { %9188 = vst [vmem:[#allocation171_spill] sm:$0xff] %v7538_v63  ;;  %v9194_v63 = vld [vmem:[#allocation80_spill] sm:$0xff] }
 0x3bf   : > { %v9195_v18 = vpack.i.bf16 %v9193_v23, %v9194_v63 }
 0x3c1   : > { %4261 = vrot.lane.b32.xlu0 %v9178_v50, %s4772_s8  ;;  %4246 = vrot.lane.b32.xlu1 %v4155_v9, %s4771_s7  ;;  %v9191_v50 = vpack.i.bf16 %v9189_v20, %v9190_v53  ;;  %v7548_v9 = vpop.permute.xlu1 %3986 }
 0x3c2   : > { %9192 = vst [vmem:[#allocation64_spill] sm:$0xff] %v7548_v9 }
 0x3c3   : > { %v7560_v52 = vpop.permute.xlu0 %4011 }
 0x3c4   : > { %9196 = vst [vmem:[#allocation144_spill] sm:$0xff] %v7560_v52 }
 0x3c5   : > { %4271 = vrot.lane.b32.xlu0 %v7231_v7, %s4773_s9  ;;  %4256 = vrot.lane.b32.xlu1 %v9187_v12, %s4772_s8  ;;  %v7558_v34 = vpop.permute.xlu1 %3996 }
 0x3c9   : > { %4281 = vrot.lane.b32.xlu0 %v9191_v50, %s4770_s6  ;;  %4266 = vrot.lane.b32.xlu1 %v7300_v39, %s4773_s9  ;;  %v7565_v53 = vpop.permute.xlu1 %4006  ;;  %v9202_v50 = vld [vmem:[#allocation111_spill] sm:$0xff] }
 0x3cd   : > { %4291 = vrot.lane.b32.xlu0 %v7300_v39, %s4770_s6  ;;  %4276 = vrot.lane.b32.xlu1 %v9195_v18, %s4770_s6  ;;  %v9198_v39 = vld [vmem:[#allocation168_spill] sm:$0xff]  ;;  %v7573_v18 = vpop.permute.xlu1 %4016 }
 0x3ce   : > { %9199 = vst [vmem:[#allocation94_spill] sm:$0xff] %v7573_v18 }
 0x3d1   : > { %4301 = vrot.lane.b32.xlu0 %v4160_v37, %s4771_s7  ;;  %4286 = vrot.lane.b32.xlu1 %v9187_v12, %s4769_s5  ;;  %v9201_v12 = vld [vmem:[#allocation110_spill] sm:$0xff] }
 0x3d2   : > { %v9203_v9 = vpack.i.bf16 %v9201_v12, %v9202_v50 }
 0x3d3   : > { %v7567_v20 = vpop.permute.xlu0 %4021 }
 0x3d4   : > { %9197 = vst [vmem:[#allocation10_spill] sm:$0xff] %v7567_v20 }
 0x3d5   : > { %4311 = vrot.lane.b32.xlu0 %v9198_v39, %s4772_s8  ;;  %4296 = vrot.lane.b32.xlu1 %v7231_v7, %s4770_s6 }
 0x3d7   : > { %v7575_v63 = vpop.permute.xlu0 %4031 }
 0x3d9   : > { %4321 = vrot.lane.b32.xlu0 %v7328_v13, %s4773_s9  ;;  %4306 = vrot.lane.b32.xlu1 %v7419_v51, %s4771_s7 }
 0x3db   : > { %v7581_v23 = vpop.permute.xlu1 %4026  ;;  %v7583_v37 = vpop.permute.xlu0 %4041 }
 0x3dc   : > { %9200 = vst [vmem:[#allocation11_spill] sm:$0xff] %v7581_v23 }
 0x3dd   : > { %4331 = vrot.lane.b32.xlu0 %v9203_v9, %s4770_s6  ;;  %4316 = vrot.lane.b32.xlu1 %v9176_v47, %s4772_s8  ;;  %v9207_v9 = vld [vmem:[#allocation49_spill] sm:$0xff]  ;;  %v9208_v47 = vld [vmem:[#allocation50_spill] sm:$0xff] }
 0x3de   : > { %v9209_v12 = vpack.i.bf16 %v9207_v9, %v9208_v47 }
 0x3df   : > { %v7591_v7 = vpop.permute.xlu1 %4036  ;;  %v7593_v20 = vpop.permute.xlu0 %4051 }
 0x3e0   : > { %9204 = vst [vmem:[#allocation22_spill] sm:$0xff] %v7593_v20  ;;  %v9221_v20 = vld [vmem:[#allocation57_spill] sm:$0xff] }
 0x3e1   : > { %4341 = vrot.lane.b32.xlu0 %v9198_v39, %s4769_s5  ;;  %4326 = vrot.lane.b32.xlu1 %v7246_v44, %s4773_s9 }
 0x3e3   : > { %v7599_v51 = vpop.permute.xlu1 %4046  ;;  %v7601_v23 = vpop.permute.xlu0 %4061 }
 0x3e4   : > { %9205 = vst [vmem:[#allocation95_spill] sm:$0xff] %v7599_v51  ;;  %9206 = vst [vmem:[#allocation33_spill] sm:$0xff] %v7601_v23 }
 0x3e5   : > { %4351 = vrot.lane.b32.xlu0 %v7246_v44, %s4770_s6  ;;  %4336 = vrot.lane.b32.xlu1 %v9209_v12, %s4770_s6  ;;  %v9216_v12 = vld [vmem:[#allocation51_spill] sm:$0xff] }
 0x3e7   : > { %v7609_v50 = vpop.permute.xlu1 %4056  ;;  %v7611_v18 = vpop.permute.xlu0 %4071 }
 0x3e8   : > { %9210 = vst [vmem:[#allocation23_spill] sm:$0xff] %v7609_v50  ;;  %v4074_v1 = vunpack.i.h.bf16 %v7611_v18 }
 0x3e9   : > { %4361 = vrot.lane.b32.xlu0 %v7440_v4, %s4771_s7  ;;  %4346 = vrot.lane.b32.xlu1 %v7328_v13, %s4770_s6  ;;  %v9213_v4 = vld [vmem:[#allocation169_spill] sm:$0xff] }
 0x3eb   : > { %v7617_v39 = vpop.permute.xlu1 %4066  ;;  %v7619_v23 = vpop.permute.xlu0 %4081 }
 0x3ec   : > { %9211 = vst [vmem:[#allocation172_spill] sm:$0xff] %v7617_v39 }
 0x3ed   : > { %4371 = vrot.lane.b32.xlu0 %v9180_v0, %s4772_s8  ;;  %4356 = vrot.lane.b32.xlu1 %v7482_v31, %s4771_s7  ;;  %v9217_v0 = vld [vmem:[#allocation52_spill] sm:$0xff] }
 0x3ee   : > { %v9218_v39 = vpack.i.bf16 %v9216_v12, %v9217_v0 }
 0x3ef   : > { %v7625_v44 = vpop.permute.xlu1 %4076  ;;  %v7627_v9 = vpop.permute.xlu0 %4091 }
 0x3f0   : > { %9212 = vst [vmem:[#allocation125_spill] sm:$0xff] %v7627_v9  ;;  %v9220_v9 = vld [vmem:[#allocation136_spill] sm:$0xff] }
 0x3f1   : > { %4381 = vrot.lane.b32.xlu0 %v7235_v22, %s4773_s9  ;;  %4366 = vrot.lane.b32.xlu1 %v9213_v4, %s4772_s8  ;;  %v9222_v52 = vpack.i.bf16 %v9220_v9, %v9221_v20 }
 0x3f3   : > { %v7633_v13 = vpop.permute.xlu1 %4086  ;;  %v7635_v47 = vpop.permute.xlu0 %4101 }
 0x3f4   : > { %9214 = vst [vmem:[#allocation145_spill] sm:$0xff] %v7633_v13  ;;  %9215 = vst [vmem:[#allocation43_spill] sm:$0xff] %v7635_v47 }
 0x3f5   : > { %4391 = vrot.lane.b32.xlu0 %v9218_v39, %s4770_s6  ;;  %4376 = vrot.lane.b32.xlu1 %v7358_v48, %s4773_s9 }
 0x3f7   : > { %v7643_v31 = vpop.permute.xlu1 %4096  ;;  %v7645_v50 = vpop.permute.xlu0 %4111 }
 0x3f8   : > { %9219 = vst [vmem:[#allocation146_spill] sm:$0xff] %v7643_v31  ;;  %v9236_v31 = vld [vmem:[#allocation77_spill] sm:$0xff] }
 0x3f9   : > { %4401 = vrot.lane.b32.xlu0 %v7358_v48, %s4770_s6  ;;  %4386 = vrot.lane.b32.xlu1 %v9222_v52, %s4770_s6  ;;  %v9225_v48 = vld [vmem:[#allocation8_spill] sm:$0xff] }
 0x3fb   : > { %v7653_v47 = vpop.permute.xlu1 %4106  ;;  %v7655_v51 = vpop.permute.xlu0 %4121 }
 0x3fc   : > { %9223 = vst [vmem:[#allocation12_spill] sm:$0xff] %v7653_v47 }
 0x3fd   : > { %4411 = vrot.lane.b32.xlu0 %v7469_v3, %s4771_s7  ;;  %4396 = vrot.lane.b32.xlu1 %v9213_v4, %s4769_s5  ;;  %v9229_v4 = vld [vmem:[#allocation137_spill] sm:$0xff] }
 0x3ff   : > { %v7661_v39 = vpop.permute.xlu1 %4116  ;;  %v7663_v12 = vpop.permute.xlu0 %4131 }
 0x400   : > { %9224 = vst [vmem:[#allocation13_spill] sm:$0xff] %v7663_v12 }
 0x401   : > { %4421 = vrot.lane.b32.xlu0 %v9225_v48, %s4772_s8  ;;  %4406 = vrot.lane.b32.xlu1 %v7235_v22, %s4770_s6  ;;  %v9230_v22 = vld [vmem:[#allocation81_spill] sm:$0xff] }
 0x402   : > { %v9231_v0 = vpack.i.bf16 %v9229_v4, %v9230_v22 }
 0x403   : > { %v7669_v52 = vpop.permute.xlu1 %4126  ;;  %v7671_v20 = vpop.permute.xlu0 %4141 }
 0x404   : > { %9226 = vst [vmem:[#allocation41_spill] sm:$0xff] %v7669_v52  ;;  %9227 = vst [vmem:[#allocation163_spill] sm:$0xff] %v7671_v20 }
 0x405   : > { %4416 = vrot.lane.b32.xlu1 %v7427_v38, %s4771_s7  ;;  %4431 = vrot.lane.b32.xlu0 %v7375_v29, %s4773_s9 }
 0x407   : > { %v7677_v3 = vpop.permute.xlu1 %4136  ;;  %v7679_v9 = vpop.permute.xlu0 %4151 }
 0x408   : > { %9228 = vst [vmem:[#allocation45_spill] sm:$0xff] %v7677_v3 }
 0x409   : > { %4426 = vrot.lane.b32.xlu1 %v9177_v62, %s4772_s8  ;;  %4441 = vrot.lane.b32.xlu0 %v9231_v0, %s4770_s6  ;;  %v9235_v62 = vld [vmem:[#allocation53_spill] sm:$0xff] }
 0x40a   : > { %v9237_v12 = vpack.i.bf16 %v9235_v62, %v9236_v31 }
 0x40b   : > { %v7687_v47 = vpop.permute.xlu1 %4146  ;;  %v7689_v20 = vpop.permute.xlu0 %4161 }
 0x40c   : > { %9232 = vst [vmem:[#allocation65_spill] sm:$0xff] %v7687_v47  ;;  %9233 = vst [vmem:[#allocation66_spill] sm:$0xff] %v7689_v20 }
 0x40d   : > { %4436 = vrot.lane.b32.xlu1 %v7296_v24, %s4773_s9  ;;  %4451 = vrot.lane.b32.xlu0 %v9225_v48, %s4769_s5 }
 0x40f   : > { %v7695_v38 = vpop.permute.xlu1 %4156  ;;  %v7697_v3 = vpop.permute.xlu0 %4171 }
 0x410   : > { %9234 = vst [vmem:[#allocation96_spill] sm:$0xff] %v7697_v3 }
 0x411   : > { %4446 = vrot.lane.b32.xlu1 %v9237_v12, %s4770_s6  ;;  %4461 = vrot.lane.b32.xlu0 %v7296_v24, %s4770_s6  ;;  %v9243_v12 = vld [vmem:[#allocation93_spill] sm:$0xff] }
 0x413   : > { %v7705_v4 = vpop.permute.xlu1 %4166  ;;  %v7707_v22 = vpop.permute.xlu0 %4181 }
 0x414   : > { %9238 = vst [vmem:[#allocation97_spill] sm:$0xff] %v7705_v4  ;;  %9239 = vst [vmem:[#allocation34_spill] sm:$0xff] %v7707_v22  ;;  %v9250_v22 = vld [vmem:[#allocation82_spill] sm:$0xff]  ;;  %v4154_v4 = vunpack.i.h.bf16 %v7679_v9 }
 0x415   : > { %4456 = vrot.lane.b32.xlu1 %v7375_v29, %s4770_s6  ;;  %4471 = vrot.lane.b32.xlu0 %v7452_v17, %s4771_s7 }
 0x417   : > { %v7713_v48 = vpop.permute.xlu1 %4176  ;;  %v7715_v0 = vpop.permute.xlu0 %4191 }
 0x418   : > { %9240 = vst [vmem:[#allocation126_spill] sm:$0xff] %v7713_v48  ;;  %v9251_v48 = vld [vmem:[#allocation113_spill] sm:$0xff] }
 0x419   : > { %4466 = vrot.lane.b32.xlu1 %v7490_v54, %s4771_s7  ;;  %4481 = vrot.lane.b32.xlu0 %v9182_v10, %s4772_s8  ;;  %v9245_v54 = vld [vmem:[#allocation54_spill] sm:$0xff]  ;;  %v9252_v3 = vpack.i.bf16 %v9250_v22, %v9251_v48  ;;  %v3953_v22 = vunpack.i.l.bf16 %v7508_v15 }
 0x41a   : > { %v9246_v10 = vld [vmem:[#allocation78_spill] sm:$0xff] }
 0x41b   : > { %v7721_v24 = vpop.permute.xlu1 %4186  ;;  %v7723_v31 = vpop.permute.xlu0 %4201  ;;  %v9247_v62 = vpack.i.bf16 %v9245_v54, %v9246_v10 }
 0x41c   : > { %9241 = vst [vmem:[#allocation147_spill] sm:$0xff] %v7721_v24  ;;  %9242 = vst [vmem:[#allocation148_spill] sm:$0xff] %v7723_v31  ;;  %v9258_v31 = vld [vmem:[#allocation58_spill] sm:$0xff] }
 0x41d   : > { %4476 = vrot.lane.b32.xlu1 %v9243_v12, %s4772_s8  ;;  %4491 = vrot.lane.b32.xlu0 %v7241_v33, %s4773_s9 }
 0x41f   : > { %v7729_v29 = vpop.permute.xlu1 %4196  ;;  %v7731_v17 = vpop.permute.xlu0 %4211 }
 0x420   : > { %9244 = vst [vmem:[#allocation14_spill] sm:$0xff] %v7731_v17 }
 0x421   : > { %4486 = vrot.lane.b32.xlu1 %v7381_v56, %s4773_s9  ;;  %4501 = vrot.lane.b32.xlu0 %v9247_v62, %s4770_s6  ;;  %v3954_v62 = vunpack.i.h.bf16 %v7508_v15  ;;  %v4073_v15 = vunpack.i.l.bf16 %v7611_v18  ;;  %v4113_v18 = vunpack.i.l.bf16 %v7645_v50 }
 0x423   : > { %v7739_v47 = vpop.permute.xlu1 %4206  ;;  %v7741_v24 = vpop.permute.xlu0 %4221 }
 0x424   : > { %9248 = vst [vmem:[#allocation15_spill] sm:$0xff] %v7739_v47  ;;  %9249 = vst [vmem:[#allocation24_spill] sm:$0xff] %v7741_v24  ;;  %v9255_v24 = vld [vmem:[#allocation59_spill] sm:$0xff] }
 0x425   : > { %4496 = vrot.lane.b32.xlu1 %v9252_v3, %s4770_s6  ;;  %4511 = vrot.lane.b32.xlu0 %v7381_v56, %s4770_s6  ;;  %v3994_v56 = vunpack.i.h.bf16 %v7540_v2  ;;  %v3993_v3 = vunpack.i.l.bf16 %v7540_v2 }
 0x427   : > { %v7749_v17 = vpop.permute.xlu1 %4216  ;;  %v4232_v52 = vpop.permute.xlu0 %4231  ;;  %v3010_v2 = vsel %vm1227_vm3, %v9174_v11, %v3994_v56  ;;  %v4193_v56 = vunpack.i.l.bf16 %v7715_v0 }
 0x428   : > { %9253 = vst [vmem:[#allocation25_spill] sm:$0xff] %v7749_v17  ;;  %v9256_v17 = vld [vmem:[#allocation138_spill] sm:$0xff]  ;;  %v4234_v59 = vunpack.i.h.bf16 %v4232_v52 }
 0x429   : > { %4506 = vrot.lane.b32.xlu1 %v9243_v12, %s4769_s5  ;;  %4521 = vrot.lane.b32.xlu0 %v7478_v40, %s4771_s7  ;;  %v4034_v12 = vunpack.i.h.bf16 %v7575_v63  ;;  %v2993_v47 = vsel %vm1227_vm3, %v9256_v17, %v3953_v22  ;;  %v4114_v22 = vunpack.i.h.bf16 %v7645_v50  ;;  %v4233_v50 = vunpack.i.l.bf16 %v4232_v52 }
 0x42b   : > { %v7755_v54 = vpop.permute.xlu1 %4226  ;;  %v4242_v10 = vpop.permute.xlu0 %4241 }
 0x42c   : > { %9254 = vst [vmem:[#allocation67_spill] sm:$0xff] %v7755_v54  ;;  %v4033_v54 = vunpack.i.l.bf16 %v7575_v63  ;;  %v3009_v63 = vsel %vm1227_vm3, %v9173_v43, %v3993_v3  ;;  %v3042_v3 = vsel %vm1260_vm4, %v3010_v2, %v4074_v1 }
 0x42d   : > { %4516 = vrot.lane.b32.xlu1 %v7241_v33, %s4770_s6  ;;  %4531 = vrot.lane.b32.xlu0 %v7349_v36, %s4772_s8  ;;  %v2994_v33 = vsel %vm1227_vm3, %v9255_v24, %v3954_v62  ;;  %v3041_v43 = vsel %vm1260_vm4, %v3009_v63, %v4073_v15  ;;  %v4194_v62 = vunpack.i.h.bf16 %v7715_v0  ;;  %v4243_v15 = vunpack.i.l.bf16 %v4242_v10 }
 0x42e   : > { %v3025_v42 = vsel %vm1260_vm4, %v2993_v47, %v4033_v54  ;;  %v3026_v11 = vsel %vm1260_vm4, %v2994_v33, %v4034_v12  ;;  %v4079_v47 = vunpack.i.h.bf16 %v7625_v44  ;;  %v4078_v54 = vunpack.i.l.bf16 %v7625_v44 }
 0x42f   : > { %v7765_v48 = vpop.permute.xlu1 %4236  ;;  %v7767_v40 = vpop.permute.xlu0 %4251  ;;  %v4244_v12 = vunpack.i.h.bf16 %v4242_v10  ;;  %v3057_v1 = vsel %vm1293_vm5, %v3025_v42, %v4113_v18  ;;  %v3058_v0 = vsel %vm1293_vm5, %v3026_v11, %v4114_v22  ;;  %v3074_v33 = vsel %vm1293_vm5, %v3042_v3, %v4154_v4 }
 0x430   : > { %v4159_v63 = vunpack.i.h.bf16 %v7695_v38  ;;  %v3090_v10 = vsel %vm1326_vm6, %v3058_v0, %v4194_v62  ;;  %v3106_v22 = vsel %vm1326_vm6, %v3074_v33, %v4234_v59  ;;  %v4253_v18 = vunpack.i.l.bf16 %v7767_v40 }
 0x431   : > { %4526 = vrot.lane.b32.xlu1 %v7436_v46, %s4771_s7  ;;  %4541 = vrot.lane.b32.xlu0 %v7383_v55, %s4773_s9  ;;  %v4153_v46 = vunpack.i.l.bf16 %v7679_v9  ;;  %v9257_v9 = vld [vmem:[#allocation115_spill] sm:$0xff] }
 0x432   : > { %v9259_v20 = vpack.i.bf16 %v9257_v9, %v9258_v31  ;;  %v4239_v31 = vunpack.i.h.bf16 %v7765_v48  ;;  %v4238_v9 = vunpack.i.l.bf16 %v7765_v48  ;;  %v4254_v48 = vunpack.i.h.bf16 %v7767_v40  ;;  %v9260_v40 = vld [vmem:[#allocation108_spill] sm:$0xff] }
 0x433   : > { %v4247_v14 = vpop.permute.xlu1 %4246  ;;  %v4262_v13 = vpop.permute.xlu0 %4261  ;;  %v3073_v52 = vsel %vm1293_vm5, %v3041_v43, %v4153_v46  ;;  %v3122_v46 = vsel %vm1359_vm7, %v3090_v10, %v4244_v12  ;;  %v9261_v10 = vld [vmem:[#allocation55_spill] sm:$0xff] }
 0x434   : > { %v3105_v42 = vsel %vm1326_vm6, %v3073_v52, %v4233_v50  ;;  %v4248_v11 = vunpack.i.l.bf16 %v4247_v14  ;;  %v4249_v62 = vunpack.i.h.bf16 %v4247_v14  ;;  %v4264_v43 = vunpack.i.h.bf16 %v4262_v13 }
 0x435   : > { %4536 = vrot.lane.b32.xlu1 %v9179_v45, %s4772_s8  ;;  %4551 = vrot.lane.b32.xlu0 %v9259_v20, %s4770_s6  ;;  %v3089_v20 = vsel %vm1326_vm6, %v3057_v1, %v4193_v56  ;;  %v4263_v56 = vunpack.i.l.bf16 %v4262_v13  ;;  %v3137_v1 = vsel %vm1359_vm7, %v3105_v42, %v4238_v9  ;;  %v3138_v0 = vsel %vm1359_vm7, %v3106_v22, %v4239_v31 }
 0x436   : > { %v3121_v4 = vsel %vm1359_vm7, %v3089_v20, %v4243_v15  ;;  %v9262_v14 = vpack.i.bf16 %v9260_v40, %v9261_v10  ;;  %v3154_v13 = vsel %vm1392_vm8, %v3122_v46, %v4254_v48  ;;  %v3169_v9 = vsel %vm1392_vm8, %v3137_v1, %v4248_v11 }
 0x437   : > { %v4257_v45 = vpop.permute.xlu1 %4256  ;;  %v4272_v2 = vpop.permute.xlu0 %4271  ;;  %v3170_v42 = vsel %vm1392_vm8, %v3138_v0, %v4249_v62  ;;  %v3186_v22 = vsel %vm1425_vm9, %v3154_v13, %v4264_v43  ;;  %v4158_v48 = vunpack.i.l.bf16 %v7695_v38  ;;  %v3959_v38 = vunpack.i.h.bf16 %v7523_v32 }
 0x438   : > { %v4258_v3 = vunpack.i.l.bf16 %v4257_v45  ;;  %v4259_v52 = vunpack.i.h.bf16 %v4257_v45  ;;  %v4273_v33 = vunpack.i.l.bf16 %v4272_v2  ;;  %v4274_v15 = vunpack.i.h.bf16 %v4272_v2 }
 0x439   : > { %4546 = vrot.lane.b32.xlu1 %v7386_v6, %s4773_s9  ;;  %4561 = vrot.lane.b32.xlu0 %v7349_v36, %s4769_s5  ;;  %v3153_v36 = vsel %vm1392_vm8, %v3121_v4, %v4253_v18 }
 0x43a   : > { %v3185_v2 = vsel %vm1425_vm9, %v3153_v36, %v4263_v56  ;;  %v3201_v18 = vsel %vm1425_vm9, %v3169_v9, %v4258_v3  ;;  %v3202_v40 = vsel %vm1425_vm9, %v3170_v42, %v4259_v52  ;;  %v3218_v11 = vsel %vm1458_vm10, %v3186_v22, %v4274_v15 }
 0x43b   : > { %v4267_v59 = vpop.permute.xlu1 %4266  ;;  %v4282_v50 = vpop.permute.xlu0 %4281  ;;  %v9266_v15 = vunpack.i.l.bf16 %v7558_v34 }
 0x43c   : > { %v4269_v20 = vunpack.i.h.bf16 %v4267_v59  ;;  %v4268_v12 = vunpack.i.l.bf16 %v4267_v59  ;;  %v4284_v31 = vunpack.i.h.bf16 %v4282_v50  ;;  %v4283_v45 = vunpack.i.l.bf16 %v4282_v50 }
 0x43d   : > { %4556 = vrot.lane.b32.xlu1 %v9262_v14, %s4770_s6  ;;  %4571 = vrot.lane.b32.xlu0 %v7386_v6, %s4770_s6  ;;  %v3217_v6 = vsel %vm1458_vm10, %v3185_v2, %v4273_v33  ;;  %v4039_v2 = vunpack.i.h.bf16 %v7591_v7 }
 0x43e   : > { %v3233_v62 = vsel %vm1458_vm10, %v3201_v18, %v4268_v12  ;;  %v3234_v43 = vsel %vm1458_vm10, %v3202_v40, %v4269_v20  ;;  %v3345_v50 = vsel %vm1496_vm11, %v3217_v6, %v4283_v45  ;;  %v3346_v1 = vsel %vm1496_vm11, %v3218_v11, %v4284_v31 }
 0x43f   : > { %v4277_v4 = vpop.permute.xlu1 %4276  ;;  %v4292_v59 = vpop.permute.xlu0 %4291  ;;  %v3011_v20 = vsel %vm1227_vm3, %v7111_v5, %v9266_v15 }
 0x440   : > { %v4279_v10 = vunpack.i.h.bf16 %v4277_v4  ;;  %v4278_v46 = vunpack.i.l.bf16 %v4277_v4  ;;  %v3043_v9 = vsel %vm1260_vm4, %v3011_v20, %v4078_v54  ;;  %v4294_v54 = vunpack.i.h.bf16 %v4292_v59 }
 0x441   : > { %4566 = vrot.lane.b32.xlu1 %v7383_v55, %s4770_s6  ;;  %4581 = vrot.lane.b32.xlu0 %v7462_v41, %s4771_s7  ;;  %v9265_v41 = vunpack.i.h.bf16 %v7558_v34  ;;  %v3856_v34 = vpack.c.bf16 %v3346_v1, %v3345_v50  ;;  %v4293_v31 = vunpack.i.l.bf16 %v4292_v59  ;;  %v4630_v50 = vpack.i.bf16 %v9255_v24, %v9256_v17 }
 0x442   : > { %v3361_v56 = vsel %vm1496_vm11, %v3233_v62, %v4278_v46  ;;  %v3362_v3 = vsel %vm1496_vm11, %v3234_v43, %v4279_v10  ;;  %v9268_v62 = vld [vmem:[#allocation44_spill] sm:$0xff]  ;;  %v4198_v24 = vunpack.i.l.bf16 %v7729_v29 }
 0x443   : > { %v4287_v0 = vpop.permute.xlu1 %4286  ;;  %v4302_v52 = vpop.permute.xlu0 %4301  ;;  %v3853_v33 = vpack.c.bf16 %v3362_v3, %v3361_v56  ;;  %v3012_v36 = vsel %vm1227_vm3, %v7108_v30, %v9265_v41  ;;  %v3075_v30 = vsel %vm1293_vm5, %v3043_v9, %v4158_v48  ;;  %v2996_v56 = vsel %vm1227_vm3, %v6971_v19, %v3959_v38 }
 0x444   : > { %v4289_v12 = vunpack.i.h.bf16 %v4287_v0  ;;  %v4288_v14 = vunpack.i.l.bf16 %v4287_v0  ;;  %v3044_v13 = vsel %vm1260_vm4, %v3012_v36, %v4079_v47  ;;  %v4304_v22 = vunpack.i.h.bf16 %v4302_v52 }
 0x445   : > { %4576 = vrot.lane.b32.xlu1 %v7365_v26, %s4771_s7  ;;  %4591 = vrot.lane.b32.xlu0 %v9183_v21, %s4772_s8  ;;  %v3076_v5 = vsel %vm1293_vm5, %v3044_v13, %v4159_v63  ;;  %v3958_v63 = vunpack.i.l.bf16 %v7523_v32  ;;  %v4303_v18 = vunpack.i.l.bf16 %v4302_v52  ;;  %v9267_v32 = vld [vmem:[#allocation109_spill] sm:$0xff]  ;;  %v3028_v1 = vsel %vm1260_vm4, %v2996_v56, %v4039_v2  ;;  %v9271_v13 = vld [vmem:[#allocation84_spill] sm:$0xff] }
 0x446   : > { %3855 = vmatprep.subr.msk.bf16.mxu1 %vm7855_vm14, %v3853_v33  ;;  %v3108_v44 = vsel %vm1326_vm6, %v3076_v5, %v4289_v12  ;;  %v3107_v47 = vsel %vm1326_vm6, %v3075_v30, %v4288_v14  ;;  %v9269_v43 = vpack.i.bf16 %v9267_v32, %v9268_v62  ;;  %v4038_v0 = vunpack.i.l.bf16 %v7591_v7  ;;  %v9270_v14 = vld [vmem:[#allocation83_spill] sm:$0xff] }
 0x447   : > { %3858 = vmatpush3.bf16.xpose.msk.msra.mxu1 %vm7855_vm14, %v3856_v34  ;;  %v7887_v26 = vpop.permute.xlu1 %4296  ;;  %v4312_v21 = vpop.permute.xlu0 %4311  ;;  %v3139_v45 = vsel %vm1359_vm7, %v3107_v47, %v4293_v31  ;;  %v3140_v42 = vsel %vm1359_vm7, %v3108_v44, %v4294_v54  ;;  %v2995_v3 = vsel %vm1227_vm3, %v6974_v35, %v3958_v63  ;;  %v4119_v52 = vunpack.i.h.bf16 %v7661_v39 }
 0x448   : > { %v4314_v40 = vunpack.i.h.bf16 %v4312_v21  ;;  %v4313_v6 = vunpack.i.l.bf16 %v4312_v21  ;;  %v3171_v10 = vsel %vm1392_vm8, %v3139_v45, %v4303_v18  ;;  %v3172_v46 = vsel %vm1392_vm8, %v3140_v42, %v4304_v22 }
 0x449   : > { %4586 = vrot.lane.b32.xlu1 %v7395_v58, %s4772_s8  ;;  %4601 = vrot.lane.b32.xlu0 %v7262_v60, %s4773_s9  ;;  %v4118_v33 = vunpack.i.l.bf16 %v7661_v39  ;;  %v4199_v35 = vunpack.i.h.bf16 %v7729_v29  ;;  %v9272_v39 = vpack.i.bf16 %v9270_v14, %v9271_v13  ;;  %v4299_v9 = vunpack.i.h.bf16 %v7887_v26 }
 0x44a   : > { %v3203_v15 = vsel %vm1425_vm9, %v3171_v10, %v4313_v6  ;;  %v3204_v19 = vsel %vm1425_vm9, %v3172_v46, %v4314_v40  ;;  %v4298_v34 = vunpack.i.l.bf16 %v7887_v26  ;;  %v3027_v5 = vsel %vm1260_vm4, %v2995_v3, %v4038_v0 }
 0x44b   : > { %v4307_v4 = vpop.permute.xlu1 %4306  ;;  %v4322_v59 = vpop.permute.xlu0 %4321  ;;  %v3059_v38 = vsel %vm1293_vm5, %v3027_v5, %v4118_v33  ;;  %v3964_v18 = vunpack.i.h.bf16 %v7518_v27  ;;  %v3963_v40 = vunpack.i.l.bf16 %v7518_v27  ;;  %v4004_v6 = vunpack.i.h.bf16 %v7550_v57 }
 0x44c   : > { %v4324_v48 = vunpack.i.h.bf16 %v4322_v59  ;;  %v4323_v11 = vunpack.i.l.bf16 %v4322_v59  ;;  %v4309_v44 = vunpack.i.h.bf16 %v4307_v4  ;;  %v4308_v47 = vunpack.i.l.bf16 %v4307_v4 }
 0x44d   : > { %4596 = vrot.lane.b32.xlu1 %v7398_v8, %s4773_s9  ;;  %4611 = vrot.lane.b32.xlu0 %v9269_v43, %s4770_s6  ;;  %v3091_v42 = vsel %vm1326_vm6, %v3059_v38, %v4198_v24  ;;  %v4003_v56 = vunpack.i.l.bf16 %v7550_v57  ;;  %v2998_v57 = vsel %vm1227_vm3, %v6986_v61, %v3964_v18  ;;  %v4009_v61 = vunpack.i.h.bf16 %v7565_v53  ;;  %v9275_v24 = vld [vmem:[#allocation66_spill] sm:$0xff]  ;;  %v8009_v38 = vld [vmem:[%s8436_s2] sm:$0xff] }
 0x44e   : > { %v3235_v17 = vsel %vm1458_vm10, %v3203_v15, %v4323_v11  ;;  %v3236_v7 = vsel %vm1458_vm10, %v3204_v19, %v4324_v48  ;;  %v3123_v4 = vsel %vm1359_vm7, %v3091_v42, %v4298_v34  ;;  %v4043_v15 = vunpack.i.l.bf16 %v7583_v37  ;;  %3785 = vmatprep.mubr.msk.f32.mxu1 %vm3378_vm13, %v8009_v38 }
 0x44f   : > { %v4317_v41 = vpop.permute.xlu1 %4316  ;;  %v4332_v36 = vpop.permute.xlu0 %4331  ;;  %v3155_v10 = vsel %vm1392_vm8, %v3123_v4, %v4308_v47  ;;  %v3014_v19 = vsel %vm1227_vm3, %v7137_v28, %v4004_v6  ;;  %v4124_v28 = vunpack.i.h.bf16 %v7655_v51  ;;  %v9278_v47 = vld [vmem:[#allocation116_spill] sm:$0xff] }
 0x450   : > { %v4334_v20 = vunpack.i.h.bf16 %v4332_v36  ;;  %v4333_v12 = vunpack.i.l.bf16 %v4332_v36  ;;  %v4319_v63 = vunpack.i.h.bf16 %v4317_v41  ;;  %v4318_v45 = vunpack.i.l.bf16 %v4317_v41 }
 0x451   : > { %4606 = vrot.lane.b32.xlu1 %v9272_v39, %s4770_s6  ;;  %4621 = vrot.lane.b32.xlu0 %v7398_v8, %s4770_s6  ;;  %v3060_v8 = vsel %vm1293_vm5, %v3028_v1, %v4119_v52  ;;  %v4044_v36 = vunpack.i.h.bf16 %v7583_v37  ;;  %v4084_v37 = vunpack.i.h.bf16 %v7619_v23 }
 0x452   : > { %v3363_v30 = vsel %vm1496_vm11, %v3235_v17, %v4333_v12  ;;  %v3364_v29 = vsel %vm1496_vm11, %v3236_v7, %v4334_v20  ;;  %v3092_v26 = vsel %vm1326_vm6, %v3060_v8, %v4199_v35  ;;  %v3187_v11 = vsel %vm1425_vm9, %v3155_v10, %v4318_v45  ;;  %v9274_v12 = vld [vmem:[#allocation36_spill] sm:$0xff] }
 0x453   : > { %v3859_v21 = vpack.c.bf16 %v3364_v29, %v3363_v30  ;;  %v4327_v54 = vpop.permute.xlu1 %4326  ;;  %v7933_v31 = vpop.permute.xlu0 %4341  ;;  %v3124_v59 = vsel %vm1359_vm7, %v3092_v26, %v4299_v9  ;;  %v3013_v20 = vsel %vm1227_vm3, %v7140_v49, %v4003_v56  ;;  %v4008_v35 = vunpack.i.l.bf16 %v7565_v53  ;;  %v9276_v9 = vld [vmem:[#allocation148_spill] sm:$0xff] }
 0x454   : > { %v4329_v2 = vunpack.i.h.bf16 %v4327_v54  ;;  %v4328_v22 = vunpack.i.l.bf16 %v4327_v54  ;;  %v3156_v46 = vsel %vm1392_vm8, %v3124_v59, %v4309_v44  ;;  %v4123_v49 = vunpack.i.l.bf16 %v7655_v51  ;;  %v9277_v44 = vld [vmem:[#allocation7_spill] sm:$0xff] }
 0x455   : > { %4616 = vrot.lane.b32.xlu1 %v7395_v58, %s4769_s5  ;;  %4631 = vrot.lane.b32.xlu0 %v4630_v50, %s4771_s7  ;;  %v3188_v32 = vsel %vm1425_vm9, %v3156_v46, %v4319_v63  ;;  %v9273_v50 = vld [vmem:[#allocation85_spill] sm:$0xff]  ;;  %v4163_v17 = vunpack.i.l.bf16 %v9275_v24  ;;  %v3030_v39 = vsel %vm1260_vm4, %v2998_v57, %v4044_v36  ;;  %v4204_v34 = vunpack.i.h.bf16 %v9276_v9  ;;  %s3715_s5 = sshll.u32 %s4817_s16, 7  ;;  %s4775_s16 = smov [#allocation2]  }
 0x456   : > { %3861 = vmatprep.subr.msk.bf16.mxu1 %vm7855_vm14, %v3859_v21  ;;  %v3219_v3 = vsel %vm1458_vm10, %v3187_v11, %v4328_v22  ;;  %v3220_v27 = vsel %vm1458_vm10, %v3188_v32, %v4329_v2  ;;  %v4344_v30 = vunpack.i.h.bf16 %v7933_v31  ;;  %v4343_v29 = vunpack.i.l.bf16 %v7933_v31  ;;  %v9279_v21 = vld [vmem:[#allocation117_spill] sm:$0xff]  ;;  %s8392_s11 = scalar_lea.hbm %s8437_s3, %s3715_s5  ;;  %s4706_s20 = sshll.u32 %s4775_s16, 4  ;;  %s4707_s20 = int_to_ptr.vmem [resolvable:$false] %s4706_s20 }
 0x457   : > { %v4337_v58 = vpop.permute.xlu1 %4336  ;;  %v7951_v48 = vpop.permute.xlu0 %4351  ;;  %v9280_v54 = vpack.i.bf16 %v9278_v47, %v9279_v21  ;;  %v3046_v31 = vsel %vm1260_vm4, %v3014_v19, %v4084_v37  ;;  %v9281_v63 = vld [vmem:[#allocation145_spill] sm:$0xff]  ;;  %v3062_v2 = vsel %vm1293_vm5, %v3030_v39, %v4124_v28  ;;  %v9284_v28 = vld [vmem:[#allocation135_spill] sm:$0xff]  ;;  %s4708_s24 = scalar_lea.vmem %s4707_s20, 256 }
 0x458   : > { %v4339_v62 = vunpack.i.h.bf16 %v4337_v58  ;;  %v4338_v43 = vunpack.i.l.bf16 %v4337_v58  ;;  %v4354_v51 = vunpack.i.h.bf16 %v7951_v48  ;;  %v4353_v5 = vunpack.i.l.bf16 %v7951_v48 }
 0x459   : > { %4626 = vrot.lane.b32.xlu1 %v7262_v60, %s4770_s6  ;;  %4641 = vrot.lane.b32.xlu0 %v9273_v50, %s4772_s8  ;;  %v2997_v60 = vsel %vm1227_vm3, %v6989_v25, %v3963_v40  ;;  %v4083_v25 = vunpack.i.l.bf16 %v7619_v23  ;;  %v4203_v23 = vunpack.i.l.bf16 %v9276_v9  ;;  %v4089_v45 = vunpack.i.h.bf16 %v9281_v63 }
 0x45a   : > { %v3347_v1 = vsel %vm1496_vm11, %v3219_v3, %v4338_v43  ;;  %v3348_v0 = vsel %vm1496_vm11, %v3220_v27, %v4339_v62  ;;  %v3029_v13 = vsel %vm1260_vm4, %v2997_v60, %v4043_v15  ;;  %v4088_v26 = vunpack.i.l.bf16 %v9281_v63  ;;  %v9282_v62 = vld [vmem:[#allocation38_spill] sm:$0xff] }
 0x45b   : > { %v3862_v52 = vpack.c.bf16 %v3348_v0, %v3347_v1  ;;  %v7964_v33 = vpop.permute.xlu1 %4346  ;;  %v7966_v41 = vpop.permute.xlu0 %4361  ;;  %v3045_v8 = vsel %vm1260_vm4, %v3013_v20, %v4083_v25  ;;  %v3061_v42 = vsel %vm1293_vm5, %v3029_v13, %v4123_v49  ;;  %v3094_v6 = vsel %vm1326_vm6, %v3062_v2, %v4204_v34 }
 0x45c   : > { %v3077_v22 = vsel %vm1293_vm5, %v3045_v8, %v4163_v17  ;;  %v3093_v40 = vsel %vm1326_vm6, %v3061_v42, %v4203_v23  ;;  %v4349_v10 = vunpack.i.h.bf16 %v7964_v33  ;;  %v4348_v46 = vunpack.i.l.bf16 %v7964_v33  ;;  %v9286_v8 = vld [vmem:[#allocation97_spill] sm:$0xff] }
 0x45d   : > { %4636 = vrot.lane.b32.xlu1 %v7448_v16, %s4771_s7  ;;  %4651 = vrot.lane.b32.xlu0 %v9274_v12, %s4773_s9  ;;  %v4164_v16 = vunpack.i.h.bf16 %v9275_v24  ;;  %v3109_v58 = vsel %vm1326_vm6, %v3077_v22, %v4343_v29  ;;  %v3125_v11 = vsel %vm1359_vm7, %v3093_v40, %v4353_v5  ;;  %v3126_v32 = vsel %vm1359_vm7, %v3094_v6, %v4354_v51 }
 0x45e   : > { %3864 = vmatpush3.bf16.xpose.msk.msra.mxu1 %vm7855_vm14, %v3862_v52  ;;  %v4364_v43 = vunpack.i.h.bf16 %v7966_v41  ;;  %v4363_v56 = vunpack.i.l.bf16 %v7966_v41  ;;  %v3141_v36 = vsel %vm1359_vm7, %v3109_v58, %v4348_v46  ;;  %v9283_v41 = vld [vmem:[#allocation56_spill] sm:$0xff]  ;;  %v4168_v42 = vunpack.i.l.bf16 %v9286_v8 }
 0x45f   : > { %v4357_v7 = vpop.permute.xlu1 %4356  ;;  %v4372_v14 = vpop.permute.xlu0 %4371  ;;  %v3078_v18 = vsel %vm1293_vm5, %v3046_v31, %v4164_v16  ;;  %v9285_v49 = vpack.i.bf16 %v9283_v41, %v9284_v28  ;;  %v4169_v31 = vunpack.i.h.bf16 %v9286_v8  ;;  %v9291_v28 = vld [vmem:[#allocation118_spill] sm:$0xff] }
 0x460   : > { %v3110_v48 = vsel %vm1326_vm6, %v3078_v18, %v4344_v30  ;;  %v4359_v3 = vunpack.i.h.bf16 %v4357_v7  ;;  %v4358_v27 = vunpack.i.l.bf16 %v4357_v7  ;;  %v4374_v50 = vunpack.i.h.bf16 %v4372_v14  ;;  %v9287_v18 = vld [vmem:[#allocation31_spill] sm:$0xff] }
 0x461   : > { %4646 = vrot.lane.b32.xlu1 %v9277_v44, %s4772_s8  ;;  %4661 = vrot.lane.b32.xlu0 %v9280_v54, %s4770_s6  ;;  %v4373_v1 = vunpack.i.l.bf16 %v4372_v14  ;;  %v3142_v15 = vsel %vm1359_vm7, %v3110_v48, %v4349_v10  ;;  %v3157_v24 = vsel %vm1392_vm8, %v3125_v11, %v4363_v56  ;;  %v3158_v16 = vsel %vm1392_vm8, %v3126_v32, %v4364_v43  ;;  %v9288_v10 = vld [vmem:[#allocation37_spill] sm:$0xff] }
 0x462   : > { %v3173_v17 = vsel %vm1392_vm8, %v3141_v36, %v4358_v27  ;;  %v3174_v7 = vsel %vm1392_vm8, %v3142_v15, %v4359_v3  ;;  %v3190_v13 = vsel %vm1425_vm9, %v3158_v16, %v4374_v50  ;;  %v3015_v46 = vsel %vm1227_vm3, %v9288_v10, %v4008_v35  ;;  %v9289_v27 = vld [vmem:[#allocation124_spill] sm:$0xff] }
 0x463   : > { %v4367_v4 = vpop.permute.xlu1 %4366  ;;  %v4382_v59 = vpop.permute.xlu0 %4381  ;;  %v3189_v14 = vsel %vm1425_vm9, %v3157_v24, %v4373_v1  ;;  %v3968_v50 = vunpack.i.l.bf16 %v9289_v27  ;;  %v9292_v24 = vld [vmem:[#allocation119_spill] sm:$0xff] }
 0x464   : > { %v4369_v0 = vunpack.i.h.bf16 %v4367_v4  ;;  %v4368_v52 = vunpack.i.l.bf16 %v4367_v4  ;;  %v4384_v60 = vunpack.i.h.bf16 %v4382_v59  ;;  %v4383_v19 = vunpack.i.l.bf16 %v4382_v59 }
 0x465   : > { %4656 = vrot.lane.b32.xlu1 %v9282_v62, %s4773_s9  ;;  %v3016_v4 = vsel %vm1227_vm3, %v9287_v18, %v4009_v61  ;;  %v3047_v62 = vsel %vm1260_vm4, %v3015_v46, %v4088_v26  ;;  %v3969_v26 = vunpack.i.h.bf16 %v9289_v27  ;;  %v2999_v16 = vsel %vm1227_vm3, %v9292_v24, %v3968_v50  ;;  %v9298_v24 = vld [vmem:[#allocation87_spill] sm:$0xff] }
 0x466   : > { %v3205_v39 = vsel %vm1425_vm9, %v3173_v17, %v4368_v52  ;;  %v3206_v9 = vsel %vm1425_vm9, %v3174_v7, %v4369_v0  ;;  %v3221_v30 = vsel %vm1458_vm10, %v3189_v14, %v4383_v19  ;;  %v3222_v29 = vsel %vm1458_vm10, %v3190_v13, %v4384_v60  ;;  %v9290_v52 = vld [vmem:[#allocation95_spill] sm:$0xff]  ;;  %v9293_v14 = vld [vmem:[#allocation41_spill] sm:$0xff] }
 0x467   : > { %v4377_v33 = vpop.permute.xlu1 %4376  ;;  %v4392_v57 = vpop.permute.xlu0 %4391  ;;  %v3048_v32 = vsel %vm1260_vm4, %v3016_v4, %v4089_v45  ;;  %v3079_v61 = vsel %vm1293_vm5, %v3047_v62, %v4168_v42  ;;  %v4048_v7 = vunpack.i.l.bf16 %v9290_v52  ;;  %v4129_v13 = vunpack.i.h.bf16 %v9293_v14 }
 0x468   : > { %v4379_v20 = vunpack.i.h.bf16 %v4377_v33  ;;  %v4378_v12 = vunpack.i.l.bf16 %v4377_v33  ;;  %v4394_v37 = vunpack.i.h.bf16 %v4392_v57  ;;  %v4393_v25 = vunpack.i.l.bf16 %v4392_v57 }
 0x469   : > { %4666 = vrot.lane.b32.xlu1 %v9285_v49, %s4770_s6  ;;  %v3080_v53 = vsel %vm1293_vm5, %v3048_v32, %v4169_v31  ;;  %v4049_v33 = vunpack.i.h.bf16 %v9290_v52  ;;  %v3000_v49 = vsel %vm1227_vm3, %v9291_v28, %v3969_v26  ;;  %s163_s6 = scalar_lea.vmem [#allocation2], %s3642_s4 }
 0x46a   : > { %v3237_v44 = vsel %vm1458_vm10, %v3205_v39, %v4378_v12  ;;  %v3238_v47 = vsel %vm1458_vm10, %v3206_v9, %v4379_v20  ;;  %v3349_v21 = vsel %vm1496_vm11, %v3221_v30, %v4393_v25  ;;  %v3350_v54 = vsel %vm1496_vm11, %v3222_v29, %v4394_v37  ;;  %s3579_s7 = sshll.u32 %s163_s6, 4  ;;  %s8394_s7 = int_to_ptr.vmem [resolvable:$true] %s3579_s7 }
 0x46b   : > { %v4387_v34 = vpop.permute.xlu1 %4386  ;;  %v4402_v23 = vpop.permute.xlu0 %4401  ;;  %v3868_v58 = vpack.c.bf16 %v3350_v54, %v3349_v21  ;;  %v3032_v17 = vsel %vm1260_vm4, %v3000_v49, %v4049_v33  ;;  %v4128_v39 = vunpack.i.l.bf16 %v9293_v14  ;;  %v9296_v33 = vld [vmem:[#allocation144_spill] sm:$0xff]  ;;  %v9300_v14 = vld [vmem:[#allocation123_spill] sm:$0xff]  ;;  %s4702_s19 = scalar_lea.vmem %s8394_s7, 128  ;;  %p4709_p0 = scmp.lt.s32.totalorder %s8394_s7, %s4707_s20 }
 0x46c   : > { %v4389_v51 = vunpack.i.h.bf16 %v4387_v34  ;;  %v4388_v5 = vunpack.i.l.bf16 %v4387_v34  ;;  %v4404_v3 = vunpack.i.h.bf16 %v4402_v23  ;;  %v4403_v63 = vunpack.i.l.bf16 %v4402_v23  ;;  %p4703_p11 = scmp.ne.s32.totalorder %s8394_s7, %s4702_s19  ;;  %p4710_p1 = scmp.lt.s32.totalorder %s4708_s24, %s4702_s19 }
 0x46d   : > { %v3064_v46 = vsel %vm1293_vm5, %v3032_v17, %v4129_v13  ;;  %v9299_v17 = vld [vmem:[#allocation88_spill] sm:$0xff] }
 0x46e   : > { %v3365_v2 = vsel %vm1496_vm11, %v3237_v44, %v4388_v5  ;;  %v3366_v22 = vsel %vm1496_vm11, %v3238_v47, %v4389_v51  ;;  %v9294_v5 = vld [vmem:[#allocation15_spill] sm:$0xff]  ;;  %p4704_p12 = pnand %p4703_p11, %p4834_p5  ;;  %p4711_p2 = por %p4710_p1, %p4709_p0 }
 0x46f   : > { %v3865_v59 = vpack.c.bf16 %v3366_v22, %v3365_v2  ;;  %v4397_v40 = vpop.permute.xlu1 %4396  ;;  %v4412_v6 = vpop.permute.xlu0 %4411  ;;  %v4209_v44 = vunpack.i.h.bf16 %v9294_v5  ;;  %v4208_v47 = vunpack.i.l.bf16 %v9294_v5  ;;  %v3031_v22 = vsel %vm1260_vm4, %v2999_v16, %v4048_v7 }
 0x470   : > { %v4399_v48 = vunpack.i.h.bf16 %v4397_v40  ;;  %v4398_v11 = vunpack.i.l.bf16 %v4397_v40  ;;  %v4414_v57 = vunpack.i.h.bf16 %v4412_v6  ;;  %v4413_v36 = vunpack.i.l.bf16 %v4412_v6  ;;  %p4705_p13 = pneg %p4704_p12 }
 0x471   : > { %3867 = vmatprep.subr.msk.bf16.mxu1 %vm7855_vm14, %v3865_v59  ;;  %v3063_v10 = vsel %vm1293_vm5, %v3031_v22, %v4128_v39  ;;  %v9301_v39 = vld [vmem:[#allocation141_spill] sm:$0xff] }
 0x472   : > { %3870 = vmatpush3.bf16.xpose.msk.msra.mxu1 %vm7855_vm14, %v3868_v58  ;;  %v3112_v35 = vsel %vm1326_vm6, %v3080_v53, %v4399_v48  ;;  %v3111_v43 = vsel %vm1326_vm6, %v3079_v61, %v4398_v11  ;;  %v3096_v11 = vsel %vm1326_vm6, %v3064_v46, %v4209_v44  ;;  %v3095_v32 = vsel %vm1326_vm6, %v3063_v10, %v4208_v47  ;;  %v9304_v44 = vld [vmem:[#allocation13_spill] sm:$0xff]  ;;  %p4712_p3 = pnand %p4711_p2, %p4705_p13 }
 0x473   : > { %v4407_v56 = vpop.permute.xlu1 %4406  ;;  %v4422_v45 = vpop.permute.xlu0 %4421  ;;  %v3143_v1 = vsel %vm1359_vm7, %v3111_v43, %v4403_v63  ;;  %v3144_v0 = vsel %vm1359_vm7, %v3112_v35, %v4404_v3  ;;  %v9295_v43 = vld [vmem:[#allocation170_spill] sm:$0xff]  ;;  %v4134_v47 = vunpack.i.h.bf16 %v9304_v44 }
 0x474   : > { %v4424_v19 = vunpack.i.h.bf16 %v4422_v45  ;;  %v4423_v20 = vunpack.i.l.bf16 %v4422_v45  ;;  %v3175_v12 = vsel %vm1392_vm8, %v3143_v1, %v4413_v36  ;;  %v3176_v37 = vsel %vm1392_vm8, %v3144_v0, %v4414_v57 }
 0x475   : > { %v4409_v8 = vunpack.i.h.bf16 %v4407_v56  ;;  %v4408_v31 = vunpack.i.l.bf16 %v4407_v56  ;;  %v3974_v56 = vunpack.i.h.bf16 %v9295_v43  ;;  %v3973_v45 = vunpack.i.l.bf16 %v9295_v43 }
 0x476   : > { %v3207_v23 = vsel %vm1425_vm9, %v3175_v12, %v4423_v20  ;;  %v3208_v30 = vsel %vm1425_vm9, %v3176_v37, %v4424_v19  ;;  %v4014_v57 = vunpack.i.h.bf16 %v9296_v33  ;;  %v4013_v36 = vunpack.i.l.bf16 %v9296_v33 }
 0x477   : > { %v4417_v15 = vpop.permute.xlu1 %4416  ;;  %v4432_v60 = vpop.permute.xlu0 %4431  ;;  %v3127_v53 = vsel %vm1359_vm7, %v3095_v32, %v4408_v31  ;;  %v3128_v35 = vsel %vm1359_vm7, %v3096_v11, %v4409_v8  ;;  %v3002_v16 = vsel %vm1227_vm3, %v9298_v24, %v3974_v56  ;;  %v3001_v7 = vsel %vm1227_vm3, %v9299_v17, %v3973_v45 }
 0x478   : > { %v4434_v25 = vunpack.i.h.bf16 %v4432_v60  ;;  %v4433_v41 = vunpack.i.l.bf16 %v4432_v60  ;;  %v4419_v18 = vunpack.i.h.bf16 %v4417_v15  ;;  %v4418_v4 = vunpack.i.l.bf16 %v4417_v15 }
 0x479   : > { %v3018_v13 = vsel %vm1227_vm3, %v9300_v14, %v4014_v57 }
 0x47a   : > { %v3239_v21 = vsel %vm1458_vm10, %v3207_v23, %v4433_v41  ;;  %v3240_v54 = vsel %vm1458_vm10, %v3208_v30, %v4434_v25  ;;  %v3159_v3 = vsel %vm1392_vm8, %v3127_v53, %v4418_v4  ;;  %v3160_v63 = vsel %vm1392_vm8, %v3128_v35, %v4419_v18  ;;  %v9297_v41 = vld [vmem:[#allocation22_spill] sm:$0xff] }
 0x47b   : > { %v4427_v9 = vpop.permute.xlu1 %4426  ;;  %v4442_v34 = vpop.permute.xlu0 %4441  ;;  %v4054_v28 = vunpack.i.h.bf16 %v9297_v41  ;;  %v4053_v49 = vunpack.i.l.bf16 %v9297_v41  ;;  %v9306_v4 = vld [vmem:[#allocation14_spill] sm:$0xff] }
 0x47c   : > { %v4444_v29 = vunpack.i.h.bf16 %v4442_v34  ;;  %v4443_v51 = vunpack.i.l.bf16 %v4442_v34  ;;  %v4429_v58 = vunpack.i.h.bf16 %v4427_v9  ;;  %v4428_v48 = vunpack.i.l.bf16 %v4427_v9  ;;  %v9302_v34 = vld [vmem:[#allocation94_spill] sm:$0xff] }
 0x47d   : > { %v3017_v9 = vsel %vm1227_vm3, %v9301_v39, %v4013_v36  ;;  %v4019_v23 = vunpack.i.h.bf16 %v9302_v34  ;;  %v4018_v30 = vunpack.i.l.bf16 %v9302_v34  ;;  %v3033_v22 = vsel %vm1260_vm4, %v3001_v7, %v4053_v49 }
 0x47e   : > { %v3367_v42 = vsel %vm1496_vm11, %v3239_v21, %v4443_v51  ;;  %v3368_v2 = vsel %vm1496_vm11, %v3240_v54, %v4444_v29  ;;  %v3191_v50 = vsel %vm1425_vm9, %v3159_v3, %v4428_v48  ;;  %v3192_v1 = vsel %vm1425_vm9, %v3160_v63, %v4429_v58  ;;  %v9303_v29 = vld [vmem:[#allocation125_spill] sm:$0xff]  ;;  %v9305_v54 = vld [vmem:[#allocation96_spill] sm:$0xff] }
 0x47f   : > { %v3871_v59 = vpack.c.bf16 %v3368_v2, %v3367_v42  ;;  %v4437_v40 = vpop.permute.xlu1 %4436  ;;  %v8103_v6 = vpop.permute.xlu0 %4451  ;;  %v4094_v51 = vunpack.i.h.bf16 %v9303_v29  ;;  %v4093_v5 = vunpack.i.l.bf16 %v9303_v29  ;;  %v4133_v21 = vunpack.i.l.bf16 %v9304_v44 }
 0x480   : > { %v4439_v62 = vunpack.i.h.bf16 %v4437_v40  ;;  %v4438_v61 = vunpack.i.l.bf16 %v4437_v40  ;;  %v4174_v8 = vunpack.i.h.bf16 %v9305_v54  ;;  %v4173_v31 = vunpack.i.l.bf16 %v9305_v54 }
 0x481   : > { %3873 = vmatprep.subr.msk.bf16.mxu1 %vm7855_vm14, %v3871_v59  ;;  %v3034_v18 = vsel %vm1260_vm4, %v3002_v16, %v4054_v28  ;;  %v4214_v59 = vunpack.i.h.bf16 %v9306_v4  ;;  %v4213_v40 = vunpack.i.l.bf16 %v9306_v4  ;;  %v4454_v10 = vunpack.i.h.bf16 %v8103_v6 }
 0x482   : > { %v3223_v15 = vsel %vm1458_vm10, %v3191_v50, %v4438_v61  ;;  %v3224_v60 = vsel %vm1458_vm10, %v3192_v1, %v4439_v62  ;;  %v4453_v46 = vunpack.i.l.bf16 %v8103_v6  ;;  %v3049_v11 = vsel %vm1260_vm4, %v3017_v9, %v4093_v5  ;;  %v9307_v62 = vld [vmem:[#allocation146_spill] sm:$0xff] }
 0x483   : > { %v4447_v27 = vpop.permute.xlu1 %4446  ;;  %v4462_v26 = vpop.permute.xlu0 %4461  ;;  %v3050_v32 = vsel %vm1260_vm4, %v3018_v13, %v4094_v51  ;;  %v4099_v61 = vunpack.i.h.bf16 %v9307_v62  ;;  %v4098_v53 = vunpack.i.l.bf16 %v9307_v62  ;;  %v3065_v35 = vsel %vm1293_vm5, %v3033_v22, %v4133_v21 }
 0x484   : > { %v4449_v0 = vunpack.i.h.bf16 %v4447_v27  ;;  %v4448_v52 = vunpack.i.l.bf16 %v4447_v27  ;;  %v4464_v58 = vunpack.i.h.bf16 %v4462_v26  ;;  %v4463_v48 = vunpack.i.l.bf16 %v4462_v26 }
 0x485   : > { %v3066_v43 = vsel %vm1293_vm5, %v3034_v18, %v4134_v47  ;;  %v3081_v56 = vsel %vm1293_vm5, %v3049_v11, %v4173_v31  ;;  %v3082_v45 = vsel %vm1293_vm5, %v3050_v32, %v4174_v8  ;;  %v3097_v63 = vsel %vm1326_vm6, %v3065_v35, %v4213_v40  ;;  %v9309_v32 = vld [vmem:[#allocation63_spill] sm:$0xff] }
 0x486   : > { %v3351_v19 = vsel %vm1496_vm11, %v3223_v15, %v4448_v52  ;;  %v3352_v20 = vsel %vm1496_vm11, %v3224_v60, %v4449_v0  ;;  %v3098_v27 = vsel %vm1326_vm6, %v3066_v43, %v4214_v59  ;;  %v3113_v1 = vsel %vm1326_vm6, %v3081_v56, %v4453_v46 }
 0x487   : > { %v3874_v12 = vpack.c.bf16 %v3352_v20, %v3351_v19  ;;  %v4457_v37 = vpop.permute.xlu1 %4456  ;;  %v8125_v25 = vpop.permute.xlu0 %4471  ;;  %v3114_v0 = vsel %vm1326_vm6, %v3082_v45, %v4454_v10  ;;  %v3129_v52 = vsel %vm1359_vm7, %v3097_v63, %v4463_v48  ;;  %v3130_v33 = vsel %vm1359_vm7, %v3098_v27, %v4464_v58  ;;  %v9308_v10 = vld [vmem:[#allocation126_spill] sm:$0xff] }
 0x488   : > { %v4459_v26 = vunpack.i.h.bf16 %v4457_v37  ;;  %v4458_v50 = vunpack.i.l.bf16 %v4457_v37  ;;  %v4474_v57 = vunpack.i.h.bf16 %v8125_v25  ;;  %v4473_v36 = vunpack.i.l.bf16 %v8125_v25 }
 0x489   : > { %3876 = vmatpush3.bf16.xpose.msk.msra.mxu1 %vm7855_vm14, %v3874_v12  ;;  %v4179_v46 = vunpack.i.h.bf16 %v9308_v10  ;;  %v4178_v58 = vunpack.i.l.bf16 %v9308_v10  ;;  %v3020_v35 = vsel %vm1227_vm3, %v9309_v32, %v4019_v23 }
 0x48a   : > { %v3145_v49 = vsel %vm1359_vm7, %v3113_v1, %v4458_v50  ;;  %v3146_v24 = vsel %vm1359_vm7, %v3114_v0, %v4459_v26  ;;  %v3161_v25 = vsel %vm1392_vm8, %v3129_v52, %v4473_v36  ;;  %v3162_v9 = vsel %vm1392_vm8, %v3130_v33, %v4474_v57  ;;  %v9311_v57 = vld [vmem:[#allocation171_spill] sm:$0xff] }
 0x48b   : > { %v4467_v42 = vpop.permute.xlu1 %4466  ;;  %v4482_v2 = vpop.permute.xlu0 %4481  ;;  %v3052_v50 = vsel %vm1260_vm4, %v3020_v35, %v4099_v61  ;;  %v3978_v36 = vunpack.i.l.bf16 %v9311_v57 }
 0x48c   : > { %v4469_v15 = vunpack.i.h.bf16 %v4467_v42  ;;  %v4468_v60 = vunpack.i.l.bf16 %v4467_v42  ;;  %v4484_v19 = vunpack.i.h.bf16 %v4482_v2  ;;  %v4483_v20 = vunpack.i.l.bf16 %v4482_v2 }
 0x48d   : > { %v3084_v34 = vsel %vm1293_vm5, %v3052_v50, %v4179_v46 }
 0x48e   : > { %v3177_v29 = vsel %vm1392_vm8, %v3145_v49, %v4468_v60  ;;  %v3178_v51 = vsel %vm1392_vm8, %v3146_v24, %v4469_v15  ;;  %v3193_v5 = vsel %vm1425_vm9, %v3161_v25, %v4483_v20  ;;  %v3194_v44 = vsel %vm1425_vm9, %v3162_v9, %v4484_v19  ;;  %v9312_v19 = vld [vmem:[#allocation23_spill] sm:$0xff]  ;;  %v9314_v25 = vld [vmem:[#allocation61_spill] sm:$0xff] }
 0x48f   : > { %v4477_v3 = vpop.permute.xlu1 %4476  ;;  %v4492_v6 = vpop.permute.xlu0 %4491  ;;  %v4059_v20 = vunpack.i.h.bf16 %v9312_v19  ;;  %v3003_v9 = vsel %vm1227_vm3, %v9314_v25, %v3978_v36  ;;  %v9320_v25 = vld [vmem:[#allocation89_spill] sm:$0xff] }
 0x490   : > { %v4479_v12 = vunpack.i.h.bf16 %v4477_v3  ;;  %v4478_v41 = vunpack.i.l.bf16 %v4477_v3  ;;  %v4494_v16 = vunpack.i.h.bf16 %v4492_v6  ;;  %v4493_v17 = vunpack.i.l.bf16 %v4492_v6  ;;  %v9310_v3 = vld [vmem:[#allocation142_spill] sm:$0xff] }
 0x491   : > { %v3019_v6 = vsel %vm1227_vm3, %v9310_v3, %v4018_v30 }
 0x492   : > { %v3209_v47 = vsel %vm1425_vm9, %v3177_v29, %v4478_v41  ;;  %v3210_v21 = vsel %vm1425_vm9, %v3178_v51, %v4479_v12  ;;  %v3225_v31 = vsel %vm1458_vm10, %v3193_v5, %v4493_v17  ;;  %v3226_v42 = vsel %vm1458_vm10, %v3194_v44, %v4494_v16  ;;  %v9315_v5 = vld [vmem:[#allocation45_spill] sm:$0xff] }
 0x493   : > { %v4487_v28 = vpop.permute.xlu1 %4486  ;;  %v4502_v37 = vpop.permute.xlu0 %4501  ;;  %v3051_v1 = vsel %vm1260_vm4, %v3019_v6, %v4098_v53  ;;  %v3979_v53 = vunpack.i.h.bf16 %v9311_v57  ;;  %v4058_v51 = vunpack.i.l.bf16 %v9312_v19  ;;  %v4139_v44 = vunpack.i.h.bf16 %v9315_v5 }
 0x494   : > { %v4489_v7 = vunpack.i.h.bf16 %v4487_v28  ;;  %v4488_v14 = vunpack.i.l.bf16 %v4487_v28  ;;  %v4504_v13 = vunpack.i.h.bf16 %v4502_v37  ;;  %v4503_v39 = vunpack.i.l.bf16 %v4502_v37 }
 0x495   : > { %v3083_v23 = vsel %vm1293_vm5, %v3051_v1, %v4178_v58 }
 0x496   : > { %v3241_v18 = vsel %vm1458_vm10, %v3209_v47, %v4488_v14  ;;  %v3242_v4 = vsel %vm1458_vm10, %v3210_v21, %v4489_v7  ;;  %v3353_v59 = vsel %vm1496_vm11, %v3225_v31, %v4503_v39  ;;  %v3354_v40 = vsel %vm1496_vm11, %v3226_v42, %v4504_v13  ;;  %v9313_v13 = vld [vmem:[#allocation121_spill] sm:$0xff] }
 0x497   : > { %v4497_v54 = vpop.permute.xlu1 %4496  ;;  %v4512_v8 = vpop.permute.xlu0 %4511  ;;  %v3880_v63 = vpack.c.bf16 %v3354_v40, %v3353_v59  ;;  %v3004_v39 = vsel %vm1227_vm3, %v9313_v13, %v3979_v53  ;;  %v4138_v47 = vunpack.i.l.bf16 %v9315_v5  ;;  %v9322_v5 = vld [vmem:[#allocation92_spill] sm:$0xff] }
 0x498   : > { %v4499_v2 = vunpack.i.h.bf16 %v4497_v54  ;;  %v4498_v22 = vunpack.i.l.bf16 %v4497_v54  ;;  %v4514_v33 = vunpack.i.h.bf16 %v4512_v8  ;;  %v4513_v62 = vunpack.i.l.bf16 %v4512_v8 }
 0x499   : > { %v3036_v29 = vsel %vm1260_vm4, %v3004_v39, %v4059_v20  ;;  %v9318_v20 = vld [vmem:[#allocation10_spill] sm:$0xff] }
 0x49a   : > { %v3369_v48 = vsel %vm1496_vm11, %v3241_v18, %v4498_v22  ;;  %v3370_v11 = vsel %vm1496_vm11, %v3242_v4, %v4499_v2  ;;  %v9316_v22 = vld [vmem:[#allocation25_spill] sm:$0xff]  ;;  %v3068_v6 = vsel %vm1293_vm5, %v3036_v29, %v4139_v44  ;;  %v9321_v29 = vld [vmem:[#allocation30_spill] sm:$0xff] }
 0x49b   : > { %v3877_v43 = vpack.c.bf16 %v3370_v11, %v3369_v48  ;;  %v4507_v56 = vpop.permute.xlu1 %4506  ;;  %v4522_v45 = vpop.permute.xlu0 %4521  ;;  %v4219_v18 = vunpack.i.h.bf16 %v9316_v22  ;;  %v4218_v4 = vunpack.i.l.bf16 %v9316_v22  ;;  %v3035_v11 = vsel %vm1260_vm4, %v3003_v9, %v4058_v51 }
 0x49c   : > { %v4509_v27 = vunpack.i.h.bf16 %v4507_v56  ;;  %v4508_v26 = vunpack.i.l.bf16 %v4507_v56  ;;  %v4524_v12 = vunpack.i.h.bf16 %v4522_v45  ;;  %v4523_v41 = vunpack.i.l.bf16 %v4522_v45 }
 0x49d   : > { %3879 = vmatprep.subr.msk.bf16.mxu1 %vm7855_vm14, %v3877_v43  ;;  %v3067_v3 = vsel %vm1293_vm5, %v3035_v11, %v4138_v47  ;;  %v9323_v47 = vld [vmem:[#allocation9_spill] sm:$0xff] }
 0x49e   : > { %3882 = vmatpush3.bf16.xpose.msk.msra.mxu1 %vm7855_vm14, %v3880_v63  ;;  %v3116_v30 = vsel %vm1326_vm6, %v3084_v34, %v4509_v27  ;;  %v3115_v0 = vsel %vm1326_vm6, %v3083_v23, %v4508_v26  ;;  %v3100_v26 = vsel %vm1326_vm6, %v3068_v6, %v4219_v18  ;;  %v3099_v50 = vsel %vm1326_vm6, %v3067_v3, %v4218_v4  ;;  %v9326_v18 = vld [vmem:[#allocation163_spill] sm:$0xff] }
 0x49f   : > { %v4517_v52 = vpop.permute.xlu1 %4516  ;;  %v4532_v61 = vpop.permute.xlu0 %4531  ;;  %v3147_v15 = vsel %vm1359_vm7, %v3115_v0, %v4513_v62  ;;  %v3148_v60 = vsel %vm1359_vm7, %v3116_v30, %v4514_v33  ;;  %v9317_v0 = vld [vmem:[#allocation143_spill] sm:$0xff]  ;;  %v4144_v4 = vunpack.i.h.bf16 %v9326_v18 }
 0x4a0   : > { %v4534_v49 = vunpack.i.h.bf16 %v4532_v61  ;;  %v4533_v24 = vunpack.i.l.bf16 %v4532_v61  ;;  %v3179_v16 = vsel %vm1392_vm8, %v3147_v15, %v4523_v41  ;;  %v3180_v17 = vsel %vm1392_vm8, %v3148_v60, %v4524_v12 }
 0x4a1   : > { %v4519_v10 = vunpack.i.h.bf16 %v4517_v52  ;;  %v4518_v46 = vunpack.i.l.bf16 %v4517_v52  ;;  %v3984_v52 = vunpack.i.h.bf16 %v9317_v0  ;;  %v3983_v61 = vunpack.i.l.bf16 %v9317_v0 }
 0x4a2   : > { %v3211_v8 = vsel %vm1425_vm9, %v3179_v16, %v4533_v24  ;;  %v3212_v31 = vsel %vm1425_vm9, %v3180_v17, %v4534_v49  ;;  %v4024_v12 = vunpack.i.h.bf16 %v9318_v20  ;;  %v4023_v41 = vunpack.i.l.bf16 %v9318_v20 }
 0x4a3   : > { %v4527_v28 = vpop.permute.xlu1 %4526  ;;  %v4542_v37 = vpop.permute.xlu0 %4541  ;;  %v3131_v34 = vsel %vm1359_vm7, %v3099_v50, %v4518_v46  ;;  %v3132_v30 = vsel %vm1359_vm7, %v3100_v26, %v4519_v10  ;;  %v3006_v9 = vsel %vm1227_vm3, %v9320_v25, %v3984_v52  ;;  %v3005_v51 = vsel %vm1227_vm3, %v9321_v29, %v3983_v61 }
 0x4a4   : > { %v4544_v7 = vunpack.i.h.bf16 %v4542_v37  ;;  %v4543_v14 = vunpack.i.l.bf16 %v4542_v37  ;;  %v4529_v32 = vunpack.i.h.bf16 %v4527_v28  ;;  %v4528_v35 = vunpack.i.l.bf16 %v4527_v28 }
 0x4a5   : > { %v3022_v44 = vsel %vm1227_vm3, %v9322_v5, %v4024_v12 }
 0x4a6   : > { %v3243_v59 = vsel %vm1458_vm10, %v3211_v8, %v4543_v14  ;;  %v3244_v40 = vsel %vm1458_vm10, %v3212_v31, %v4544_v7  ;;  %v3163_v33 = vsel %vm1392_vm8, %v3131_v34, %v4528_v35  ;;  %v3164_v62 = vsel %vm1392_vm8, %v3132_v30, %v4529_v32  ;;  %v9319_v14 = vld [vmem:[#allocation33_spill] sm:$0xff]  ;;  %v9328_v35 = vld [vmem:[#allocation24_spill] sm:$0xff] }
 0x4a7   : > { %v4537_v21 = vpop.permute.xlu1 %4536  ;;  %v4552_v54 = vpop.permute.xlu0 %4551  ;;  %v4064_v13 = vunpack.i.h.bf16 %v9319_v14  ;;  %v4063_v39 = vunpack.i.l.bf16 %v9319_v14 }
 0x4a8   : > { %v4554_v42 = vunpack.i.h.bf16 %v4552_v54  ;;  %v4553_v2 = vunpack.i.l.bf16 %v4552_v54  ;;  %v4539_v63 = vunpack.i.h.bf16 %v4537_v21  ;;  %v4538_v27 = vunpack.i.l.bf16 %v4537_v21  ;;  %v9324_v54 = vld [vmem:[#allocation11_spill] sm:$0xff] }
 0x4a9   : > { %v3021_v21 = vsel %vm1227_vm3, %v9323_v47, %v4023_v41  ;;  %v4029_v8 = vunpack.i.h.bf16 %v9324_v54  ;;  %v4028_v31 = vunpack.i.l.bf16 %v9324_v54  ;;  %v3037_v11 = vsel %vm1260_vm4, %v3005_v51, %v4063_v39 }
 0x4aa   : > { %v3371_v58 = vsel %vm1496_vm11, %v3243_v59, %v4553_v2  ;;  %v3372_v48 = vsel %vm1496_vm11, %v3244_v40, %v4554_v42  ;;  %v3195_v36 = vsel %vm1425_vm9, %v3163_v33, %v4538_v27  ;;  %v3196_v15 = vsel %vm1425_vm9, %v3164_v62, %v4539_v63  ;;  %v9325_v42 = vld [vmem:[#allocation43_spill] sm:$0xff]  ;;  %v9327_v40 = vld [vmem:[#allocation34_spill] sm:$0xff] }
 0x4ab   : > { %v3883_v43 = vpack.c.bf16 %v3372_v48, %v3371_v58  ;;  %v4547_v56 = vpop.permute.xlu1 %4546  ;;  %v8235_v45 = vpop.permute.xlu0 %4561  ;;  %v4104_v2 = vunpack.i.h.bf16 %v9325_v42  ;;  %v4103_v22 = vunpack.i.l.bf16 %v9325_v42  ;;  %v4143_v59 = vunpack.i.l.bf16 %v9326_v18 }
 0x4ac   : > { %v4549_v1 = vunpack.i.h.bf16 %v4547_v56  ;;  %v4548_v23 = vunpack.i.l.bf16 %v4547_v56  ;;  %v4184_v10 = vunpack.i.h.bf16 %v9327_v40  ;;  %v4183_v46 = vunpack.i.l.bf16 %v9327_v40 }
 0x4ad   : > { %3885 = vmatprep.subr.msk.bf16.mxu1 %vm7855_vm14, %v3883_v43  ;;  %v3038_v32 = vsel %vm1260_vm4, %v3006_v9, %v4064_v13  ;;  %v4224_v43 = vunpack.i.h.bf16 %v9328_v35  ;;  %v4223_v56 = vunpack.i.l.bf16 %v9328_v35  ;;  %v4564_v3 = vunpack.i.h.bf16 %v8235_v45 }
 0x4ae   : > { %v3227_v28 = vsel %vm1458_vm10, %v3195_v36, %v4548_v23  ;;  %v3228_v37 = vsel %vm1458_vm10, %v3196_v15, %v4549_v1  ;;  %v4563_v6 = vunpack.i.l.bf16 %v8235_v45  ;;  %v3053_v26 = vsel %vm1260_vm4, %v3021_v21, %v4103_v22  ;;  %v9329_v1 = vld [vmem:[#allocation12_spill] sm:$0xff] }
 0x4af   : > { %v4557_v57 = vpop.permute.xlu1 %4556  ;;  %v4572_v53 = vpop.permute.xlu0 %4571  ;;  %v3054_v50 = vsel %vm1260_vm4, %v3022_v44, %v4104_v2  ;;  %v4109_v23 = vunpack.i.h.bf16 %v9329_v1  ;;  %v4108_v34 = vunpack.i.l.bf16 %v9329_v1  ;;  %v3069_v30 = vsel %vm1293_vm5, %v3037_v11, %v4143_v59 }
 0x4b0   : > { %v4559_v60 = vunpack.i.h.bf16 %v4557_v57  ;;  %v4558_v19 = vunpack.i.l.bf16 %v4557_v57  ;;  %v4574_v63 = vunpack.i.h.bf16 %v4572_v53  ;;  %v4573_v27 = vunpack.i.l.bf16 %v4572_v53 }
 0x4b1   : > { %v3070_v0 = vsel %vm1293_vm5, %v3038_v32, %v4144_v4  ;;  %v3085_v52 = vsel %vm1293_vm5, %v3053_v26, %v4183_v46  ;;  %v3086_v61 = vsel %vm1293_vm5, %v3054_v50, %v4184_v10  ;;  %v3101_v62 = vsel %vm1326_vm6, %v3069_v30, %v4223_v56  ;;  %v9331_v50 = vld [vmem:[#allocation32_spill] sm:$0xff] }
 0x4b2   : > { %v3355_v49 = vsel %vm1496_vm11, %v3227_v28, %v4558_v19  ;;  %v3356_v24 = vsel %vm1496_vm11, %v3228_v37, %v4559_v60  ;;  %v3102_v57 = vsel %vm1326_vm6, %v3070_v0, %v4224_v43  ;;  %v3117_v15 = vsel %vm1326_vm6, %v3085_v52, %v4563_v6 }
 0x4b3   : > { %v3886_v16 = vpack.c.bf16 %v3356_v24, %v3355_v49  ;;  %v4567_v17 = vpop.permute.xlu1 %4566  ;;  %v8257_v7 = vpop.permute.xlu0 %4581  ;;  %v3118_v60 = vsel %vm1326_vm6, %v3086_v61, %v4564_v3  ;;  %v3133_v19 = vsel %vm1359_vm7, %v3101_v62, %v4573_v27  ;;  %v3134_v20 = vsel %vm1359_vm7, %v3102_v57, %v4574_v63  ;;  %v9330_v3 = vld [vmem:[#allocation147_spill] sm:$0xff] }
 0x4b4   : > { %v4569_v53 = vunpack.i.h.bf16 %v4567_v17  ;;  %v4568_v36 = vunpack.i.l.bf16 %v4567_v17  ;;  %v4584_v12 = vunpack.i.h.bf16 %v8257_v7  ;;  %v4583_v41 = vunpack.i.l.bf16 %v8257_v7 }
 0x4b5   : > { %3888 = vmatpush3.bf16.xpose.msk.msra.mxu1 %vm7855_vm14, %v3886_v16  ;;  %v4189_v6 = vunpack.i.h.bf16 %v9330_v3  ;;  %v4188_v63 = vunpack.i.l.bf16 %v9330_v3  ;;  %v3024_v30 = vsel %vm1227_vm3, %v9331_v50, %v4029_v8 }
 0x4b6   : > { %v3149_v39 = vsel %vm1359_vm7, %v3117_v15, %v4568_v36  ;;  %v3150_v25 = vsel %vm1359_vm7, %v3118_v60, %v4569_v53  ;;  %v3165_v7 = vsel %vm1392_vm8, %v3133_v19, %v4583_v41  ;;  %v3166_v21 = vsel %vm1392_vm8, %v3134_v20, %v4584_v12  ;;  %v9333_v41 = vld [vmem:[#allocation64_spill] sm:$0xff] }
 0x4b7   : > { %v4577_v58 = vpop.permute.xlu1 %4576  ;;  %v4592_v48 = vpop.permute.xlu0 %4591  ;;  %v3056_v15 = vsel %vm1260_vm4, %v3024_v30, %v4109_v23 }
 0x4b8   : > { %v4579_v28 = vunpack.i.h.bf16 %v4577_v58  ;;  %v4578_v37 = vunpack.i.l.bf16 %v4577_v58  ;;  %v4594_v49 = vunpack.i.h.bf16 %v4592_v48  ;;  %v4593_v24 = vunpack.i.l.bf16 %v4592_v48 }
 0x4b9   : > { %v3088_v8 = vsel %vm1293_vm5, %v3056_v15, %v4189_v6 }
 0x4ba   : > { %v3181_v42 = vsel %vm1392_vm8, %v3149_v39, %v4578_v37  ;;  %v3182_v2 = vsel %vm1392_vm8, %v3150_v25, %v4579_v28  ;;  %v3197_v22 = vsel %vm1425_vm9, %v3165_v7, %v4593_v24  ;;  %v3198_v18 = vsel %vm1425_vm9, %v3166_v21, %v4594_v49  ;;  %v9336_v7 = vld [vmem:[#allocation139_spill] sm:$0xff] }
 0x4bb   : > { %v4587_v33 = vpop.permute.xlu1 %4586  ;;  %v4602_v45 = vpop.permute.xlu0 %4601  ;;  %v3989_v28 = vunpack.i.h.bf16 %v9333_v41  ;;  %v3988_v37 = vunpack.i.l.bf16 %v9333_v41 }
 0x4bc   : > { %v4589_v16 = vunpack.i.h.bf16 %v4587_v33  ;;  %v4588_v14 = vunpack.i.l.bf16 %v4587_v33  ;;  %v4604_v9 = vunpack.i.h.bf16 %v4602_v45  ;;  %v4603_v29 = vunpack.i.l.bf16 %v4602_v45  ;;  %v9332_v33 = vld [vmem:[#allocation40_spill] sm:$0xff] }
 0x4bd   : > { %v3023_v45 = vsel %vm1227_vm3, %v9332_v33, %v4028_v31  ;;  %v3007_v21 = vsel %vm1227_vm3, %v9336_v7, %v3988_v37 }
 0x4be   : > { %v3213_v4 = vsel %vm1425_vm9, %v3181_v42, %v4588_v14  ;;  %v3214_v59 = vsel %vm1425_vm9, %v3182_v2, %v4589_v16  ;;  %v3229_v46 = vsel %vm1458_vm10, %v3197_v22, %v4603_v29  ;;  %v3230_v58 = vsel %vm1458_vm10, %v3198_v18, %v4604_v9  ;;  %v9334_v16 = vld [vmem:[#allocation172_spill] sm:$0xff]  ;;  %v9337_v22 = vld [vmem:[#allocation65_spill] sm:$0xff] }
 0x4bf   : > { %v4597_v13 = vpop.permute.xlu1 %4596  ;;  %v4612_v17 = vpop.permute.xlu0 %4611  ;;  %v3055_v36 = vsel %vm1260_vm4, %v3023_v45, %v4108_v34  ;;  %v4069_v14 = vunpack.i.h.bf16 %v9334_v16  ;;  %v4068_v2 = vunpack.i.l.bf16 %v9334_v16  ;;  %v4149_v18 = vunpack.i.h.bf16 %v9337_v22 }
 0x4c0   : > { %v4599_v51 = vunpack.i.h.bf16 %v4597_v13  ;;  %v4598_v5 = vunpack.i.l.bf16 %v4597_v13  ;;  %v4614_v44 = vunpack.i.h.bf16 %v4612_v17  ;;  %v4613_v47 = vunpack.i.l.bf16 %v4612_v17 }
 0x4c1   : > { %v3087_v54 = vsel %vm1293_vm5, %v3055_v36, %v4188_v63 }
 0x4c2   : > { %v3245_v32 = vsel %vm1458_vm10, %v3213_v4, %v4598_v5  ;;  %v3246_v35 = vsel %vm1458_vm10, %v3214_v59, %v4599_v51  ;;  %v3357_v43 = vsel %vm1496_vm11, %v3229_v46, %v4613_v47  ;;  %v3358_v56 = vsel %vm1496_vm11, %v3230_v58, %v4614_v44  ;;  %v9335_v44 = vld [vmem:[#allocation122_spill] sm:$0xff] }
 0x4c3   : > { %v4607_v40 = vpop.permute.xlu1 %4606  ;;  %v4622_v10 = vpop.permute.xlu0 %4621  ;;  %v3892_v62 = vpack.c.bf16 %v3358_v56, %v3357_v43  ;;  %v3008_v47 = vsel %vm1227_vm3, %v9335_v44, %v3989_v28  ;;  %v4148_v4 = vunpack.i.l.bf16 %v9337_v22 }
 0x4c4   : > { %v4609_v48 = vunpack.i.h.bf16 %v4607_v40  ;;  %v4608_v11 = vunpack.i.l.bf16 %v4607_v40  ;;  %v4624_v20 = vunpack.i.h.bf16 %v4622_v10  ;;  %v4623_v1 = vunpack.i.l.bf16 %v4622_v10 }
 0x4c5   : > { %v3040_v42 = vsel %vm1260_vm4, %v3008_v47, %v4069_v14 }
 0x4c6   : > { %v3373_v27 = vsel %vm1496_vm11, %v3245_v32, %v4608_v11  ;;  %v3374_v26 = vsel %vm1496_vm11, %v3246_v35, %v4609_v48  ;;  %v9338_v11 = vld [vmem:[#allocation67_spill] sm:$0xff]  ;;  %v3072_v33 = vsel %vm1293_vm5, %v3040_v42, %v4149_v18 }
 0x4c7   : > { %v3889_v0 = vpack.c.bf16 %v3374_v26, %v3373_v27  ;;  %v4617_v52 = vpop.permute.xlu1 %4616  ;;  %v4632_v61 = vpop.permute.xlu0 %4631  ;;  %v4229_v32 = vunpack.i.h.bf16 %v9338_v11  ;;  %v4228_v35 = vunpack.i.l.bf16 %v9338_v11  ;;  %v3039_v26 = vsel %vm1260_vm4, %v3007_v21, %v4068_v2 }
 0x4c8   : > { %v4619_v57 = vunpack.i.h.bf16 %v4617_v52  ;;  %v4618_v53 = vunpack.i.l.bf16 %v4617_v52  ;;  %v4634_v12 = vunpack.i.h.bf16 %v4632_v61  ;;  %v4633_v23 = vunpack.i.l.bf16 %v4632_v61 }
 0x4c9   : > { %3891 = vmatprep.subr.msk.bf16.mxu1 %vm7855_vm14, %v3889_v0  ;;  %v3071_v61 = vsel %vm1293_vm5, %v3039_v26, %v4148_v4 }
 0x4ca   : > { %3894 = vmatpush3.bf16.xpose.msk.msra.mxu1 %vm7855_vm14, %v3892_v62  ;;  %v3120_v31 = vsel %vm1326_vm6, %v3088_v8, %v4619_v57  ;;  %v3119_v60 = vsel %vm1326_vm6, %v3087_v54, %v4618_v53  ;;  %v3104_v57 = vsel %vm1326_vm6, %v3072_v33, %v4229_v32  ;;  %v3103_v53 = vsel %vm1326_vm6, %v3071_v61, %v4228_v35 }
 0x4cb   : > { %v4627_v19 = vpop.permute.xlu1 %4626  ;;  %v4642_v34 = vpop.permute.xlu0 %4641  ;;  %v3151_v49 = vsel %vm1359_vm7, %v3119_v60, %v4623_v1  ;;  %v3152_v24 = vsel %vm1359_vm7, %v3120_v31, %v4624_v20 }
 0x4cc   : > { %v4644_v39 = vunpack.i.h.bf16 %v4642_v34  ;;  %v4643_v25 = vunpack.i.l.bf16 %v4642_v34  ;;  %v3183_v9 = vsel %vm1392_vm8, %v3151_v49, %v4633_v23  ;;  %v3184_v29 = vsel %vm1392_vm8, %v3152_v24, %v4634_v12 }
 0x4cd   : > { %v4629_v3 = vunpack.i.h.bf16 %v4627_v19  ;;  %v4628_v6 = vunpack.i.l.bf16 %v4627_v19 }
 0x4ce   : > { %v3215_v10 = vsel %vm1425_vm9, %v3183_v9, %v4643_v25  ;;  %v3216_v46 = vsel %vm1425_vm9, %v3184_v29, %v4644_v39 }
 0x4cf   : > { %v4637_v13 = vpop.permute.xlu1 %4636  ;;  %v4652_v17 = vpop.permute.xlu0 %4651  ;;  %v3136_v8 = vsel %vm1359_vm7, %v3104_v57, %v4629_v3  ;;  %v3135_v54 = vsel %vm1359_vm7, %v3103_v53, %v4628_v6 }
 0x4d0   : > { %v4654_v51 = vunpack.i.h.bf16 %v4652_v17  ;;  %v4653_v5 = vunpack.i.l.bf16 %v4652_v17  ;;  %v4639_v50 = vunpack.i.h.bf16 %v4637_v13  ;;  %v4638_v30 = vunpack.i.l.bf16 %v4637_v13 }
 0x4d2   : > { %v3247_v43 = vsel %vm1458_vm10, %v3215_v10, %v4653_v5  ;;  %v3248_v56 = vsel %vm1458_vm10, %v3216_v46, %v4654_v51  ;;  %v3167_v31 = vsel %vm1392_vm8, %v3135_v54, %v4638_v30  ;;  %v3168_v60 = vsel %vm1392_vm8, %v3136_v8, %v4639_v50 }
 0x4d3   : > { %v4647_v59 = vpop.permute.xlu1 %4646  ;;  %v4662_v40 = vpop.permute.xlu0 %4661 }
 0x4d4   : > { %v4664_v58 = vunpack.i.h.bf16 %v4662_v40  ;;  %v4663_v48 = vunpack.i.l.bf16 %v4662_v40  ;;  %v4649_v45 = vunpack.i.h.bf16 %v4647_v59  ;;  %v4648_v62 = vunpack.i.l.bf16 %v4647_v59 }
 0x4d6   : > { %v3375_v63 = vsel %vm1496_vm11, %v3247_v43, %v4663_v48  ;;  %v3376_v27 = vsel %vm1496_vm11, %v3248_v56, %v4664_v58  ;;  %v3199_v34 = vsel %vm1425_vm9, %v3167_v31, %v4648_v62  ;;  %v3200_v20 = vsel %vm1425_vm9, %v3168_v60, %v4649_v45 }
 0x4d7   : > { %v3895_v0 = vpack.c.bf16 %v3376_v27, %v3375_v63  ;;  %v4657_v52 = vpop.permute.xlu1 %4656 }
 0x4d8   : > { %v4659_v36 = vunpack.i.h.bf16 %v4657_v52  ;;  %v4658_v15 = vunpack.i.l.bf16 %v4657_v52 }
 0x4d9   : > { %3897 = vmatprep.subr.msk.bf16.mxu1 %vm7855_vm14, %v3895_v0 }
 0x4da   : > { %v3231_v23 = vsel %vm1458_vm10, %v3199_v34, %v4658_v15  ;;  %v3232_v41 = vsel %vm1458_vm10, %v3200_v20, %v4659_v36 }
 0x4db   : > { %v4667_v19 = vpop.permute.xlu1 %4666 }
 0x4dc   : > { %v4669_v1 = vunpack.i.h.bf16 %v4667_v19  ;;  %v4668_v12 = vunpack.i.l.bf16 %v4667_v19 }
 0x4de   : > { %v3359_v28 = vsel %vm1496_vm11, %v3231_v23, %v4668_v12  ;;  %v3360_v37 = vsel %vm1496_vm11, %v3232_v41, %v4669_v1 }
 0x4df   : > { %v3898_v49 = vpack.c.bf16 %v3360_v37, %v3359_v28 }
 0x4e1   : > { %3900 = vmatpush3.bf16.xpose.msk.msra.mxu1 %vm7855_vm14, %v3898_v49 }
 0x4e8   : > { %3786 = vmatmul.mubr.msk.f32.vlgmr.msra.gmra.mrb[0].mxu1 %vm3378_vm13, %v8009_v38 }
 0x5bb   : > { %v3544_v24 = vpop.f32.mrb[0].mxu1 }
 0x5bc   : > { %v3549_v16 = vmax.f32 %v3544_v24, 0.0  ;;  %v3553_v14 = vrot.slane %v3544_v24, 4  ;;  %v3546_v13 = vpop.f32.mrb[1].mxu1 }
 0x5bd   : > { %v3550_v17 = vmax.f32 %v3546_v13, 0.0  ;;  %v3554_v39 = vrot.slane %v3546_v13, 4 }
 0x5be   : > { %v3557_v25 = vadd.f32 %v3553_v14, %v3549_v16 }
 0x5bf   : > { %v3558_v9 = vadd.f32 %v3554_v39, %v3550_v17 }
 0x5c1   : > { %v3561_v29 = vcombine.low %v3557_v25, %v3558_v9 }
 0x5c3   : > { %3563 = vst [vmem:[%s163_s6] sm:$0xff] %v3561_v29 }
 0x5c4   : > { %4715 = shalt.err (!%p4712_p3)
}
 0x5c5   : > { %s4716_s25 = scalar_lea.hbm %s8392_s11, 128  ;;  %s4720_s9 = scalar_lea.hbm %s8437_s3, 256 }
 0x5c6   : > { %p4717_p4 = scmp.ne.s32.totalorder %s8392_s11, %s4716_s25  ;;  %p4721_p9 = scmp.lt.u32.totalorder %s8392_s11, %s8437_s3 }
 0x5c7   : > { %p4722_p10 = scmp.lt.u32.totalorder %s4720_s9, %s4716_s25  ;;  %p4724_p12 = scmp.lt.u32.totalorder %s4716_s25, %s8392_s11 }
 0x5c8   : > { %p4718_p7 = pnand %p4717_p4, %p4834_p5 }
 0x5c9   : > { %p4723_p11 = por %p4722_p10, %p4721_p9 }
 0x5ca   : > { %p4719_p8 = pneg %p4718_p7 }
 0x5cb   : > { %p4725_p13 = por %p4724_p12, %p4723_p11 }
 0x5cd   : > { %p4726_p0 = pnand %p4725_p13, %p4719_p8 }
 0x5cf   : > { %4729 = shalt.err (!%p4726_p0)
}
 0x5d0   : > { %3902 = dma.vmem_to_hbm [thread:$0]  (%p4834_p5), %s8394_s7, 128, %s8392_s11, %s3565_s17  }
 0x5d1 PF: > { %p3908_p1 = scmp.ge.s32.totalorder %s4764_s15, 2  ;;  %s3591_s30 = sand.u32 1, %s4752_s12  }
 0x5d2   : > { %s3592_s4 = scalar_lea.sflag [#allocation3], %s3591_s30 }
 0x5d3   : > { %p3905_p2 = pnand %p3908_p1, %p4838_p6 }
 0x5d5   : > { %4747 = dma.done.wait (!%p3905_p2), %s3592_s4, 128  }
 0x5d6   : > { %4749 = vsyncadd (!%p3905_p2), %s3592_s4, 4294967168  ;;  %p13_p3 = scmp.ge.s32.totalorder %s4821_s18, 4   ;;  %s9339_s12 = smov %s4756_s13 }
 0x5d7   : > { %s9340_s13 = smov %s4760_s14  ;;  %s9341_s14 = smov %s4832_s21 }
 0x5d8   : > { %s9342_s15 = smov %s4821_s18  ;;  %15 = sbr.rel (!%p13_p3) target bundleno = 3 (0x3), region = 67 }
 0x5df   :  { %3597 = vsyncpa [#allocation3], 1 }
 0x5e0   :  { %3599 = vsyncpa [#allocation3 + $0x1], 1 }

</bundles_post_ra>
